<compile_context>
chip_gen: v5e
topology: v5e:2x2
jax: 0.10.0
libtpu: 0.0.40
codegen_flags: <defaults>
</compile_context>

<pallas_src>
import functools

import numpy as np
import jax
import jax.numpy as jnp
from jax.experimental import pallas as pl
from jax.experimental.pallas import tpu as pltpu

CONV_CH = 16     # both convs have 16 output channels (fixed by the module)
_LANE = 128


def _round_up(x, m):
    return (x + m - 1) // m * m


# ----------------------------------------------------------------------------
# Fused kernel: conv1 + ReLU + conv2 + ReLU + flatten + Linear + ReLU
# ----------------------------------------------------------------------------
def _cnn_fused_kernel(x_ref, a_ref, b1_ref, c_ref, b2_ref, wfc_ref, bfc_ref,
                      o_ref):
    # x_ref:   (H, TB, 128)  bf16   input rows, (w, c) lane order, zero padded
    # a_ref:   (256, 256)    bf16   conv1 banded weight, kh taps stacked on K
    # c_ref:   (512, 256)    bf16   conv2 banded weight, kh taps stacked on K
    # wfc_ref: (H2, 256, 128) bf16  FC weight, one K-slab per conv2 output row
    # o_ref:   (TB, 128)     f32
    H, TB, _ = x_ref.shape
    H2 = H - 2
    n_out = o_ref.shape[-1]

    # Loop-invariant bias broadcasts, hoisted out of the row loops.
    b1b = jnp.broadcast_to(b1_ref[...], (TB, b1_ref.shape[-1]))
    b2b = jnp.broadcast_to(b2_ref[...], (TB, b2_ref.shape[-1]))

    def conv1_row(h):
        # Fold both kh taps into one K=256 matmul: the two input rows are each
        # a full 128-lane tile, so the concat is tile-aligned (no lane shifts).
        xc = jnp.concatenate([x_ref[h], x_ref[h + 1]], axis=-1)      # (TB, 256)
        yh = jnp.dot(xc, a_ref[...], preferred_element_type=jnp.float32)
        return jnp.maximum(yh + b1b, 0.0).astype(jnp.bfloat16)       # (TB, 256)

    # Stream conv1 rows into conv2 + FC; only two conv1 rows are live at once.
    acc = jnp.broadcast_to(bfc_ref[...], (TB, n_out))                # (TB, 128)
    y_prev = conv1_row(0)
    for h in range(H2):                                              # static unroll
        y_next = conv1_row(h + 1)
        yc = jnp.concatenate([y_prev, y_next], axis=-1)              # (TB, 512)
        zh = jnp.dot(yc, c_ref[...], preferred_element_type=jnp.float32)
        zh = jnp.maximum(zh + b2b, 0.0).astype(jnp.bfloat16)         # (TB, 256)
        acc = acc + jnp.dot(zh, wfc_ref[h],
                            preferred_element_type=jnp.float32)      # (TB, 128)
        y_prev = y_next
    o_ref[...] = jnp.maximum(acc, 0.0)


def _fused_cnn(x3, a, b1, c, b2, wfc, bfc, tb):
    """One pallas_call for the whole CNN head.  x3: (H, B_pad, 128) bf16."""
    H, b_pad, _ = x3.shape
    n_out = bfc.shape[-1]
    nb = b_pad // tb

    def const_spec(arr):
        return pl.BlockSpec(arr.shape, lambda i, _nd=arr.ndim: (0,) * _nd)

    return pl.pallas_call(
        _cnn_fused_kernel,
        out_shape=jax.ShapeDtypeStruct((b_pad, n_out), jnp.float32),
        grid=(nb,),
        in_specs=[pl.BlockSpec((H, tb, _LANE), lambda i: (0, i, 0)),
                  const_spec(a), const_spec(b1), const_spec(c),
                  const_spec(b2), const_spec(wfc), const_spec(bfc)],
        out_specs=pl.BlockSpec((tb, n_out), lambda i: (i, 0)),
        compiler_params=pltpu.CompilerParams(
            dimension_semantics=("parallel",)),
    )(x3, a, b1, c, b2, wfc, bfc)


# ----------------------------------------------------------------------------
# Parameters (deterministic, kaiming-normal weights like layer_init)
# ----------------------------------------------------------------------------
def init_params(key, c_in, hidden_size, ac=True):
    ol = hidden_size * 2 if ac else hidden_size
    k1, k2, k3, k4, k5, k6 = jax.random.split(key, 6)

    def kaiming(k, shape, fan_in):
        return jax.random.normal(k, shape, jnp.float32) * np.sqrt(2.0 / fan_in)

    def bias(k, shape, fan_in):
        bound = 1.0 / np.sqrt(fan_in)
        return jax.random.uniform(k, shape, jnp.float32, -bound, bound)

    return dict(
        w1=kaiming(k1, (CONV_CH, c_in, 2, 2), c_in * 4),
        b1=bias(k4, (CONV_CH,), c_in * 4),
        w2=kaiming(k2, (CONV_CH, CONV_CH, 2, 2), CONV_CH * 4),
        b2=bias(k5, (CONV_CH,), CONV_CH * 4),
        wfc=kaiming(k3, (ol, 1728), 1728),
        bfc=bias(k6, (ol,), 1728),
    )


# ----------------------------------------------------------------------------
# One-time weight packing (all relayout work hoisted out of the hot path)
# ----------------------------------------------------------------------------
def _pack_conv_weight(wt, w_in, c_in, k_pad, n_pad):
    """(C_out, C_in, 2, 2) torch conv weight -> (2*k_pad, n_pad) banded matrix.

    The kw direction of the 2x2 conv is the band; the kh direction is handled
    in-kernel by lane-concatenating two adjacent input rows (each padded to
    k_pad lanes), so the two kh slabs are stacked along K here."""
    c_out = wt.shape[0]
    kh_sz, kw_sz = wt.shape[2], wt.shape[3]
    w_out = w_in - 1
    full = np.zeros((kh_sz * k_pad, n_pad), np.float32)
    for kh in range(kh_sz):
        for kw in range(kw_sz):
            blk = wt[:, :, kh, kw].T                       # (C_in, C_out)
            for wo in range(w_out):
                wi = wo + kw
                r0 = kh * k_pad + wi * c_in
                c0 = wo * c_out
                full[r0:r0 + c_in, c0:c0 + c_out] = blk
    return full


def pack_params(params, size_ob):
    c_in, h, w = size_ob
    w1_, h2, w2 = w - 1, h - 2, w - 2
    assert w * c_in <= _LANE, "per-row input lanes must fit one 128-lane tile"

    wt1 = np.asarray(params["w1"], np.float32)
    wt2 = np.asarray(params["w2"], np.float32)
    wfc = np.asarray(params["wfc"], np.float32)
    ol = wfc.shape[0]
    assert wfc.shape[1] == CONV_CH * h2 * w2            # = 1728 for (4,11,14)

    k1_pad = _LANE                                      # input row lane pad
    n1_pad = _round_up(w1_ * CONV_CH, _LANE)            # 208 -> 256
    n2_pad = _round_up(w2 * CONV_CH, _LANE)             # 192 -> 256
    n_fc = _round_up(ol, _LANE)                         # 64  -> 128

    a = _pack_conv_weight(wt1, w, c_in, k1_pad, n1_pad)        # (256, 256)
    cw = _pack_conv_weight(wt2, w1_, CONV_CH, n1_pad, n2_pad)  # (512, 256)

    b1 = np.zeros((1, n1_pad), np.float32)
    b1[0, :w1_ * CONV_CH] = np.tile(np.asarray(params["b1"], np.float32), w1_)
    b2 = np.zeros((1, n2_pad), np.float32)
    b2[0, :w2 * CONV_CH] = np.tile(np.asarray(params["b2"], np.float32), w2)

    # Torch Flatten order on NCHW is (c, h2, w2); the kernel's per-row K order
    # is (w2, c) -> permute FC weight columns once here; pad K per row to 256
    # lanes and outputs to 128 lanes.
    wfc4 = wfc.reshape(ol, CONV_CH, h2, w2).transpose(2, 3, 1, 0)  # (h2,w2,c,o)
    wfc3 = np.zeros((h2, n1_pad, n_fc), np.float32)
    wfc3 = np.zeros((h2, n2_pad, n_fc), np.float32)
    wfc3[:, :w2 * CONV_CH, :ol] = wfc4.reshape(h2, w2 * CONV_CH, ol)
    bfc = np.zeros((1, n_fc), np.float32)
    bfc[0, :ol] = np.asarray(params["bfc"], np.float32)

    return dict(
        a=jnp.asarray(a, jnp.bfloat16),
        b1=jnp.asarray(b1, jnp.float32),
        c=jnp.asarray(cw, jnp.bfloat16),
        b2=jnp.asarray(b2, jnp.float32),
        wfc=jnp.asarray(wfc3, jnp.bfloat16),
        bfc=jnp.asarray(bfc, jnp.float32),
    )


# ----------------------------------------------------------------------------
# Forward pass, mirroring CNN_layers.forward
# ----------------------------------------------------------------------------
@functools.partial(jax.jit, static_argnames=("hidden_size", "out_features"))
def cnn_layers_forward(ob, packed, *, hidden_size, out_features):
    x = ob.astype(jnp.float32)                          # ob.float()
    b, c, h, w = x.shape
    tb = min(256, _round_up(b, 8))                      # batch tile (M per matmul)
    b_pad = _round_up(b, tb)
    # (B,C,H,W) -> (H, B, W*C) row layout, zero-padded to 128 lanes / tb batch.
    x3 = x.transpose(2, 0, 3, 1).reshape(h, b, w * c)
    x3 = jnp.pad(x3, ((0, 0), (0, b_pad - b), (0, _LANE - w * c)))
    x3 = x3.astype(jnp.bfloat16)

    feats = _fused_cnn(x3, packed["a"], packed["b1"], packed["c"],
                       packed["b2"], packed["wfc"], packed["bfc"], tb)
    feats = feats[:b, :out_features]
    # torch.split(features, hidden_size, dim=1) -- keeps a remainder chunk.
    chunks, start = [], 0
    while start < out_features:
        end = min(start + hidden_size, out_features)
        chunks.append(feats[:, start:end])
        start = end
    return tuple(chunks)


# ----------------------------------------------------------------------------
# Pure-JAX f32 reference (for a numerical sanity check only)
# ----------------------------------------------------------------------------
def _reference_forward(ob, params, hidden_size, out_features):
    x = ob.astype(jnp.float32)
    dn = ("NCHW", "OIHW", "NCHW")
    y = jax.lax.conv_general_dilated(x, params["w1"], (1, 1), "VALID",
                                     dimension_numbers=dn)
    y = jnp.maximum(y + params["b1"][None, :, None, None], 0.0)
    z = jax.lax.conv_general_dilated(y, params["w2"], (1, 1), "VALID",
                                     dimension_numbers=dn)
    z = jnp.maximum(z + params["b2"][None, :, None, None], 0.0)
    flat = z.reshape(z.shape[0], -1)
    f = jnp.maximum(flat @ params["wfc"].T + params["bfc"][None, :], 0.0)
    chunks, start = [], 0
    while start < out_features:
        end = min(start + hidden_size, out_features)
        chunks.append(f[:, start:end])
        start = end
    return tuple(chunks)


if __name__ == "__main__":
    key = jax.random.PRNGKey(0)
    k_x, k_p = jax.random.split(key)

    # size_ob = (4, 11, 14): two 2x2 convs -> 16 * 9 * 12 = 1728 flat features,
    # matching Linear(1728, .).  hidden=32, ac=True -> ol_size = 64.
    B, C, H, W = 2, 4, 11, 14
    hidden_size = 32
    out_features = hidden_size * 2          # ac=True

    ob = jax.random.normal(k_x, (B, C, H, W), jnp.float32)
    params = init_params(k_p, C, hidden_size, ac=True)
    packed = pack_params(params, (C, H, W))

    outs = cnn_layers_forward(ob, packed, hidden_size=hidden_size,
                              out_features=out_features)
    outs = jax.block_until_ready(outs)

    assert len(outs) == 2
    assert all(o.shape == (B, hidden_size) for o in outs)

    # Numerical sanity vs. f32 reference (bf16 MXU inputs -> loose tolerance).
    refs = _reference_forward(ob, params, hidden_size, out_features)
    for got, ref in zip(outs, refs):
        assert float(jnp.max(jnp.abs(got - ref))) < 0.25

    print("KERNEL_OK")
</pallas_src>

<mosaic_0001>
module attributes {stable_mosaic.version = 11 : i64} {
  func.func @_cnn_fused_kernel(%arg0: i32, %arg1: memref<11x8x128xbf16, #tpu.memory_space<vmem>>, %arg2: memref<256x256xbf16, #tpu.memory_space<vmem>>, %arg3: memref<1x256xf32, #tpu.memory_space<vmem>>, %arg4: memref<512x256xbf16, #tpu.memory_space<vmem>>, %arg5: memref<1x256xf32, #tpu.memory_space<vmem>>, %arg6: memref<9x256x128xbf16, #tpu.memory_space<vmem>>, %arg7: memref<1x128xf32, #tpu.memory_space<vmem>>, %arg8: memref<8x128xf32, #tpu.memory_space<vmem>>) attributes {dimension_semantics = [#tpu.dimension_semantics<parallel>], iteration_bounds = array<i64: 1>, scalar_prefetch = 0 : i64, scratch_operands = 0 : i64, tpu.core_type = #tpu.core_type<tc>, window_params = [{transform_indices = @transform_0, window_bounds = array<i64: 11, 8, 128>}, {pipeline_mode = #tpu.pipeline_mode<synchronous>, transform_indices = @transform_1, window_bounds = array<i64: 256, 256>}, {pipeline_mode = #tpu.pipeline_mode<synchronous>, transform_indices = @transform_2, window_bounds = array<i64: 1, 256>}, {pipeline_mode = #tpu.pipeline_mode<synchronous>, transform_indices = @transform_3, window_bounds = array<i64: 512, 256>}, {pipeline_mode = #tpu.pipeline_mode<synchronous>, transform_indices = @transform_4, window_bounds = array<i64: 1, 256>}, {pipeline_mode = #tpu.pipeline_mode<synchronous>, transform_indices = @transform_5, window_bounds = array<i64: 9, 256, 128>}, {pipeline_mode = #tpu.pipeline_mode<synchronous>, transform_indices = @transform_6, window_bounds = array<i64: 1, 128>}, {transform_indices = @transform_7, window_bounds = array<i64: 8, 128>}]} {
    %c0 = arith.constant 0 : index
    %c0_0 = arith.constant 0 : index
    %0 = vector.load %arg3[%c0, %c0_0] : memref<1x256xf32, #tpu.memory_space<vmem>>, vector<1x256xf32>
    %1 = vector.shape_cast %0 : vector<1x256xf32> to vector<1x256xf32>
    %2 = vector.broadcast %1 : vector<1x256xf32> to vector<8x256xf32>
    %c0_1 = arith.constant 0 : index
    %c0_2 = arith.constant 0 : index
    %3 = vector.load %arg5[%c0_1, %c0_2] : memref<1x256xf32, #tpu.memory_space<vmem>>, vector<1x256xf32>
    %4 = vector.shape_cast %3 : vector<1x256xf32> to vector<1x256xf32>
    %5 = vector.broadcast %4 : vector<1x256xf32> to vector<8x256xf32>
    %c0_3 = arith.constant 0 : index
    %c0_4 = arith.constant 0 : index
    %6 = vector.load %arg7[%c0_3, %c0_4] : memref<1x128xf32, #tpu.memory_space<vmem>>, vector<1x128xf32>
    %7 = vector.shape_cast %6 : vector<1x128xf32> to vector<1x128xf32>
    %8 = vector.broadcast %7 : vector<1x128xf32> to vector<8x128xf32>
    %c0_5 = arith.constant 0 : index
    %c0_6 = arith.constant 0 : index
    %c0_7 = arith.constant 0 : index
    %9 = vector.load %arg1[%c0_5, %c0_6, %c0_7] : memref<11x8x128xbf16, #tpu.memory_space<vmem>>, vector<1x8x128xbf16>
    %10 = vector.shape_cast %9 : vector<1x8x128xbf16> to vector<8x128xbf16>
    %c1 = arith.constant 1 : index
    %c0_8 = arith.constant 0 : index
    %c0_9 = arith.constant 0 : index
    %11 = vector.load %arg1[%c1, %c0_8, %c0_9] : memref<11x8x128xbf16, #tpu.memory_space<vmem>>, vector<1x8x128xbf16>
    %12 = vector.shape_cast %11 : vector<1x8x128xbf16> to vector<8x128xbf16>
    %13 = tpu.concatenate %10, %12 in 1 : vector<8x128xbf16>, vector<8x128xbf16> -> vector<8x256xbf16>
    %c0_10 = arith.constant 0 : index
    %c0_11 = arith.constant 0 : index
    %14 = vector.load %arg2[%c0_10, %c0_11] : memref<256x256xbf16, #tpu.memory_space<vmem>>, vector<256x256xbf16>
    %cst = arith.constant dense<0.000000e+00> : vector<8x256xf32>
    %15 = tpu.matmul %13, %14, %cst {dimension_numbers = #tpu.dot_dimension_numbers<[1], [0], [0], [1], [0, 0, 1, 1], [], []>} : vector<8x256xbf16>, vector<256x256xbf16>, vector<8x256xf32> -> vector<8x256xf32>
    %16 = arith.addf %15, %2 : vector<8x256xf32>
    %cst_12 = arith.constant 0.000000e+00 : f32
    %17 = vector.broadcast %cst_12 : f32 to vector<8x256xf32>
    %18 = arith.maximumf %16, %17 : vector<8x256xf32>
    %19 = arith.truncf %18 : vector<8x256xf32> to vector<8x256xbf16>
    %c1_13 = arith.constant 1 : index
    %c0_14 = arith.constant 0 : index
    %c0_15 = arith.constant 0 : index
    %20 = vector.load %arg1[%c1_13, %c0_14, %c0_15] : memref<11x8x128xbf16, #tpu.memory_space<vmem>>, vector<1x8x128xbf16>
    %21 = vector.shape_cast %20 : vector<1x8x128xbf16> to vector<8x128xbf16>
    %c2 = arith.constant 2 : index
    %c0_16 = arith.constant 0 : index
    %c0_17 = arith.constant 0 : index
    %22 = vector.load %arg1[%c2, %c0_16, %c0_17] : memref<11x8x128xbf16, #tpu.memory_space<vmem>>, vector<1x8x128xbf16>
    %23 = vector.shape_cast %22 : vector<1x8x128xbf16> to vector<8x128xbf16>
    %24 = tpu.concatenate %21, %23 in 1 : vector<8x128xbf16>, vector<8x128xbf16> -> vector<8x256xbf16>
    %c0_18 = arith.constant 0 : index
    %c0_19 = arith.constant 0 : index
    %25 = vector.load %arg2[%c0_18, %c0_19] : memref<256x256xbf16, #tpu.memory_space<vmem>>, vector<256x256xbf16>
    %cst_20 = arith.constant dense<0.000000e+00> : vector<8x256xf32>
    %26 = tpu.matmul %24, %25, %cst_20 {dimension_numbers = #tpu.dot_dimension_numbers<[1], [0], [0], [1], [0, 0, 1, 1], [], []>} : vector<8x256xbf16>, vector<256x256xbf16>, vector<8x256xf32> -> vector<8x256xf32>
    %27 = arith.addf %26, %2 : vector<8x256xf32>
    %cst_21 = arith.constant 0.000000e+00 : f32
    %28 = vector.broadcast %cst_21 : f32 to vector<8x256xf32>
    %29 = arith.maximumf %27, %28 : vector<8x256xf32>
    %30 = arith.truncf %29 : vector<8x256xf32> to vector<8x256xbf16>
    %31 = tpu.concatenate %19, %30 in 1 : vector<8x256xbf16>, vector<8x256xbf16> -> vector<8x512xbf16>
    %c0_22 = arith.constant 0 : index
    %c0_23 = arith.constant 0 : index
    %32 = vector.load %arg4[%c0_22, %c0_23] : memref<512x256xbf16, #tpu.memory_space<vmem>>, vector<512x256xbf16>
    %cst_24 = arith.constant dense<0.000000e+00> : vector<8x256xf32>
    %33 = tpu.matmul %31, %32, %cst_24 {dimension_numbers = #tpu.dot_dimension_numbers<[1], [0], [0], [1], [0, 0, 1, 1], [], []>} : vector<8x512xbf16>, vector<512x256xbf16>, vector<8x256xf32> -> vector<8x256xf32>
    %34 = arith.addf %33, %5 : vector<8x256xf32>
    %cst_25 = arith.constant 0.000000e+00 : f32
    %35 = vector.broadcast %cst_25 : f32 to vector<8x256xf32>
    %36 = arith.maximumf %34, %35 : vector<8x256xf32>
    %37 = arith.truncf %36 : vector<8x256xf32> to vector<8x256xbf16>
    %c0_26 = arith.constant 0 : index
    %c0_27 = arith.constant 0 : index
    %c0_28 = arith.constant 0 : index
    %38 = vector.load %arg6[%c0_26, %c0_27, %c0_28] : memref<9x256x128xbf16, #tpu.memory_space<vmem>>, vector<1x256x128xbf16>
    %39 = vector.shape_cast %38 : vector<1x256x128xbf16> to vector<256x128xbf16>
    %cst_29 = arith.constant dense<0.000000e+00> : vector<8x128xf32>
    %40 = tpu.matmul %37, %39, %cst_29 {dimension_numbers = #tpu.dot_dimension_numbers<[1], [0], [0], [1], [0, 0, 1, 1], [], []>} : vector<8x256xbf16>, vector<256x128xbf16>, vector<8x128xf32> -> vector<8x128xf32>
    %41 = arith.addf %8, %40 : vector<8x128xf32>
    %c2_30 = arith.constant 2 : index
    %c0_31 = arith.constant 0 : index
    %c0_32 = arith.constant 0 : index
    %42 = vector.load %arg1[%c2_30, %c0_31, %c0_32] : memref<11x8x128xbf16, #tpu.memory_space<vmem>>, vector<1x8x128xbf16>
    %43 = vector.shape_cast %42 : vector<1x8x128xbf16> to vector<8x128xbf16>
    %c3 = arith.constant 3 : index
    %c0_33 = arith.constant 0 : index
    %c0_34 = arith.constant 0 : index
    %44 = vector.load %arg1[%c3, %c0_33, %c0_34] : memref<11x8x128xbf16, #tpu.memory_space<vmem>>, vector<1x8x128xbf16>
    %45 = vector.shape_cast %44 : vector<1x8x128xbf16> to vector<8x128xbf16>
    %46 = tpu.concatenate %43, %45 in 1 : vector<8x128xbf16>, vector<8x128xbf16> -> vector<8x256xbf16>
    %c0_35 = arith.constant 0 : index
    %c0_36 = arith.constant 0 : index
    %47 = vector.load %arg2[%c0_35, %c0_36] : memref<256x256xbf16, #tpu.memory_space<vmem>>, vector<256x256xbf16>
    %cst_37 = arith.constant dense<0.000000e+00> : vector<8x256xf32>
    %48 = tpu.matmul %46, %47, %cst_37 {dimension_numbers = #tpu.dot_dimension_numbers<[1], [0], [0], [1], [0, 0, 1, 1], [], []>} : vector<8x256xbf16>, vector<256x256xbf16>, vector<8x256xf32> -> vector<8x256xf32>
    %49 = arith.addf %48, %2 : vector<8x256xf32>
    %cst_38 = arith.constant 0.000000e+00 : f32
    %50 = vector.broadcast %cst_38 : f32 to vector<8x256xf32>
    %51 = arith.maximumf %49, %50 : vector<8x256xf32>
    %52 = arith.truncf %51 : vector<8x256xf32> to vector<8x256xbf16>
    %53 = tpu.concatenate %30, %52 in 1 : vector<8x256xbf16>, vector<8x256xbf16> -> vector<8x512xbf16>
    %c0_39 = arith.constant 0 : index
    %c0_40 = arith.constant 0 : index
    %54 = vector.load %arg4[%c0_39, %c0_40] : memref<512x256xbf16, #tpu.memory_space<vmem>>, vector<512x256xbf16>
    %cst_41 = arith.constant dense<0.000000e+00> : vector<8x256xf32>
    %55 = tpu.matmul %53, %54, %cst_41 {dimension_numbers = #tpu.dot_dimension_numbers<[1], [0], [0], [1], [0, 0, 1, 1], [], []>} : vector<8x512xbf16>, vector<512x256xbf16>, vector<8x256xf32> -> vector<8x256xf32>
    %56 = arith.addf %55, %5 : vector<8x256xf32>
    %cst_42 = arith.constant 0.000000e+00 : f32
    %57 = vector.broadcast %cst_42 : f32 to vector<8x256xf32>
    %58 = arith.maximumf %56, %57 : vector<8x256xf32>
    %59 = arith.truncf %58 : vector<8x256xf32> to vector<8x256xbf16>
    %c1_43 = arith.constant 1 : index
    %c0_44 = arith.constant 0 : index
    %c0_45 = arith.constant 0 : index
    %60 = vector.load %arg6[%c1_43, %c0_44, %c0_45] : memref<9x256x128xbf16, #tpu.memory_space<vmem>>, vector<1x256x128xbf16>
    %61 = vector.shape_cast %60 : vector<1x256x128xbf16> to vector<256x128xbf16>
    %cst_46 = arith.constant dense<0.000000e+00> : vector<8x128xf32>
    %62 = tpu.matmul %59, %61, %cst_46 {dimension_numbers = #tpu.dot_dimension_numbers<[1], [0], [0], [1], [0, 0, 1, 1], [], []>} : vector<8x256xbf16>, vector<256x128xbf16>, vector<8x128xf32> -> vector<8x128xf32>
    %63 = arith.addf %41, %62 : vector<8x128xf32>
    %c3_47 = arith.constant 3 : index
    %c0_48 = arith.constant 0 : index
    %c0_49 = arith.constant 0 : index
    %64 = vector.load %arg1[%c3_47, %c0_48, %c0_49] : memref<11x8x128xbf16, #tpu.memory_space<vmem>>, vector<1x8x128xbf16>
    %65 = vector.shape_cast %64 : vector<1x8x128xbf16> to vector<8x128xbf16>
    %c4 = arith.constant 4 : index
    %c0_50 = arith.constant 0 : index
    %c0_51 = arith.constant 0 : index
    %66 = vector.load %arg1[%c4, %c0_50, %c0_51] : memref<11x8x128xbf16, #tpu.memory_space<vmem>>, vector<1x8x128xbf16>
    %67 = vector.shape_cast %66 : vector<1x8x128xbf16> to vector<8x128xbf16>
    %68 = tpu.concatenate %65, %67 in 1 : vector<8x128xbf16>, vector<8x128xbf16> -> vector<8x256xbf16>
    %c0_52 = arith.constant 0 : index
    %c0_53 = arith.constant 0 : index
    %69 = vector.load %arg2[%c0_52, %c0_53] : memref<256x256xbf16, #tpu.memory_space<vmem>>, vector<256x256xbf16>
    %cst_54 = arith.constant dense<0.000000e+00> : vector<8x256xf32>
    %70 = tpu.matmul %68, %69, %cst_54 {dimension_numbers = #tpu.dot_dimension_numbers<[1], [0], [0], [1], [0, 0, 1, 1], [], []>} : vector<8x256xbf16>, vector<256x256xbf16>, vector<8x256xf32> -> vector<8x256xf32>
    %71 = arith.addf %70, %2 : vector<8x256xf32>
    %cst_55 = arith.constant 0.000000e+00 : f32
    %72 = vector.broadcast %cst_55 : f32 to vector<8x256xf32>
    %73 = arith.maximumf %71, %72 : vector<8x256xf32>
    %74 = arith.truncf %73 : vector<8x256xf32> to vector<8x256xbf16>
    %75 = tpu.concatenate %52, %74 in 1 : vector<8x256xbf16>, vector<8x256xbf16> -> vector<8x512xbf16>
    %c0_56 = arith.constant 0 : index
    %c0_57 = arith.constant 0 : index
    %76 = vector.load %arg4[%c0_56, %c0_57] : memref<512x256xbf16, #tpu.memory_space<vmem>>, vector<512x256xbf16>
    %cst_58 = arith.constant dense<0.000000e+00> : vector<8x256xf32>
    %77 = tpu.matmul %75, %76, %cst_58 {dimension_numbers = #tpu.dot_dimension_numbers<[1], [0], [0], [1], [0, 0, 1, 1], [], []>} : vector<8x512xbf16>, vector<512x256xbf16>, vector<8x256xf32> -> vector<8x256xf32>
    %78 = arith.addf %77, %5 : vector<8x256xf32>
    %cst_59 = arith.constant 0.000000e+00 : f32
    %79 = vector.broadcast %cst_59 : f32 to vector<8x256xf32>
    %80 = arith.maximumf %78, %79 : vector<8x256xf32>
    %81 = arith.truncf %80 : vector<8x256xf32> to vector<8x256xbf16>
    %c2_60 = arith.constant 2 : index
    %c0_61 = arith.constant 0 : index
    %c0_62 = arith.constant 0 : index
    %82 = vector.load %arg6[%c2_60, %c0_61, %c0_62] : memref<9x256x128xbf16, #tpu.memory_space<vmem>>, vector<1x256x128xbf16>
    %83 = vector.shape_cast %82 : vector<1x256x128xbf16> to vector<256x128xbf16>
    %cst_63 = arith.constant dense<0.000000e+00> : vector<8x128xf32>
    %84 = tpu.matmul %81, %83, %cst_63 {dimension_numbers = #tpu.dot_dimension_numbers<[1], [0], [0], [1], [0, 0, 1, 1], [], []>} : vector<8x256xbf16>, vector<256x128xbf16>, vector<8x128xf32> -> vector<8x128xf32>
    %85 = arith.addf %63, %84 : vector<8x128xf32>
    %c4_64 = arith.constant 4 : index
    %c0_65 = arith.constant 0 : index
    %c0_66 = arith.constant 0 : index
    %86 = vector.load %arg1[%c4_64, %c0_65, %c0_66] : memref<11x8x128xbf16, #tpu.memory_space<vmem>>, vector<1x8x128xbf16>
    %87 = vector.shape_cast %86 : vector<1x8x128xbf16> to vector<8x128xbf16>
    %c5 = arith.constant 5 : index
    %c0_67 = arith.constant 0 : index
    %c0_68 = arith.constant 0 : index
    %88 = vector.load %arg1[%c5, %c0_67, %c0_68] : memref<11x8x128xbf16, #tpu.memory_space<vmem>>, vector<1x8x128xbf16>
    %89 = vector.shape_cast %88 : vector<1x8x128xbf16> to vector<8x128xbf16>
    %90 = tpu.concatenate %87, %89 in 1 : vector<8x128xbf16>, vector<8x128xbf16> -> vector<8x256xbf16>
    %c0_69 = arith.constant 0 : index
    %c0_70 = arith.constant 0 : index
    %91 = vector.load %arg2[%c0_69, %c0_70] : memref<256x256xbf16, #tpu.memory_space<vmem>>, vector<256x256xbf16>
    %cst_71 = arith.constant dense<0.000000e+00> : vector<8x256xf32>
    %92 = tpu.matmul %90, %91, %cst_71 {dimension_numbers = #tpu.dot_dimension_numbers<[1], [0], [0], [1], [0, 0, 1, 1], [], []>} : vector<8x256xbf16>, vector<256x256xbf16>, vector<8x256xf32> -> vector<8x256xf32>
    %93 = arith.addf %92, %2 : vector<8x256xf32>
    %cst_72 = arith.constant 0.000000e+00 : f32
    %94 = vector.broadcast %cst_72 : f32 to vector<8x256xf32>
    %95 = arith.maximumf %93, %94 : vector<8x256xf32>
    %96 = arith.truncf %95 : vector<8x256xf32> to vector<8x256xbf16>
    %97 = tpu.concatenate %74, %96 in 1 : vector<8x256xbf16>, vector<8x256xbf16> -> vector<8x512xbf16>
    %c0_73 = arith.constant 0 : index
    %c0_74 = arith.constant 0 : index
    %98 = vector.load %arg4[%c0_73, %c0_74] : memref<512x256xbf16, #tpu.memory_space<vmem>>, vector<512x256xbf16>
    %cst_75 = arith.constant dense<0.000000e+00> : vector<8x256xf32>
    %99 = tpu.matmul %97, %98, %cst_75 {dimension_numbers = #tpu.dot_dimension_numbers<[1], [0], [0], [1], [0, 0, 1, 1], [], []>} : vector<8x512xbf16>, vector<512x256xbf16>, vector<8x256xf32> -> vector<8x256xf32>
    %100 = arith.addf %99, %5 : vector<8x256xf32>
    %cst_76 = arith.constant 0.000000e+00 : f32
    %101 = vector.broadcast %cst_76 : f32 to vector<8x256xf32>
    %102 = arith.maximumf %100, %101 : vector<8x256xf32>
    %103 = arith.truncf %102 : vector<8x256xf32> to vector<8x256xbf16>
    %c3_77 = arith.constant 3 : index
    %c0_78 = arith.constant 0 : index
    %c0_79 = arith.constant 0 : index
    %104 = vector.load %arg6[%c3_77, %c0_78, %c0_79] : memref<9x256x128xbf16, #tpu.memory_space<vmem>>, vector<1x256x128xbf16>
    %105 = vector.shape_cast %104 : vector<1x256x128xbf16> to vector<256x128xbf16>
    %cst_80 = arith.constant dense<0.000000e+00> : vector<8x128xf32>
    %106 = tpu.matmul %103, %105, %cst_80 {dimension_numbers = #tpu.dot_dimension_numbers<[1], [0], [0], [1], [0, 0, 1, 1], [], []>} : vector<8x256xbf16>, vector<256x128xbf16>, vector<8x128xf32> -> vector<8x128xf32>
    %107 = arith.addf %85, %106 : vector<8x128xf32>
    %c5_81 = arith.constant 5 : index
    %c0_82 = arith.constant 0 : index
    %c0_83 = arith.constant 0 : index
    %108 = vector.load %arg1[%c5_81, %c0_82, %c0_83] : memref<11x8x128xbf16, #tpu.memory_space<vmem>>, vector<1x8x128xbf16>
    %109 = vector.shape_cast %108 : vector<1x8x128xbf16> to vector<8x128xbf16>
    %c6 = arith.constant 6 : index
    %c0_84 = arith.constant 0 : index
    %c0_85 = arith.constant 0 : index
    %110 = vector.load %arg1[%c6, %c0_84, %c0_85] : memref<11x8x128xbf16, #tpu.memory_space<vmem>>, vector<1x8x128xbf16>
    %111 = vector.shape_cast %110 : vector<1x8x128xbf16> to vector<8x128xbf16>
    %112 = tpu.concatenate %109, %111 in 1 : vector<8x128xbf16>, vector<8x128xbf16> -> vector<8x256xbf16>
    %c0_86 = arith.constant 0 : index
    %c0_87 = arith.constant 0 : index
    %113 = vector.load %arg2[%c0_86, %c0_87] : memref<256x256xbf16, #tpu.memory_space<vmem>>, vector<256x256xbf16>
    %cst_88 = arith.constant dense<0.000000e+00> : vector<8x256xf32>
    %114 = tpu.matmul %112, %113, %cst_88 {dimension_numbers = #tpu.dot_dimension_numbers<[1], [0], [0], [1], [0, 0, 1, 1], [], []>} : vector<8x256xbf16>, vector<256x256xbf16>, vector<8x256xf32> -> vector<8x256xf32>
    %115 = arith.addf %114, %2 : vector<8x256xf32>
    %cst_89 = arith.constant 0.000000e+00 : f32
    %116 = vector.broadcast %cst_89 : f32 to vector<8x256xf32>
    %117 = arith.maximumf %115, %116 : vector<8x256xf32>
    %118 = arith.truncf %117 : vector<8x256xf32> to vector<8x256xbf16>
    %119 = tpu.concatenate %96, %118 in 1 : vector<8x256xbf16>, vector<8x256xbf16> -> vector<8x512xbf16>
    %c0_90 = arith.constant 0 : index
    %c0_91 = arith.constant 0 : index
    %120 = vector.load %arg4[%c0_90, %c0_91] : memref<512x256xbf16, #tpu.memory_space<vmem>>, vector<512x256xbf16>
    %cst_92 = arith.constant dense<0.000000e+00> : vector<8x256xf32>
    %121 = tpu.matmul %119, %120, %cst_92 {dimension_numbers = #tpu.dot_dimension_numbers<[1], [0], [0], [1], [0, 0, 1, 1], [], []>} : vector<8x512xbf16>, vector<512x256xbf16>, vector<8x256xf32> -> vector<8x256xf32>
    %122 = arith.addf %121, %5 : vector<8x256xf32>
    %cst_93 = arith.constant 0.000000e+00 : f32
    %123 = vector.broadcast %cst_93 : f32 to vector<8x256xf32>
    %124 = arith.maximumf %122, %123 : vector<8x256xf32>
    %125 = arith.truncf %124 : vector<8x256xf32> to vector<8x256xbf16>
    %c4_94 = arith.constant 4 : index
    %c0_95 = arith.constant 0 : index
    %c0_96 = arith.constant 0 : index
    %126 = vector.load %arg6[%c4_94, %c0_95, %c0_96] : memref<9x256x128xbf16, #tpu.memory_space<vmem>>, vector<1x256x128xbf16>
    %127 = vector.shape_cast %126 : vector<1x256x128xbf16> to vector<256x128xbf16>
    %cst_97 = arith.constant dense<0.000000e+00> : vector<8x128xf32>
    %128 = tpu.matmul %125, %127, %cst_97 {dimension_numbers = #tpu.dot_dimension_numbers<[1], [0], [0], [1], [0, 0, 1, 1], [], []>} : vector<8x256xbf16>, vector<256x128xbf16>, vector<8x128xf32> -> vector<8x128xf32>
    %129 = arith.addf %107, %128 : vector<8x128xf32>
    %c6_98 = arith.constant 6 : index
    %c0_99 = arith.constant 0 : index
    %c0_100 = arith.constant 0 : index
    %130 = vector.load %arg1[%c6_98, %c0_99, %c0_100] : memref<11x8x128xbf16, #tpu.memory_space<vmem>>, vector<1x8x128xbf16>
    %131 = vector.shape_cast %130 : vector<1x8x128xbf16> to vector<8x128xbf16>
    %c7 = arith.constant 7 : index
    %c0_101 = arith.constant 0 : index
    %c0_102 = arith.constant 0 : index
    %132 = vector.load %arg1[%c7, %c0_101, %c0_102] : memref<11x8x128xbf16, #tpu.memory_space<vmem>>, vector<1x8x128xbf16>
    %133 = vector.shape_cast %132 : vector<1x8x128xbf16> to vector<8x128xbf16>
    %134 = tpu.concatenate %131, %133 in 1 : vector<8x128xbf16>, vector<8x128xbf16> -> vector<8x256xbf16>
    %c0_103 = arith.constant 0 : index
    %c0_104 = arith.constant 0 : index
    %135 = vector.load %arg2[%c0_103, %c0_104] : memref<256x256xbf16, #tpu.memory_space<vmem>>, vector<256x256xbf16>
    %cst_105 = arith.constant dense<0.000000e+00> : vector<8x256xf32>
    %136 = tpu.matmul %134, %135, %cst_105 {dimension_numbers = #tpu.dot_dimension_numbers<[1], [0], [0], [1], [0, 0, 1, 1], [], []>} : vector<8x256xbf16>, vector<256x256xbf16>, vector<8x256xf32> -> vector<8x256xf32>
    %137 = arith.addf %136, %2 : vector<8x256xf32>
    %cst_106 = arith.constant 0.000000e+00 : f32
    %138 = vector.broadcast %cst_106 : f32 to vector<8x256xf32>
    %139 = arith.maximumf %137, %138 : vector<8x256xf32>
    %140 = arith.truncf %139 : vector<8x256xf32> to vector<8x256xbf16>
    %141 = tpu.concatenate %118, %140 in 1 : vector<8x256xbf16>, vector<8x256xbf16> -> vector<8x512xbf16>
    %c0_107 = arith.constant 0 : index
    %c0_108 = arith.constant 0 : index
    %142 = vector.load %arg4[%c0_107, %c0_108] : memref<512x256xbf16, #tpu.memory_space<vmem>>, vector<512x256xbf16>
    %cst_109 = arith.constant dense<0.000000e+00> : vector<8x256xf32>
    %143 = tpu.matmul %141, %142, %cst_109 {dimension_numbers = #tpu.dot_dimension_numbers<[1], [0], [0], [1], [0, 0, 1, 1], [], []>} : vector<8x512xbf16>, vector<512x256xbf16>, vector<8x256xf32> -> vector<8x256xf32>
    %144 = arith.addf %143, %5 : vector<8x256xf32>
    %cst_110 = arith.constant 0.000000e+00 : f32
    %145 = vector.broadcast %cst_110 : f32 to vector<8x256xf32>
    %146 = arith.maximumf %144, %145 : vector<8x256xf32>
    %147 = arith.truncf %146 : vector<8x256xf32> to vector<8x256xbf16>
    %c5_111 = arith.constant 5 : index
    %c0_112 = arith.constant 0 : index
    %c0_113 = arith.constant 0 : index
    %148 = vector.load %arg6[%c5_111, %c0_112, %c0_113] : memref<9x256x128xbf16, #tpu.memory_space<vmem>>, vector<1x256x128xbf16>
    %149 = vector.shape_cast %148 : vector<1x256x128xbf16> to vector<256x128xbf16>
    %cst_114 = arith.constant dense<0.000000e+00> : vector<8x128xf32>
    %150 = tpu.matmul %147, %149, %cst_114 {dimension_numbers = #tpu.dot_dimension_numbers<[1], [0], [0], [1], [0, 0, 1, 1], [], []>} : vector<8x256xbf16>, vector<256x128xbf16>, vector<8x128xf32> -> vector<8x128xf32>
    %151 = arith.addf %129, %150 : vector<8x128xf32>
    %c7_115 = arith.constant 7 : index
    %c0_116 = arith.constant 0 : index
    %c0_117 = arith.constant 0 : index
    %152 = vector.load %arg1[%c7_115, %c0_116, %c0_117] : memref<11x8x128xbf16, #tpu.memory_space<vmem>>, vector<1x8x128xbf16>
    %153 = vector.shape_cast %152 : vector<1x8x128xbf16> to vector<8x128xbf16>
    %c8 = arith.constant 8 : index
    %c0_118 = arith.constant 0 : index
    %c0_119 = arith.constant 0 : index
    %154 = vector.load %arg1[%c8, %c0_118, %c0_119] : memref<11x8x128xbf16, #tpu.memory_space<vmem>>, vector<1x8x128xbf16>
    %155 = vector.shape_cast %154 : vector<1x8x128xbf16> to vector<8x128xbf16>
    %156 = tpu.concatenate %153, %155 in 1 : vector<8x128xbf16>, vector<8x128xbf16> -> vector<8x256xbf16>
    %c0_120 = arith.constant 0 : index
    %c0_121 = arith.constant 0 : index
    %157 = vector.load %arg2[%c0_120, %c0_121] : memref<256x256xbf16, #tpu.memory_space<vmem>>, vector<256x256xbf16>
    %cst_122 = arith.constant dense<0.000000e+00> : vector<8x256xf32>
    %158 = tpu.matmul %156, %157, %cst_122 {dimension_numbers = #tpu.dot_dimension_numbers<[1], [0], [0], [1], [0, 0, 1, 1], [], []>} : vector<8x256xbf16>, vector<256x256xbf16>, vector<8x256xf32> -> vector<8x256xf32>
    %159 = arith.addf %158, %2 : vector<8x256xf32>
    %cst_123 = arith.constant 0.000000e+00 : f32
    %160 = vector.broadcast %cst_123 : f32 to vector<8x256xf32>
    %161 = arith.maximumf %159, %160 : vector<8x256xf32>
    %162 = arith.truncf %161 : vector<8x256xf32> to vector<8x256xbf16>
    %163 = tpu.concatenate %140, %162 in 1 : vector<8x256xbf16>, vector<8x256xbf16> -> vector<8x512xbf16>
    %c0_124 = arith.constant 0 : index
    %c0_125 = arith.constant 0 : index
    %164 = vector.load %arg4[%c0_124, %c0_125] : memref<512x256xbf16, #tpu.memory_space<vmem>>, vector<512x256xbf16>
    %cst_126 = arith.constant dense<0.000000e+00> : vector<8x256xf32>
    %165 = tpu.matmul %163, %164, %cst_126 {dimension_numbers = #tpu.dot_dimension_numbers<[1], [0], [0], [1], [0, 0, 1, 1], [], []>} : vector<8x512xbf16>, vector<512x256xbf16>, vector<8x256xf32> -> vector<8x256xf32>
    %166 = arith.addf %165, %5 : vector<8x256xf32>
    %cst_127 = arith.constant 0.000000e+00 : f32
    %167 = vector.broadcast %cst_127 : f32 to vector<8x256xf32>
    %168 = arith.maximumf %166, %167 : vector<8x256xf32>
    %169 = arith.truncf %168 : vector<8x256xf32> to vector<8x256xbf16>
    %c6_128 = arith.constant 6 : index
    %c0_129 = arith.constant 0 : index
    %c0_130 = arith.constant 0 : index
    %170 = vector.load %arg6[%c6_128, %c0_129, %c0_130] : memref<9x256x128xbf16, #tpu.memory_space<vmem>>, vector<1x256x128xbf16>
    %171 = vector.shape_cast %170 : vector<1x256x128xbf16> to vector<256x128xbf16>
    %cst_131 = arith.constant dense<0.000000e+00> : vector<8x128xf32>
    %172 = tpu.matmul %169, %171, %cst_131 {dimension_numbers = #tpu.dot_dimension_numbers<[1], [0], [0], [1], [0, 0, 1, 1], [], []>} : vector<8x256xbf16>, vector<256x128xbf16>, vector<8x128xf32> -> vector<8x128xf32>
    %173 = arith.addf %151, %172 : vector<8x128xf32>
    %c8_132 = arith.constant 8 : index
    %c0_133 = arith.constant 0 : index
    %c0_134 = arith.constant 0 : index
    %174 = vector.load %arg1[%c8_132, %c0_133, %c0_134] : memref<11x8x128xbf16, #tpu.memory_space<vmem>>, vector<1x8x128xbf16>
    %175 = vector.shape_cast %174 : vector<1x8x128xbf16> to vector<8x128xbf16>
    %c9 = arith.constant 9 : index
    %c0_135 = arith.constant 0 : index
    %c0_136 = arith.constant 0 : index
    %176 = vector.load %arg1[%c9, %c0_135, %c0_136] : memref<11x8x128xbf16, #tpu.memory_space<vmem>>, vector<1x8x128xbf16>
    %177 = vector.shape_cast %176 : vector<1x8x128xbf16> to vector<8x128xbf16>
    %178 = tpu.concatenate %175, %177 in 1 : vector<8x128xbf16>, vector<8x128xbf16> -> vector<8x256xbf16>
    %c0_137 = arith.constant 0 : index
    %c0_138 = arith.constant 0 : index
    %179 = vector.load %arg2[%c0_137, %c0_138] : memref<256x256xbf16, #tpu.memory_space<vmem>>, vector<256x256xbf16>
    %cst_139 = arith.constant dense<0.000000e+00> : vector<8x256xf32>
    %180 = tpu.matmul %178, %179, %cst_139 {dimension_numbers = #tpu.dot_dimension_numbers<[1], [0], [0], [1], [0, 0, 1, 1], [], []>} : vector<8x256xbf16>, vector<256x256xbf16>, vector<8x256xf32> -> vector<8x256xf32>
    %181 = arith.addf %180, %2 : vector<8x256xf32>
    %cst_140 = arith.constant 0.000000e+00 : f32
    %182 = vector.broadcast %cst_140 : f32 to vector<8x256xf32>
    %183 = arith.maximumf %181, %182 : vector<8x256xf32>
    %184 = arith.truncf %183 : vector<8x256xf32> to vector<8x256xbf16>
    %185 = tpu.concatenate %162, %184 in 1 : vector<8x256xbf16>, vector<8x256xbf16> -> vector<8x512xbf16>
    %c0_141 = arith.constant 0 : index
    %c0_142 = arith.constant 0 : index
    %186 = vector.load %arg4[%c0_141, %c0_142] : memref<512x256xbf16, #tpu.memory_space<vmem>>, vector<512x256xbf16>
    %cst_143 = arith.constant dense<0.000000e+00> : vector<8x256xf32>
    %187 = tpu.matmul %185, %186, %cst_143 {dimension_numbers = #tpu.dot_dimension_numbers<[1], [0], [0], [1], [0, 0, 1, 1], [], []>} : vector<8x512xbf16>, vector<512x256xbf16>, vector<8x256xf32> -> vector<8x256xf32>
    %188 = arith.addf %187, %5 : vector<8x256xf32>
    %cst_144 = arith.constant 0.000000e+00 : f32
    %189 = vector.broadcast %cst_144 : f32 to vector<8x256xf32>
    %190 = arith.maximumf %188, %189 : vector<8x256xf32>
    %191 = arith.truncf %190 : vector<8x256xf32> to vector<8x256xbf16>
    %c7_145 = arith.constant 7 : index
    %c0_146 = arith.constant 0 : index
    %c0_147 = arith.constant 0 : index
    %192 = vector.load %arg6[%c7_145, %c0_146, %c0_147] : memref<9x256x128xbf16, #tpu.memory_space<vmem>>, vector<1x256x128xbf16>
    %193 = vector.shape_cast %192 : vector<1x256x128xbf16> to vector<256x128xbf16>
    %cst_148 = arith.constant dense<0.000000e+00> : vector<8x128xf32>
    %194 = tpu.matmul %191, %193, %cst_148 {dimension_numbers = #tpu.dot_dimension_numbers<[1], [0], [0], [1], [0, 0, 1, 1], [], []>} : vector<8x256xbf16>, vector<256x128xbf16>, vector<8x128xf32> -> vector<8x128xf32>
    %195 = arith.addf %173, %194 : vector<8x128xf32>
    %c9_149 = arith.constant 9 : index
    %c0_150 = arith.constant 0 : index
    %c0_151 = arith.constant 0 : index
    %196 = vector.load %arg1[%c9_149, %c0_150, %c0_151] : memref<11x8x128xbf16, #tpu.memory_space<vmem>>, vector<1x8x128xbf16>
    %197 = vector.shape_cast %196 : vector<1x8x128xbf16> to vector<8x128xbf16>
    %c10 = arith.constant 10 : index
    %c0_152 = arith.constant 0 : index
    %c0_153 = arith.constant 0 : index
    %198 = vector.load %arg1[%c10, %c0_152, %c0_153] : memref<11x8x128xbf16, #tpu.memory_space<vmem>>, vector<1x8x128xbf16>
    %199 = vector.shape_cast %198 : vector<1x8x128xbf16> to vector<8x128xbf16>
    %200 = tpu.concatenate %197, %199 in 1 : vector<8x128xbf16>, vector<8x128xbf16> -> vector<8x256xbf16>
    %c0_154 = arith.constant 0 : index
    %c0_155 = arith.constant 0 : index
    %201 = vector.load %arg2[%c0_154, %c0_155] : memref<256x256xbf16, #tpu.memory_space<vmem>>, vector<256x256xbf16>
    %cst_156 = arith.constant dense<0.000000e+00> : vector<8x256xf32>
    %202 = tpu.matmul %200, %201, %cst_156 {dimension_numbers = #tpu.dot_dimension_numbers<[1], [0], [0], [1], [0, 0, 1, 1], [], []>} : vector<8x256xbf16>, vector<256x256xbf16>, vector<8x256xf32> -> vector<8x256xf32>
    %203 = arith.addf %202, %2 : vector<8x256xf32>
    %cst_157 = arith.constant 0.000000e+00 : f32
    %204 = vector.broadcast %cst_157 : f32 to vector<8x256xf32>
    %205 = arith.maximumf %203, %204 : vector<8x256xf32>
    %206 = arith.truncf %205 : vector<8x256xf32> to vector<8x256xbf16>
    %207 = tpu.concatenate %184, %206 in 1 : vector<8x256xbf16>, vector<8x256xbf16> -> vector<8x512xbf16>
    %c0_158 = arith.constant 0 : index
    %c0_159 = arith.constant 0 : index
    %208 = vector.load %arg4[%c0_158, %c0_159] : memref<512x256xbf16, #tpu.memory_space<vmem>>, vector<512x256xbf16>
    %cst_160 = arith.constant dense<0.000000e+00> : vector<8x256xf32>
    %209 = tpu.matmul %207, %208, %cst_160 {dimension_numbers = #tpu.dot_dimension_numbers<[1], [0], [0], [1], [0, 0, 1, 1], [], []>} : vector<8x512xbf16>, vector<512x256xbf16>, vector<8x256xf32> -> vector<8x256xf32>
    %210 = arith.addf %209, %5 : vector<8x256xf32>
    %cst_161 = arith.constant 0.000000e+00 : f32
    %211 = vector.broadcast %cst_161 : f32 to vector<8x256xf32>
    %212 = arith.maximumf %210, %211 : vector<8x256xf32>
    %213 = arith.truncf %212 : vector<8x256xf32> to vector<8x256xbf16>
    %c8_162 = arith.constant 8 : index
    %c0_163 = arith.constant 0 : index
    %c0_164 = arith.constant 0 : index
    %214 = vector.load %arg6[%c8_162, %c0_163, %c0_164] : memref<9x256x128xbf16, #tpu.memory_space<vmem>>, vector<1x256x128xbf16>
    %215 = vector.shape_cast %214 : vector<1x256x128xbf16> to vector<256x128xbf16>
    %cst_165 = arith.constant dense<0.000000e+00> : vector<8x128xf32>
    %216 = tpu.matmul %213, %215, %cst_165 {dimension_numbers = #tpu.dot_dimension_numbers<[1], [0], [0], [1], [0, 0, 1, 1], [], []>} : vector<8x256xbf16>, vector<256x128xbf16>, vector<8x128xf32> -> vector<8x128xf32>
    %217 = arith.addf %195, %216 : vector<8x128xf32>
    %cst_166 = arith.constant 0.000000e+00 : f32
    %218 = vector.broadcast %cst_166 : f32 to vector<8x128xf32>
    %219 = arith.maximumf %217, %218 : vector<8x128xf32>
    %c0_167 = arith.constant 0 : index
    %c0_168 = arith.constant 0 : index
    %220 = vector.load %arg8[%c0_167, %c0_168] : memref<8x128xf32, #tpu.memory_space<vmem>>, vector<8x128xf32>
    tpu.vector_store %arg8[%c0_167, %c0_168], %219 {strides = array<i32>} : memref<8x128xf32, #tpu.memory_space<vmem>>, vector<8x128xf32>,
    return
  }
  func.func @transform_0(%arg0: i32) -> (i32, i32, i32) {
    %c0_i32 = arith.constant 0 : i32
    %c0_i32_0 = arith.constant 0 : i32
    %c0_i32_1 = arith.constant 0 : i32
    return %c0_i32, %arg0, %c0_i32_0 : i32, i32, i32
  }
  func.func @transform_1(%arg0: i32) -> (i32, i32) {
    %c0_i32 = arith.constant 0 : i32
    %c0_i32_0 = arith.constant 0 : i32
    %c0_i32_1 = arith.constant 0 : i32
    return %c0_i32, %c0_i32_0 : i32, i32
  }
  func.func @transform_2(%arg0: i32) -> (i32, i32) {
    %c0_i32 = arith.constant 0 : i32
    %c0_i32_0 = arith.constant 0 : i32
    %c0_i32_1 = arith.constant 0 : i32
    return %c0_i32, %c0_i32_0 : i32, i32
  }
  func.func @transform_3(%arg0: i32) -> (i32, i32) {
    %c0_i32 = arith.constant 0 : i32
    %c0_i32_0 = arith.constant 0 : i32
    %c0_i32_1 = arith.constant 0 : i32
    return %c0_i32, %c0_i32_0 : i32, i32
  }
  func.func @transform_4(%arg0: i32) -> (i32, i32) {
    %c0_i32 = arith.constant 0 : i32
    %c0_i32_0 = arith.constant 0 : i32
    %c0_i32_1 = arith.constant 0 : i32
    return %c0_i32, %c0_i32_0 : i32, i32
  }
  func.func @transform_5(%arg0: i32) -> (i32, i32, i32) {
    %c0_i32 = arith.constant 0 : i32
    %c0_i32_0 = arith.constant 0 : i32
    %c0_i32_1 = arith.constant 0 : i32
    %c0_i32_2 = arith.constant 0 : i32
    return %c0_i32, %c0_i32_0, %c0_i32_1 : i32, i32, i32
  }
  func.func @transform_6(%arg0: i32) -> (i32, i32) {
    %c0_i32 = arith.constant 0 : i32
    %c0_i32_0 = arith.constant 0 : i32
    %c0_i32_1 = arith.constant 0 : i32
    return %c0_i32, %c0_i32_0 : i32, i32
  }
  func.func @transform_7(%arg0: i32) -> (i32, i32) {
    %c0_i32 = arith.constant 0 : i32
    %c0_i32_0 = arith.constant 0 : i32
    return %arg0, %c0_i32 : i32, i32
  }
}

</mosaic_0001>

<bundles_post_ra>
// kernel: cnn_layers_forward.1
= control target key start
LH: loop header
LB: loop body
LE: loop exit
PB: predicated region body
PF: predicated region fallthrough
CT: control target
= control target key end

     0   :  { %12 = vsyncpa [#allocation3], 0  ;;  %s6592_s0 = inlined_call_operand.vmem [shape: bf16[11,8,128], index: 0, kind: input, shape index: {}]   ;;  %s6593_s1 = inlined_call_operand.vmem [shape: bf16[256,256], index: 1, kind: input, shape index: {}]   ;;  %s6594_s2 = inlined_call_operand.vmem [shape: f32[1,256], index: 2, kind: input, shape index: {}]   ;;  %s6595_s3 = inlined_call_operand.hbm [shape: bf16[512,256], index: 3, kind: input, shape index: {}]   ;;  %s6596_s4 = inlined_call_operand.vmem [shape: f32[1,256], index: 4, kind: input, shape index: {}]   ;;  %s6597_s5 = inlined_call_operand.hbm [shape: bf16[9,256,128], index: 5, kind: input, shape index: {}]   ;;  %s6598_s6 = inlined_call_operand.vmem [shape: f32[1,128], index: 6, kind: input, shape index: {}]   ;;  %s6599_s7 = inlined_call_operand.vmem [shape: f32[8,128], index: 7, kind: output, shape index: {}]  }
   0x1   :  { %s24_s26 = sshll.u32 %s6595_s3, 4  ;;  %s25_s26 = int_to_ptr.hbm [resolvable:$true] %s24_s26 }
   0x2   :  { %13 = vsyncpa [#allocation5], 0  ;;  %s4943_s27 = smov [#allocation2]   ;;  %s39_s8 = sshll.u32 %s6597_s5, 4  ;;  %s40_s8 = int_to_ptr.hbm [resolvable:$true] %s39_s8 }
   0x3   :  { %s26_s28 = sshll.u32 %s4943_s27, 4  ;;  %s4944_s9 = smov 128   ;;  %s27_s28 = int_to_ptr.vmem [resolvable:$true] %s26_s28 }
   0x4   :  { %s4945_s10 = smov 8   ;;  %s4946_s11 = smov [#allocation4]  }
   0x5   :  { %32 = dma.hbm_to_vmem [thread:$0]  %s25_s26, 8192, %s27_s28, [#allocation3], %s4944_s9, %s4944_s9, %s4945_s10  }
   0x6   :  { %s41_s12 = sshll.u32 %s4946_s11, 4  ;;  %s4947_s13 = smov 64   ;;  %s42_s12 = int_to_ptr.vmem [resolvable:$true] %s41_s12 }
   0x7   :  { %s4948_s14 = smov 4  }
   0x8   :  { %47 = dma.hbm_to_vmem [thread:$0]  %s40_s8, 18432, %s42_s12, [#allocation5], %s4947_s13, %s4947_s13, %s4948_s14  }
   0x9   :  { %4939 = dma.done.wait [#allocation3], 8192  }
   0xa   :  { %4940 = vsyncadd [#allocation3], 4294959104 }
   0xb   :  { %4941 = dma.done.wait [#allocation5], 18432  }
   0xc   :  { %4942 = vsyncadd [#allocation5], 4294948864  ;;  %v3733_v0 = vld [vmem:[%s6593_s1 + $0x70] sm:$0xf]  ;;  %v4659_v1 = vld [vmem:[%s6593_s1 + $0x74] sm:$0xf0] }
   0xd   :  { %v3797_v2 = vld [vmem:[%s6593_s1 + $0xf0] sm:$0xf]  ;;  %v5004_v3 = vor.u32 %v4659_v1, %v3733_v0  ;;  %v4675_v4 = vld [vmem:[%s6593_s1 + $0xf4] sm:$0xf0]  ;;  %v4658_v5 = vld [vmem:[%s6593_s1 + $0x74] sm:$0xf] }
   0xe   :  { %v3735_v6 = vld [vmem:[%s6593_s1 + $0x78] sm:$0xf0]  ;;  %v5015_v7 = vor.u32 %v4675_v4, %v3797_v2  ;;  %v4674_v9 = vld [vmem:[%s6593_s1 + $0xf4] sm:$0xf]  ;;  %v3725_v11 = vld [vmem:[%s6593_s1 + $0x60] sm:$0xf] }
   0xf   :  { %v5017_v8 = vor.u32 %v4658_v5, %v3735_v6  ;;  %v3799_v10 = vld [vmem:[%s6593_s1 + $0xf8] sm:$0xf0]  ;;  %269 = vmatpush.bf16.msra.mxu0 %v5004_v3  ;;  %v4657_v13 = vld [vmem:[%s6593_s1 + $0x64] sm:$0xf0]  ;;  %v3789_v14 = vld [vmem:[%s6593_s1 + $0xe0] sm:$0xf] }
  0x10   :  { %v5029_v12 = vor.u32 %v4674_v9, %v3799_v10  ;;  %v4673_v15 = vld [vmem:[%s6593_s1 + $0xe4] sm:$0xf0]  ;;  %282 = vmatpush.bf16.msra.mxu1 %v5015_v7  ;;  %v5042_v16 = vor.u32 %v4657_v13, %v3725_v11  ;;  %v4656_v18 = vld [vmem:[%s6593_s1 + $0x64] sm:$0xf]  ;;  %v3727_v19 = vld [vmem:[%s6593_s1 + $0x68] sm:$0xf0] }
  0x11   :  { %6721 = vst [vmem:[#allocation8_spill] sm:$0xff] %v5017_v8  ;;  %295 = vmatpush.bf16.msra.mxu2 %v5017_v8  ;;  %v5044_v17 = vor.u32 %v4673_v15, %v3789_v14  ;;  %v4672_v20 = vld [vmem:[%s6593_s1 + $0xe4] sm:$0xf]  ;;  %v5056_v21 = vor.u32 %v4656_v18, %v3727_v19  ;;  %v3791_v22 = vld [vmem:[%s6593_s1 + $0xe8] sm:$0xf0] }
  0x12   :  { %6722 = vst [vmem:[#allocation9_spill] sm:$0xff] %v5029_v12  ;;  %308 = vmatpush.bf16.msra.mxu3 %v5029_v12  ;;  %v3717_v23 = vld [vmem:[%s6593_s1 + $0x50] sm:$0xf]  ;;  %v4655_v24 = vld [vmem:[%s6593_s1 + $0x54] sm:$0xf0]  ;;  %v5067_v25 = vor.u32 %v4672_v20, %v3791_v22 }
  0x13   :  { %6723 = vst [vmem:[#allocation10_spill] sm:$0xff] %v5056_v21  ;;  %v3781_v26 = vld [vmem:[%s6593_s1 + $0xd0] sm:$0xf]  ;;  %v4671_v27 = vld [vmem:[%s6593_s1 + $0xd4] sm:$0xf0]  ;;  %270 = vmatpush.bf16.msra.mxu0 %v5042_v16  ;;  %v5079_v29 = vor.u32 %v4655_v24, %v3717_v23 }
  0x14   :  { %6724 = vst [vmem:[#allocation11_spill] sm:$0xff] %v5067_v25  ;;  %v4654_v28 = vld [vmem:[%s6593_s1 + $0x54] sm:$0xf]  ;;  %v3719_v30 = vld [vmem:[%s6593_s1 + $0x58] sm:$0xf0]  ;;  %283 = vmatpush.bf16.msra.mxu1 %v5044_v17  ;;  %v5092_v33 = vor.u32 %v4671_v27, %v3781_v26 }
  0x15   :  { %v4670_v31 = vld [vmem:[%s6593_s1 + $0xd4] sm:$0xf]  ;;  %v3783_v32 = vld [vmem:[%s6593_s1 + $0xd8] sm:$0xf0]  ;;  %296 = vmatpush.bf16.msra.mxu2 %v5056_v21  ;;  %v5094_v34 = vor.u32 %v4654_v28, %v3719_v30  ;;  %v3709_v35 = vld [vmem:[%s6593_s1 + $0x40] sm:$0xf] }
  0x16   :  { %v4653_v36 = vld [vmem:[%s6593_s1 + $0x44] sm:$0xf0]  ;;  %v3773_v37 = vld [vmem:[%s6593_s1 + $0xc0] sm:$0xf]  ;;  %309 = vmatpush.bf16.msra.mxu3 %v5067_v25  ;;  %v5106_v38 = vor.u32 %v4670_v31, %v3783_v32  ;;  %v4652_v40 = vld [vmem:[%s6593_s1 + $0x44] sm:$0xf] }
  0x17   :  { %6725 = vst [vmem:[#allocation12_spill] sm:$0xff] %v5094_v34  ;;  %v4669_v39 = vld [vmem:[%s6593_s1 + $0xc4] sm:$0xf0]  ;;  %v3711_v41 = vld [vmem:[%s6593_s1 + $0x48] sm:$0xf0]  ;;  %271 = vmatpush.bf16.msra.mxu0 %v5079_v29  ;;  %v5124_v44 = vor.u32 %v4653_v36, %v3709_v35 }
  0x18   :  { %6726 = vst [vmem:[#allocation13_spill] sm:$0xff] %v5106_v38  ;;  %v4668_v42 = vld [vmem:[%s6593_s1 + $0xc4] sm:$0xf]  ;;  %v3775_v43 = vld [vmem:[%s6593_s1 + $0xc8] sm:$0xf0]  ;;  %284 = vmatpush.bf16.msra.mxu1 %v5092_v33  ;;  %v5128_v45 = vor.u32 %v4669_v39, %v3773_v37  ;;  %v5130_v46 = vor.u32 %v4652_v40, %v3711_v41 }
  0x19   :  { %297 = vmatpush.bf16.msra.mxu2 %v5094_v34  ;;  %v3701_v47 = vld [vmem:[%s6593_s1 + $0x30] sm:$0xf]  ;;  %v4651_v48 = vld [vmem:[%s6593_s1 + $0x34] sm:$0xf0]  ;;  %v5142_v50 = vor.u32 %v4668_v42, %v3775_v43  ;;  %v4650_v52 = vld [vmem:[%s6593_s1 + $0x34] sm:$0xf] }
  0x1a   :  { %6727 = vst [vmem:[#allocation14_spill] sm:$0xff] %v5130_v46  ;;  %v3765_v49 = vld [vmem:[%s6593_s1 + $0xb0] sm:$0xf]  ;;  %310 = vmatpush.bf16.msra.mxu3 %v5106_v38  ;;  %v4667_v51 = vld [vmem:[%s6593_s1 + $0xb4] sm:$0xf0]  ;;  %v5160_v56 = vor.u32 %v4651_v48, %v3701_v47 }
  0x1b   :  { %6728 = vst [vmem:[#allocation15_spill] sm:$0xff] %v5142_v50  ;;  %v3703_v53 = vld [vmem:[%s6593_s1 + $0x38] sm:$0xf0]  ;;  %v4666_v54 = vld [vmem:[%s6593_s1 + $0xb4] sm:$0xf]  ;;  %272 = vmatpush.bf16.msra.mxu0 %v5124_v44  ;;  %v5164_v57 = vor.u32 %v4667_v51, %v3765_v49 }
  0x1c   :  { %v3767_v55 = vld [vmem:[%s6593_s1 + $0xb8] sm:$0xf0]  ;;  %285 = vmatpush.bf16.msra.mxu1 %v5128_v45  ;;  %v5166_v58 = vor.u32 %v4650_v52, %v3703_v53  ;;  %v3693_v59 = vld [vmem:[%s6593_s1 + $0x20] sm:$0xf]  ;;  %v4649_v60 = vld [vmem:[%s6593_s1 + $0x24] sm:$0xf0] }
  0x1d   :  { %298 = vmatpush.bf16.msra.mxu2 %v5130_v46  ;;  %v3757_v61 = vld [vmem:[%s6593_s1 + $0xa0] sm:$0xf]  ;;  %v5178_v62 = vor.u32 %v4666_v54, %v3767_v55  ;;  %v4665_v63 = vld [vmem:[%s6593_s1 + $0xa4] sm:$0xf0]  ;;  %v4648_v0 = vld [vmem:[%s6593_s1 + $0x24] sm:$0xf]  ;;  %v5196_v5 = vor.u32 %v4649_v60, %v3693_v59 }
  0x1e   :  { %6729 = vst [vmem:[#allocation16_spill] sm:$0xff] %v5166_v58  ;;  %311 = vmatpush.bf16.msra.mxu3 %v5142_v50  ;;  %v3695_v1 = vld [vmem:[%s6593_s1 + $0x28] sm:$0xf0]  ;;  %v4664_v2 = vld [vmem:[%s6593_s1 + $0xa4] sm:$0xf]  ;;  %v5200_v6 = vor.u32 %v4665_v63, %v3757_v61 }
  0x1f   :  { %6730 = vst [vmem:[#allocation17_spill] sm:$0xff] %v5178_v62  ;;  %v3759_v4 = vld [vmem:[%s6593_s1 + $0xa8] sm:$0xf0]  ;;  %273 = vmatpush.bf16.msra.mxu0 %v5160_v56  ;;  %v5202_v9 = vor.u32 %v4648_v0, %v3695_v1  ;;  %v3685_v10 = vld [vmem:[%s6593_s1 + $0x10] sm:$0xf] }
  0x20   :  { %286 = vmatpush.bf16.msra.mxu1 %v5164_v57  ;;  %v4647_v11 = vld [vmem:[%s6593_s1 + $0x14] sm:$0xf0]  ;;  %v3749_v13 = vld [vmem:[%s6593_s1 + $0x90] sm:$0xf]  ;;  %v5214_v14 = vor.u32 %v4664_v2, %v3759_v4  ;;  %v4646_v18 = vld [vmem:[%s6593_s1 + $0x14] sm:$0xf] }
  0x21   :  { %299 = vmatpush.bf16.msra.mxu2 %v5166_v58  ;;  %6731 = vst [vmem:[#allocation18_spill] sm:$0xff] %v5202_v9  ;;  %v4663_v15 = vld [vmem:[%s6593_s1 + $0x94] sm:$0xf0]  ;;  %v3687_v19 = vld [vmem:[%s6593_s1 + $0x18] sm:$0xf0]  ;;  %v5232_v23 = vor.u32 %v4647_v11, %v3685_v10 }
  0x22   :  { %312 = vmatpush.bf16.msra.mxu3 %v5178_v62  ;;  %6732 = vst [vmem:[#allocation19_spill] sm:$0xff] %v5214_v14  ;;  %v4662_v20 = vld [vmem:[%s6593_s1 + $0x94] sm:$0xf]  ;;  %v3751_v22 = vld [vmem:[%s6593_s1 + $0x98] sm:$0xf0]  ;;  %v5236_v24 = vor.u32 %v4663_v15, %v3749_v13  ;;  %v5238_v26 = vor.u32 %v4646_v18, %v3687_v19 }
  0x23   :  { %274 = vmatpush.bf16.msra.mxu0 %v5196_v5  ;;  %v3677_v27 = vld [vmem:[%s6593_s1] sm:$0xf]  ;;  %v4645_v28 = vld [vmem:[%s6593_s1 + $0x4] sm:$0xf0]  ;;  %v5250_v31 = vor.u32 %v4662_v20, %v3751_v22  ;;  %v4644_v35 = vld [vmem:[%s6593_s1 + $0x4] sm:$0xf] }
  0x24   :  { %287 = vmatpush.bf16.msra.mxu1 %v5200_v6  ;;  %6733 = vst [vmem:[#allocation20_spill] sm:$0xff] %v5238_v26  ;;  %v3741_v30 = vld [vmem:[%s6593_s1 + $0x80] sm:$0xf]  ;;  %v4661_v32 = vld [vmem:[%s6593_s1 + $0x84] sm:$0xf0]  ;;  %v5268_v40 = vor.u32 %v4645_v28, %v3677_v27 }
  0x25   :  { %300 = vmatpush.bf16.msra.mxu2 %v5202_v9  ;;  %6734 = vst [vmem:[#allocation21_spill] sm:$0xff] %v5250_v31  ;;  %v3679_v36 = vld [vmem:[%s6593_s1 + $0x8] sm:$0xf0]  ;;  %v4660_v37 = vld [vmem:[%s6593_s1 + $0x84] sm:$0xf]  ;;  %v5272_v41 = vor.u32 %v4661_v32, %v3741_v30 }
  0x26   :  { %313 = vmatpush.bf16.msra.mxu3 %v5214_v14  ;;  %v3743_v39 = vld [vmem:[%s6593_s1 + $0x88] sm:$0xf0]  ;;  %v5274_v42 = vor.u32 %v4644_v35, %v3679_v36  ;;  %v74_v47 = vld [vmem:[%s6592_s0] sm:$0xf]  ;;  %v5290_v48 = vld [vmem:[%s6592_s0 + $0x4] sm:$0xf] }
  0x27   :  { %275 = vmatpush.bf16.msra.mxu0 %v5232_v23  ;;  %v5277_v43 = vor.u32 %v4660_v37, %v3743_v39  ;;  %v3862_v49 = vld [vmem:[#allocation2 + $0x70] sm:$0xf]  ;;  %v4691_v51 = vld [vmem:[#allocation2 + $0x74] sm:$0xf0]  ;;  %v3854_v55 = vld [vmem:[#allocation2 + $0x60] sm:$0xf] }
  0x28   :  { %288 = vmatpush.bf16.msra.mxu1 %v5236_v24  ;;  %6735 = vst [vmem:[#allocation22_spill] sm:$0xff] %v5274_v42  ;;  %v3926_v52 = vld [vmem:[#allocation2 + $0xf0] sm:$0xf]  ;;  %v4707_v53 = vld [vmem:[#allocation2 + $0xf4] sm:$0xf0]  ;;  %v5321_v54 = vor.u32 %v4691_v51, %v3862_v49 }
  0x29   :  { %301 = vmatpush.bf16.msra.mxu2 %v5238_v26  ;;  %6736 = vst [vmem:[#allocation23_spill] sm:$0xff] %v5277_v43  ;;  %v3990_v59 = vld [vmem:[#allocation2 + $0x170] sm:$0xf]  ;;  %v4723_v60 = vld [vmem:[#allocation2 + $0x174] sm:$0xf0]  ;;  %v5323_v61 = vor.u32 %v4707_v53, %v3926_v52 }
  0x2a   :  { %314 = vmatpush.bf16.msra.mxu3 %v5250_v31  ;;  %v4689_v63 = vld [vmem:[#allocation2 + $0x64] sm:$0xf0]  ;;  %v4054_v0 = vld [vmem:[#allocation2 + $0x1f0] sm:$0xf]  ;;  %v4739_v1 = vld [vmem:[#allocation2 + $0x1f4] sm:$0xf0]  ;;  %v5333_v11 = vor.u32 %v4723_v60, %v3990_v59 }
  0x2b   :  { %276 = vmatpush.bf16.msra.mxu0 %v5268_v40  ;;  %v3918_v2 = vld [vmem:[#allocation2 + $0xe0] sm:$0xf]  ;;  %v4705_v4 = vld [vmem:[#allocation2 + $0xe4] sm:$0xf0]  ;;  %v5337_v13 = vor.u32 %v4689_v63, %v3854_v55  ;;  %v3846_v15 = vld [vmem:[#allocation2 + $0x50] sm:$0xf]  ;;  %v5339_v18 = vor.u32 %v4739_v1, %v4054_v0 }
  0x2c   :  { %289 = vmatpush.bf16.msra.mxu1 %v5272_v41  ;;  %v5331_v10 = vld [vmem:[%s6592_s0 + $0x8] sm:$0xf]  ;;  %6737 = vst [vmem:[#allocation24_spill] sm:$0xff] %v5333_v11  ;;  %v3982_v19 = vld [vmem:[#allocation2 + $0x160] sm:$0xf]  ;;  %v5343_v22 = vor.u32 %v4705_v4, %v3918_v2 }
  0x2d   :  { %302 = vmatpush.bf16.msra.mxu2 %v5274_v42  ;;  %6738 = vst [vmem:[#allocation25_spill] sm:$0xff] %v5339_v18  ;;  %v4721_v20 = vld [vmem:[#allocation2 + $0x164] sm:$0xf0]  ;;  %v4687_v27 = vld [vmem:[#allocation2 + $0x54] sm:$0xf0] }
  0x2e   :  { %315 = vmatpush.bf16.msra.mxu3 %v5277_v43  ;;  %277 = vmatmul.bf16.vlgmr.msra.gmra.mxu0 %v74_v47  ;;  %v4046_v28 = vld [vmem:[#allocation2 + $0x1e0] sm:$0xf]  ;;  %v4737_v30 = vld [vmem:[#allocation2 + $0x1e4] sm:$0xf0]  ;;  %v3910_v32 = vld [vmem:[#allocation2 + $0xd0] sm:$0xf]  ;;  %v5349_v36 = vor.u32 %v4721_v20, %v3982_v19  ;;  %v5352_v37 = vor.u32 %v4687_v27, %v3846_v15 }
  0x2f   :  { %326 = vmatpush.bf16.msrb.mxu0 %v5004_v3  ;;  %290 = vmatmul.bf16.vlgmr.msra.gmra.mxu1 %v5290_v48  ;;  %v4703_v35 = vld [vmem:[#allocation2 + $0xd4] sm:$0xf0]  ;;  %v3838_v39 = vld [vmem:[#allocation2 + $0x40] sm:$0xf]  ;;  %v3974_v49 = vld [vmem:[#allocation2 + $0x150] sm:$0xf] }
  0x30   :  { %339 = vmatpush.bf16.msrb.mxu1 %v5015_v7  ;;  %303 = vmatmul.bf16.vlgmr.msra.gmra.mxu2 %v74_v47  ;;  %6739 = vst [vmem:[#allocation26_spill] sm:$0xff] %v5349_v36  ;;  %v5355_v47 = vor.u32 %v4737_v30, %v4046_v28  ;;  %v4719_v51 = vld [vmem:[#allocation2 + $0x154] sm:$0xf0]  ;;  %v4685_v52 = vld [vmem:[#allocation2 + $0x44] sm:$0xf0] }
  0x31   :  { %352 = vmatpush.bf16.msrb.mxu2 %v5017_v8  ;;  %316 = vmatmul.bf16.vlgmr.msra.gmra.mxu3 %v5290_v48  ;;  %v4038_v53 = vld [vmem:[#allocation2 + $0x1d0] sm:$0xf]  ;;  %v4735_v55 = vld [vmem:[#allocation2 + $0x1d4] sm:$0xf0]  ;;  %v3902_v59 = vld [vmem:[#allocation2 + $0xc0] sm:$0xf]  ;;  %v5361_v63 = vor.u32 %v4719_v51, %v3974_v49  ;;  %v5364_v0 = vor.u32 %v4685_v52, %v3838_v39 }
  0x32   :  { %365 = vmatpush.bf16.msrb.mxu3 %v5029_v12  ;;  %6740 = vst [vmem:[#allocation27_spill] sm:$0xff] %v5355_v47  ;;  %v4701_v60 = vld [vmem:[#allocation2 + $0xc4] sm:$0xf0]  ;;  %v3830_v1 = vld [vmem:[#allocation2 + $0x30] sm:$0xf]  ;;  %v5367_v2 = vor.u32 %v4735_v55, %v4038_v53 }
  0x33   :  { %327 = vmatpush.bf16.msrb.mxu0 %v5042_v16  ;;  %6741 = vst [vmem:[#allocation28_spill] sm:$0xff] %v5361_v63  ;;  %v3966_v4 = vld [vmem:[#allocation2 + $0x140] sm:$0xf]  ;;  %v4717_v15 = vld [vmem:[#allocation2 + $0x144] sm:$0xf0]  ;;  %v5370_v19 = vor.u32 %v4701_v60, %v3902_v59 }
  0x34   :  { %340 = vmatpush.bf16.msrb.mxu1 %v5044_v17  ;;  %6742 = vst [vmem:[#allocation29_spill] sm:$0xff] %v5367_v2  ;;  %v4683_v20 = vld [vmem:[#allocation2 + $0x34] sm:$0xf0]  ;;  %v4030_v27 = vld [vmem:[#allocation2 + $0x1c0] sm:$0xf] }
  0x35   :  { %353 = vmatpush.bf16.msrb.mxu2 %v5056_v21  ;;  %v4733_v28 = vld [vmem:[#allocation2 + $0x1c4] sm:$0xf0]  ;;  %v3894_v30 = vld [vmem:[#allocation2 + $0xb0] sm:$0xf]  ;;  %v5376_v39 = vor.u32 %v4683_v20, %v3830_v1  ;;  %v3822_v52 = vld [vmem:[#allocation2 + $0x20] sm:$0xf] }
  0x36   :  { %366 = vmatpush.bf16.msrb.mxu3 %v5067_v25  ;;  %v5379_v49 = vor.u32 %v4733_v28, %v4030_v27  ;;  %v4681_v53 = vld [vmem:[#allocation2 + $0x24] sm:$0xf0]  ;;  %v3886_v55 = vld [vmem:[#allocation2 + $0xa0] sm:$0xf]  ;;  %v3878_v20 = vld [vmem:[#allocation2 + $0x90] sm:$0xf] }
  0x37   :  { %328 = vmatpush.bf16.msrb.mxu0 %v5079_v29  ;;  %v4697_v59 = vld [vmem:[#allocation2 + $0xa4] sm:$0xf0]  ;;  %v5386_v60 = vor.u32 %v4681_v53, %v3822_v52  ;;  %v4695_v27 = vld [vmem:[#allocation2 + $0x94] sm:$0xf0]  ;;  %v3870_v53 = vld [vmem:[#allocation2 + $0x80] sm:$0xf] }
  0x38   :  { %341 = vmatpush.bf16.msrb.mxu1 %v5092_v33  ;;  %6744 = vst [vmem:[#allocation31_spill] sm:$0xff] %v5379_v49  ;;  %v5390_v1 = vor.u32 %v4697_v59, %v3886_v55  ;;  %v4677_v52 = vld [vmem:[#allocation2 + $0x4] sm:$0xf0]  ;;  %v4706_v55 = vld [vmem:[#allocation2 + $0xf4] sm:$0xf] }
  0x39   :  { %354 = vmatpush.bf16.msrb.mxu2 %v5094_v34  ;;  %v3928_v59 = vld [vmem:[#allocation2 + $0xf8] sm:$0xf0]  ;;  %v4678_v25 = vld [vmem:[#allocation2 + $0x14] sm:$0xf] }
  0x3a   :  { %367 = vmatpush.bf16.msrb.mxu3 %v5106_v38  ;;  %v4694_v12 = vld [vmem:[#allocation2 + $0x94] sm:$0xf] }
  0x3b   :  { %329 = vmatpush.bf16.msrb.mxu0 %v5124_v44 }
  0x3c   :  { %342 = vmatpush.bf16.msrb.mxu1 %v5128_v45 }
  0x3d   :  { %355 = vmatpush.bf16.msrb.mxu2 %v5130_v46  ;;  %v3816_v46 = vld [vmem:[#allocation2 + $0x18] sm:$0xf0] }
  0x3e   :  { %368 = vmatpush.bf16.msrb.mxu3 %v5142_v50  ;;  %v3832_v50 = vld [vmem:[#allocation2 + $0x38] sm:$0xf0] }
  0x3f   :  { %330 = vmatpush.bf16.msrb.mxu0 %v5160_v56 }
  0x40   :  { %343 = vmatpush.bf16.msrb.mxu1 %v5164_v57 }
  0x41   :  { %356 = vmatpush.bf16.msrb.mxu2 %v5166_v58  ;;  %v3976_v58 = vld [vmem:[#allocation2 + $0x158] sm:$0xf0] }
  0x42   :  { %369 = vmatpush.bf16.msrb.mxu3 %v5178_v62 }
  0x43   :  { %331 = vmatpush.bf16.msrb.mxu0 %v5196_v5 }
  0x44   :  { %344 = vmatpush.bf16.msrb.mxu1 %v5200_v6 }
  0x45   :  { %357 = vmatpush.bf16.msrb.mxu2 %v5202_v9  ;;  %v4698_v9 = vld [vmem:[#allocation2 + $0xb4] sm:$0xf] }
  0x46   :  { %370 = vmatpush.bf16.msrb.mxu3 %v5214_v14 }
  0x47   :  { %332 = vmatpush.bf16.msrb.mxu0 %v5232_v23 }
  0x48   :  { %345 = vmatpush.bf16.msrb.mxu1 %v5236_v24 }
  0x49   :  { %358 = vmatpush.bf16.msrb.mxu2 %v5238_v26  ;;  %v3992_v26 = vld [vmem:[#allocation2 + $0x178] sm:$0xf0] }
  0x4a   :  { %371 = vmatpush.bf16.msrb.mxu3 %v5250_v31  ;;  %v4014_v31 = vld [vmem:[#allocation2 + $0x1a0] sm:$0xf] }
  0x4b   :  { %333 = vmatpush.bf16.msrb.mxu0 %v5268_v40 }
  0x4c   :  { %346 = vmatpush.bf16.msrb.mxu1 %v5272_v41 }
  0x4d   :  { %359 = vmatpush.bf16.msrb.mxu2 %v5274_v42  ;;  %v3934_v42 = vld [vmem:[#allocation2 + $0x100] sm:$0xf] }
  0x4e   :  { %372 = vmatpush.bf16.msrb.mxu3 %v5277_v43  ;;  %334 = vmatmul.bf16.vlgmr.msrb.gmra.mxu0 %v5290_v48  ;;  %v4713_v43 = vld [vmem:[#allocation2 + $0x124] sm:$0xf0] }
  0x4f   :  { %779 = vmatpush.bf16.msra.mxu0 %v5321_v54  ;;  %347 = vmatmul.bf16.vlgmr.msrb.gmra.mxu1 %v5331_v10 }
  0x50   :  { %792 = vmatpush.bf16.msra.mxu1 %v5323_v61  ;;  %360 = vmatmul.bf16.vlgmr.msrb.gmra.mxu2 %v5290_v48  ;;  %v5358_v48 = vor.u32 %v4703_v35, %v3910_v32  ;;  %v4699_v32 = vld [vmem:[#allocation2 + $0xb4] sm:$0xf0]  ;;  %v5373_v35 = vor.u32 %v4717_v15, %v3966_v4  ;;  %v3814_v4 = vld [vmem:[#allocation2 + $0x10] sm:$0xf] }
  0x51   :  { %373 = vmatmul.bf16.vlgmr.msrb.gmra.mxu3 %v5331_v10  ;;  %805 = vmatpush.bf16.msra.mxu2 %v5333_v11  ;;  %v5382_v51 = vor.u32 %v4699_v32, %v3894_v30  ;;  %v4679_v15 = vld [vmem:[#allocation2 + $0x14] sm:$0xf0]  ;;  %v5396_v30 = vor.u32 %v4695_v27, %v3878_v20  ;;  %v3806_v32 = vld [vmem:[#allocation2] sm:$0xf]  ;;  %v5406_v20 = vor.u32 %v4706_v55, %v3928_v59  ;;  %v3958_v27 = vld [vmem:[#allocation2 + $0x130] sm:$0xf] }
  0x52   :  { %818 = vmatpush.bf16.msra.mxu3 %v5339_v18  ;;  %6743 = vst [vmem:[#allocation30_spill] sm:$0xff] %v5373_v35  ;;  %v5393_v28 = vor.u32 %v4679_v15, %v3814_v4  ;;  %v5399_v18 = vor.u32 %v4677_v52, %v3806_v32  ;;  %v4022_v32 = vld [vmem:[#allocation2 + $0x1b0] sm:$0xf]  ;;  %v3920_v59 = vld [vmem:[#allocation2 + $0xe8] sm:$0xf0] }
  0x53   :  { %780 = vmatpush.bf16.msra.mxu0 %v5337_v13  ;;  %v3950_v11 = vld [vmem:[#allocation2 + $0x120] sm:$0xf] }
  0x54   :  { %793 = vmatpush.bf16.msra.mxu1 %v5343_v22 }
  0x55   :  { %806 = vmatpush.bf16.msra.mxu2 %v5349_v36 }
  0x56   :  { %819 = vmatpush.bf16.msra.mxu3 %v5355_v47  ;;  %v3864_v47 = vld [vmem:[#allocation2 + $0x78] sm:$0xf0] }
  0x57   :  { %781 = vmatpush.bf16.msra.mxu0 %v5352_v37 }
  0x58   :  { %794 = vmatpush.bf16.msra.mxu1 %v5358_v48 }
  0x59   :  { %807 = vmatpush.bf16.msra.mxu2 %v5361_v63  ;;  %v4731_v63 = vld [vmem:[#allocation2 + $0x1b4] sm:$0xf0] }
  0x5a   :  { %820 = vmatpush.bf16.msra.mxu3 %v5367_v2  ;;  %v4690_v2 = vld [vmem:[#allocation2 + $0x74] sm:$0xf] }
  0x5b   :  { %782 = vmatpush.bf16.msra.mxu0 %v5364_v0  ;;  %v5404_v15 = vor.u32 %v4690_v2, %v3864_v47  ;;  %v4688_v47 = vld [vmem:[#allocation2 + $0x64] sm:$0xf]  ;;  %v3856_v2 = vld [vmem:[#allocation2 + $0x68] sm:$0xf0] }
  0x5c   :  { %795 = vmatpush.bf16.msra.mxu1 %v5370_v19  ;;  %v5417_v55 = vor.u32 %v4688_v47, %v3856_v2  ;;  %v3848_v47 = vld [vmem:[#allocation2 + $0x58] sm:$0xf0]  ;;  %v4702_v2 = vld [vmem:[#allocation2 + $0xd4] sm:$0xf] }
  0x5d   :  { %808 = vmatpush.bf16.msra.mxu2 %v5373_v35  ;;  %v4715_v35 = vld [vmem:[#allocation2 + $0x134] sm:$0xf0] }
  0x5e   :  { %821 = vmatpush.bf16.msra.mxu3 %v5379_v49  ;;  %v4693_v49 = vld [vmem:[#allocation2 + $0x84] sm:$0xf0]  ;;  %v5412_v52 = vor.u32 %v4715_v35, %v3958_v27  ;;  %v5423_v35 = vor.u32 %v4713_v43, %v3950_v11  ;;  %v4711_v43 = vld [vmem:[#allocation2 + $0x114] sm:$0xf0]  ;;  %v4006_v11 = vld [vmem:[#allocation2 + $0x190] sm:$0xf] }
  0x5f   :  { %783 = vmatpush.bf16.msra.mxu0 %v5376_v39  ;;  %v5402_v4 = vor.u32 %v4693_v49, %v3870_v53  ;;  %v5414_v49 = vor.u32 %v4731_v63, %v4022_v32  ;;  %v4704_v53 = vld [vmem:[#allocation2 + $0xe4] sm:$0xf]  ;;  %v4729_v63 = vld [vmem:[#allocation2 + $0x1a4] sm:$0xf0]  ;;  %v4686_v32 = vld [vmem:[#allocation2 + $0x54] sm:$0xf] }
  0x60   :  { %796 = vmatpush.bf16.msra.mxu1 %v5382_v51  ;;  %6745 = vst [vmem:[#allocation32_spill] sm:$0xff] %v5412_v52  ;;  %v5420_v36 = vor.u32 %v4704_v53, %v3920_v59  ;;  %v5426_v27 = vor.u32 %v4729_v63, %v4014_v31  ;;  %v3912_v53 = vld [vmem:[#allocation2 + $0xd8] sm:$0xf0]  ;;  %v4727_v31 = vld [vmem:[#allocation2 + $0x194] sm:$0xf0] }
  0x61   :  { %6746 = vst [vmem:[#allocation33_spill] sm:$0xff] %v5414_v49  ;;  %809 = vmatpush.bf16.msra.mxu2 %v5412_v52  ;;  %v5432_v59 = vor.u32 %v4702_v2, %v3912_v53  ;;  %v3942_v52 = vld [vmem:[#allocation2 + $0x110] sm:$0xf]  ;;  %v5438_v63 = vor.u32 %v4727_v31, %v4006_v11  ;;  %v3904_v2 = vld [vmem:[#allocation2 + $0xc8] sm:$0xf0] }
  0x62   :  { %822 = vmatpush.bf16.msra.mxu3 %v5414_v49  ;;  %6747 = vst [vmem:[#allocation34_spill] sm:$0xff] %v5423_v35  ;;  %v5429_v49 = vor.u32 %v4686_v32, %v3848_v47  ;;  %v5435_v14 = vor.u32 %v4711_v43, %v3942_v52  ;;  %v3840_v32 = vld [vmem:[#allocation2 + $0x48] sm:$0xf0]  ;;  %v4700_v47 = vld [vmem:[#allocation2 + $0xc4] sm:$0xf] }
  0x63   :  { %784 = vmatpush.bf16.msra.mxu0 %v5386_v60  ;;  %6748 = vst [vmem:[#allocation35_spill] sm:$0xff] %v5426_v27  ;;  %v5444_v53 = vor.u32 %v4700_v47, %v3904_v2  ;;  %v4709_v52 = vld [vmem:[#allocation2 + $0x104] sm:$0xf0]  ;;  %v3998_v43 = vld [vmem:[#allocation2 + $0x180] sm:$0xf] }
  0x64   :  { %797 = vmatpush.bf16.msra.mxu1 %v5390_v1  ;;  %6749 = vst [vmem:[#allocation36_spill] sm:$0xff] %v5435_v14  ;;  %v5447_v62 = vor.u32 %v4709_v52, %v3934_v42  ;;  %v4725_v11 = vld [vmem:[#allocation2 + $0x184] sm:$0xf0]  ;;  %v4722_v31 = vld [vmem:[#allocation2 + $0x174] sm:$0xf] }
  0x65   :  { %810 = vmatpush.bf16.msra.mxu2 %v5423_v35  ;;  %6750 = vst [vmem:[#allocation37_spill] sm:$0xff] %v5438_v63  ;;  %v4684_v35 = vld [vmem:[#allocation2 + $0x44] sm:$0xf]  ;;  %v4682_v47 = vld [vmem:[#allocation2 + $0x34] sm:$0xf] }
  0x66   :  { %823 = vmatpush.bf16.msra.mxu3 %v5426_v27  ;;  %v5441_v27 = vor.u32 %v4684_v35, %v3840_v32  ;;  %6751 = vst [vmem:[#allocation38_spill] sm:$0xff] %v5444_v53  ;;  %v5452_v35 = vor.u32 %v4722_v31, %v3992_v26  ;;  %v4738_v32 = vld [vmem:[#allocation2 + $0x1f4] sm:$0xf]  ;;  %v3896_v42 = vld [vmem:[#allocation2 + $0xb8] sm:$0xf0]  ;;  %v5459_v52 = vor.u32 %v4682_v47, %v3832_v50 }
  0x67   :  { %785 = vmatpush.bf16.msra.mxu0 %v5393_v28  ;;  %6752 = vst [vmem:[#allocation39_spill] sm:$0xff] %v5447_v62  ;;  %v4720_v26 = vld [vmem:[#allocation2 + $0x164] sm:$0xf]  ;;  %v3888_v47 = vld [vmem:[#allocation2 + $0xa8] sm:$0xf0] }
  0x68   :  { %798 = vmatpush.bf16.msra.mxu1 %v5396_v30  ;;  %6754 = vst [vmem:[#allocation41_spill] sm:$0xff] %v5452_v35  ;;  %v4736_v31 = vld [vmem:[#allocation2 + $0x1e4] sm:$0xf] }
  0x69   :  { %811 = vmatpush.bf16.msra.mxu2 %v5435_v14  ;;  %v5450_v14 = vor.u32 %v4725_v11, %v3998_v43  ;;  %6756 = vst [vmem:[#allocation43_spill] sm:$0xff] %v5459_v52  ;;  %v5461_v43 = vor.u32 %v4698_v9, %v3896_v42  ;;  %v3984_v11 = vld [vmem:[#allocation2 + $0x168] sm:$0xf0]  ;;  %v4696_v9 = vld [vmem:[#allocation2 + $0xa4] sm:$0xf] }
  0x6a   :  { %824 = vmatpush.bf16.msra.mxu3 %v5438_v63  ;;  %v4056_v63 = vld [vmem:[#allocation2 + $0x1f8] sm:$0xf0]  ;;  %v5464_v38 = vor.u32 %v4720_v26, %v3984_v11  ;;  %v4718_v42 = vld [vmem:[#allocation2 + $0x154] sm:$0xf] }
  0x6b   :  { %786 = vmatpush.bf16.msra.mxu0 %v5399_v18  ;;  %6753 = vst [vmem:[#allocation40_spill] sm:$0xff] %v5450_v14  ;;  %v5455_v2 = vor.u32 %v4738_v32, %v4056_v63  ;;  %v4048_v63 = vld [vmem:[#allocation2 + $0x1e8] sm:$0xf0]  ;;  %v4680_v32 = vld [vmem:[#allocation2 + $0x24] sm:$0xf]  ;;  %v5475_v11 = vor.u32 %v4718_v42, %v3976_v58 }
  0x6c   :  { %799 = vmatpush.bf16.msra.mxu1 %v5402_v4  ;;  %6757 = vst [vmem:[#allocation44_spill] sm:$0xff] %v5461_v43  ;;  %v4040_v26 = vld [vmem:[#allocation2 + $0x1d8] sm:$0xf0]  ;;  %v3968_v42 = vld [vmem:[#allocation2 + $0x148] sm:$0xf0] }
  0x6d   :  { %812 = vmatpush.bf16.msra.mxu2 %v5447_v62  ;;  %6755 = vst [vmem:[#allocation42_spill] sm:$0xff] %v5455_v2  ;;  %v3824_v62 = vld [vmem:[#allocation2 + $0x28] sm:$0xf0] }
  0x6e   :  { %825 = vmatpush.bf16.msra.mxu3 %v5450_v14  ;;  %6758 = vst [vmem:[#allocation45_spill] sm:$0xff] %v5464_v38  ;;  %v5468_v14 = vor.u32 %v4736_v31, %v4048_v63  ;;  %v5470_v50 = vor.u32 %v4680_v32, %v3824_v62  ;;  %v58_v62 = vld [vmem:[%s6594_s2] sm:$0x3]  ;;  %v3880_v63 = vld [vmem:[#allocation2 + $0x98] sm:$0xf0]  ;;  %v5485_v32 = vor.u32 %v4678_v25, %v3816_v46 }
  0x6f   :  { %831 = vmatpush.bf16.msrb.mxu0 %v5404_v15  ;;  %6762 = vst [vmem:[#allocation49_spill] sm:$0xff] %v5475_v11  ;;  %v5487_v58 = vor.u32 %v4694_v12, %v3880_v63  ;;  %v4676_v25 = vld [vmem:[#allocation2 + $0x4] sm:$0xf]  ;;  %v3808_v46 = vld [vmem:[#allocation2 + $0x8] sm:$0xf0] }
  0x70   :  { %844 = vmatpush.bf16.msrb.mxu1 %v5406_v20  ;;  %6759 = vst [vmem:[#allocation46_spill] sm:$0xff] %v5468_v14  ;;  %v5499_v63 = vor.u32 %v4676_v25, %v3808_v46  ;;  %v3952_v46 = vld [vmem:[#allocation2 + $0x128] sm:$0xf0] }
  0x71   :  { %857 = vmatpush.bf16.msrb.mxu2 %v5452_v35  ;;  %6760 = vst [vmem:[#allocation47_spill] sm:$0xff] %v5470_v50  ;;  %v5472_v35 = vor.u32 %v4696_v9, %v3888_v47  ;;  %v5489_v9 = vperm.slane %v58_v62, 0  ;;  %v4716_v47 = vld [vmem:[#allocation2 + $0x144] sm:$0xf] }
  0x72   :  { %870 = vmatpush.bf16.msrb.mxu3 %v5455_v2  ;;  %v4734_v2 = vld [vmem:[#allocation2 + $0x1d4] sm:$0xf]  ;;  %6764 = vst [vmem:[#allocation51_spill] sm:$0xff] %v5485_v32 }
  0x73   :  { %832 = vmatpush.bf16.msrb.mxu0 %v5417_v55  ;;  %6761 = vst [vmem:[#allocation48_spill] sm:$0xff] %v5472_v35  ;;  %v5481_v31 = vor.u32 %v4734_v2, %v4040_v26  ;;  %v5495_v2 = vor.u32 %v4716_v47, %v3968_v42  ;;  %v4032_v26 = vld [vmem:[#allocation2 + $0x1c8] sm:$0xf0]  ;;  %v4714_v47 = vld [vmem:[#allocation2 + $0x134] sm:$0xf] }
  0x74   :  { %845 = vmatpush.bf16.msrb.mxu1 %v5420_v36  ;;  %6765 = vst [vmem:[#allocation52_spill] sm:$0xff] %v5487_v58  ;;  %v3960_v42 = vld [vmem:[#allocation2 + $0x138] sm:$0xf0] }
  0x75   :  { %858 = vmatpush.bf16.msrb.mxu2 %v5464_v38  ;;  %6763 = vst [vmem:[#allocation50_spill] sm:$0xff] %v5481_v31  ;;  %v4692_v38 = vld [vmem:[#allocation2 + $0x84] sm:$0xf] }
  0x76   :  { %871 = vmatpush.bf16.msrb.mxu3 %v5468_v14  ;;  %6766 = vst [vmem:[#allocation53_spill] sm:$0xff] %v5489_v9  ;;  %v4732_v14 = vld [vmem:[#allocation2 + $0x1c4] sm:$0xf] }
  0x77   :  { %833 = vmatpush.bf16.msrb.mxu0 %v5429_v49  ;;  %6767 = vst [vmem:[#allocation54_spill] sm:$0xff] %v5495_v2  ;;  %v5497_v12 = vor.u32 %v4732_v14, %v4032_v26  ;;  %v5510_v14 = vor.u32 %v4714_v47, %v3960_v42  ;;  %v4024_v26 = vld [vmem:[#allocation2 + $0x1b8] sm:$0xf0] }
  0x78   :  { %846 = vmatpush.bf16.msrb.mxu1 %v5432_v59  ;;  %6769 = vst [vmem:[#allocation56_spill] sm:$0xff] %v5499_v63 }
  0x79   :  { %859 = vmatpush.bf16.msrb.mxu2 %v5475_v11  ;;  %6768 = vst [vmem:[#allocation55_spill] sm:$0xff] %v5497_v12  ;;  %v3872_v11 = vld [vmem:[#allocation2 + $0x88] sm:$0xf0] }
  0x7a   :  { %872 = vmatpush.bf16.msrb.mxu3 %v5481_v31  ;;  %v5502_v31 = vor.u32 %v4692_v38, %v3872_v11  ;;  %6771 = vst [vmem:[#allocation58_spill] sm:$0xff] %v5510_v14  ;;  %v4712_v11 = vld [vmem:[#allocation2 + $0x124] sm:$0xf] }
  0x7b   :  { %834 = vmatpush.bf16.msrb.mxu0 %v5441_v27 }
  0x7c   :  { %847 = vmatpush.bf16.msrb.mxu1 %v5444_v53  ;;  %6770 = vst [vmem:[#allocation57_spill] sm:$0xff] %v5502_v31 }
  0x7d   :  { %860 = vmatpush.bf16.msrb.mxu2 %v5495_v2  ;;  %v5517_v2 = vor.u32 %v4712_v11, %v3952_v46  ;;  %v4008_v11 = vld [vmem:[#allocation2 + $0x198] sm:$0xf0] }
  0x7e   :  { %873 = vmatpush.bf16.msrb.mxu3 %v5497_v12 }
  0x7f   :  { %835 = vmatpush.bf16.msrb.mxu0 %v5459_v52  ;;  %6773 = vst [vmem:[#allocation60_spill] sm:$0xff] %v5517_v2 }
  0x80   :  { %848 = vmatpush.bf16.msrb.mxu1 %v5461_v43 }
  0x81   :  { %861 = vmatpush.bf16.msrb.mxu2 %v5510_v14  ;;  %v4726_v14 = vld [vmem:[#allocation2 + $0x194] sm:$0xf] }
  0x82   :  { %v5525_v46 = vor.u32 %v4726_v14, %v4008_v11 }
  0x83   :  { %836 = vmatpush.bf16.msrb.mxu0 %v5470_v50 }
  0x84   :  { %849 = vmatpush.bf16.msrb.mxu1 %v5472_v35  ;;  %6776 = vst [vmem:[#allocation63_spill] sm:$0xff] %v5525_v46 }
  0x85   :  { %862 = vmatpush.bf16.msrb.mxu2 %v5517_v2 }
  0x87   :  { %837 = vmatpush.bf16.msrb.mxu0 %v5485_v32  ;;  %v5506_v32 = vperm.slane %v58_v62, 1 }
  0x88   :  { %850 = vmatpush.bf16.msrb.mxu1 %v5487_v58  ;;  %v4730_v58 = vld [vmem:[#allocation2 + $0x1b4] sm:$0xf] }
  0x89   :  { %v5512_v25 = vor.u32 %v4730_v58, %v4024_v26 }
  0x8b   :  { %838 = vmatpush.bf16.msrb.mxu0 %v5499_v63  ;;  %6772 = vst [vmem:[#allocation59_spill] sm:$0xff] %v5512_v25  ;;  %874 = vmatpush.bf16.msrb.mxu3 %v5512_v25  ;;  %v4728_v63 = vld [vmem:[#allocation2 + $0x1a4] sm:$0xf]  ;;  %v3944_v25 = vld [vmem:[#allocation2 + $0x118] sm:$0xf0] }
  0x8c   :  { %851 = vmatpush.bf16.msrb.mxu1 %v5502_v31  ;;  %v4016_v31 = vld [vmem:[#allocation2 + $0x1a8] sm:$0xf0] }
  0x8d   :  { %v5519_v47 = vor.u32 %v4728_v63, %v4016_v31  ;;  %v3936_v63 = vld [vmem:[#allocation2 + $0x108] sm:$0xf0] }
  0x8f   :  { %6774 = vst [vmem:[#allocation61_spill] sm:$0xff] %v5519_v47  ;;  %875 = vmatpush.bf16.msrb.mxu3 %v5519_v47 }
  0x93   :  { %876 = vmatpush.bf16.msrb.mxu3 %v5525_v46 }
  0xab   :  { %v278_v34 = vpop.f32.mrf.mxu0 }
  0xac   :  { %v279_v21 = vadd.f32 %v278_v34, %v5489_v9  ;;  %v291_v8 = vpop.f32.mrf.mxu1 }
  0xae   :  { %v292_v38 = vadd.f32 %v291_v8, %v279_v21  ;;  %v4710_v21 = vld [vmem:[#allocation2 + $0x114] sm:$0xf] }
  0xb0   :  { %v321_v42 = vmax.f32 %v292_v38, 0.0  ;;  %v4724_v38 = vld [vmem:[#allocation2 + $0x184] sm:$0xf] }
  0xb3   :  { %v304_v34 = vpop.f32.mrf.mxu2  ;;  %v280_v26 = vpop.f32.mrf.mxu0 }
  0xb4   :  { %v305_v62 = vadd.f32 %v304_v34, %v5506_v32  ;;  %v317_v12 = vpop.f32.mrf.mxu3  ;;  %v293_v8 = vpop.f32.mrf.mxu1  ;;  %v5523_v34 = vor.u32 %v4710_v21, %v3944_v25 }
  0xb6   :  { %v318_v58 = vadd.f32 %v317_v12, %v305_v62  ;;  %6775 = vst [vmem:[#allocation62_spill] sm:$0xff] %v5523_v34  ;;  %863 = vmatpush.bf16.msrb.mxu2 %v5523_v34  ;;  %v4708_v12 = vld [vmem:[#allocation2 + $0x104] sm:$0xf] }
  0xb7   :  { %v5529_v47 = vor.u32 %v4708_v12, %v3936_v63 }
  0xb8   :  { %v322_v35 = vmax.f32 %v318_v58, 0.0  ;;  %v4000_v58 = vld [vmem:[#allocation2 + $0x188] sm:$0xf0] }
  0xb9   :  { %6777 = vst [vmem:[#allocation64_spill] sm:$0xff] %v5529_v47  ;;  %v5531_v25 = vor.u32 %v4724_v38, %v4000_v58 }
  0xba   :  { %v323_v50 = vpack.c.bf16 %v322_v35, %v321_v42  ;;  %864 = vmatpush.bf16.msrb.mxu2 %v5529_v47 }
  0xbb   :  { %v306_v31 = vpop.f32.mrf.mxu2  ;;  %6778 = vst [vmem:[#allocation65_spill] sm:$0xff] %v5531_v25  ;;  %877 = vmatpush.bf16.msrb.mxu3 %v5531_v25 }
  0xbc   :  { %v382_v62 = vunpack.c.l.b16 %v323_v50  ;;  %v383_v26 = vunpack.c.h.b16 %v323_v50  ;;  %v319_v8 = vpop.f32.mrf.mxu3 }
  0xbe   :  { %v384_v21 = vpack.c.b16 %v382_v62, %v382_v62  ;;  %v385_v14 = vpack.c.b16 %v383_v26, %v383_v26 }
  0xc0   :  { %787 = vmatmul.bf16.vlgmr.msra.gmra.mxu0 %v384_v21  ;;  %800 = vmatmul.bf16.vlgmr.msra.gmra.mxu1 %v385_v14 }
  0xcb   :  { %v335_v35 = vpop.f32.mrf.mxu0 }
  0xcc   :  { %v348_v42 = vpop.f32.mrf.mxu1  ;;  %v336_v11 = vadd.f32 %v335_v35, %v5489_v9 }
  0xce   :  { %v349_v31 = vadd.f32 %v348_v42, %v336_v11  ;;  %v4755_v42 = vld [vmem:[#allocation4 + $0x78] sm:$0xff]  ;;  %v4744_v11 = vld [vmem:[#allocation4 + $0x20] sm:$0xff] }
  0xcf   :  { %1028 = vmatpush.bf16.msra.mxu1 %v4755_v42 }
  0xd0   :  { %839 = vmatmul.bf16.vlgmr.msrb.gmra.mxu0 %v384_v21  ;;  %852 = vmatmul.bf16.vlgmr.msrb.gmra.mxu1 %v385_v14  ;;  %v378_v26 = vmax.f32 %v349_v31, 0.0  ;;  %v6780_v21 = vld [vmem:[#allocation47_spill] sm:$0xff]  ;;  %v6781_v14 = vld [vmem:[#allocation48_spill] sm:$0xff]  ;;  %v4754_v31 = vld [vmem:[#allocation4 + $0x70] sm:$0xff] }
  0xd3   :  { %v361_v50 = vpop.f32.mrf.mxu2  ;;  %v337_v38 = vpop.f32.mrf.mxu0  ;;  %1029 = vmatpush.bf16.msra.mxu1 %v4754_v31  ;;  %v4750_v31 = vld [vmem:[#allocation4 + $0x50] sm:$0xff] }
  0xd4   :  { %v362_v12 = vadd.f32 %v361_v50, %v5506_v32  ;;  %v374_v63 = vpop.f32.mrf.mxu3  ;;  %v350_v62 = vpop.f32.mrf.mxu1  ;;  %v6782_v50 = vld [vmem:[#allocation51_spill] sm:$0xff]  ;;  %v6784_v38 = vld [vmem:[#allocation56_spill] sm:$0xff] }
  0xd5   :  { %v6785_v62 = vld [vmem:[#allocation57_spill] sm:$0xff] }
  0xd6   :  { %v375_v8 = vadd.f32 %v374_v63, %v362_v12  ;;  %v6783_v12 = vld [vmem:[#allocation52_spill] sm:$0xff]  ;;  %v4743_v63 = vld [vmem:[#allocation4 + $0x18] sm:$0xff] }
  0xd8   :  { %v379_v58 = vmax.f32 %v375_v8, 0.0  ;;  %v4742_v8 = vld [vmem:[#allocation4 + $0x10] sm:$0xff] }
  0xda   :  { %v380_v46 = vpack.c.bf16 %v379_v58, %v378_v26  ;;  %v4753_v26 = vld [vmem:[#allocation4 + $0x68] sm:$0xff]  ;;  %v4752_v58 = vld [vmem:[#allocation4 + $0x60] sm:$0xff] }
  0xdb   :  { %v363_v25 = vpop.f32.mrf.mxu2  ;;  %1030 = vmatpush.bf16.msra.mxu1 %v4753_v26 }
  0xdc   :  { %v389_v47 = vunpack.c.l.b16 %v380_v46  ;;  %v390_v34 = vunpack.c.h.b16 %v380_v46  ;;  %v376_v2 = vpop.f32.mrf.mxu3  ;;  %v4745_v46 = vld [vmem:[#allocation4 + $0x28] sm:$0xff]  ;;  %v6779_v25 = vld [vmem:[#allocation44_spill] sm:$0xff] }
  0xdd   :  { %v5564_v2 = vld [vmem:[%s6592_s0 + $0xc] sm:$0xf] }
  0xde   :  { %v5537_v43 = vpack.c.b16 %v389_v47, %v389_v47  ;;  %v5539_v35 = vpack.c.b16 %v390_v34, %v390_v34  ;;  %v4747_v47 = vld [vmem:[#allocation4 + $0x38] sm:$0xff]  ;;  %v4746_v34 = vld [vmem:[#allocation4 + $0x30] sm:$0xff] }
  0xdf   :  { %1015 = vmatpush.bf16.msra.mxu0 %v4747_v47  ;;  %v4741_v47 = vld [vmem:[#allocation4 + $0x8] sm:$0xff]  ;;  %1031 = vmatpush.bf16.msra.mxu1 %v4752_v58 }
  0xe0   :  { %813 = vmatmul.bf16.vlgmr.msra.gmra.mxu2 %v5537_v43  ;;  %826 = vmatmul.bf16.vlgmr.msra.gmra.mxu3 %v5539_v35  ;;  %v6789_v58 = vld [vmem:[#allocation9_spill] sm:$0xff] }
  0xe1   :  { %1044 = vmatpush.bf16.msra.mxu2 %v5004_v3  ;;  %1057 = vmatpush.bf16.msra.mxu3 %v5015_v7 }
  0xe3   :  { %1016 = vmatpush.bf16.msra.mxu0 %v4746_v34  ;;  %v4751_v34 = vld [vmem:[#allocation4 + $0x58] sm:$0xff] }
  0xe4   :  { %1032 = vmatpush.bf16.msra.mxu1 %v4751_v34  ;;  %v6790_v34 = vld [vmem:[#allocation14_spill] sm:$0xff] }
  0xe5   :  { %1045 = vmatpush.bf16.msra.mxu2 %v5042_v16  ;;  %1058 = vmatpush.bf16.msra.mxu3 %v5044_v17 }
  0xe7   :  { %1017 = vmatpush.bf16.msra.mxu0 %v4745_v46 }
  0xe8   :  { %1033 = vmatpush.bf16.msra.mxu1 %v4750_v31  ;;  %v6793_v31 = vld [vmem:[#allocation13_spill] sm:$0xff] }
  0xe9   :  { %1046 = vmatpush.bf16.msra.mxu2 %v5079_v29  ;;  %1059 = vmatpush.bf16.msra.mxu3 %v5092_v33 }
  0xeb   :  { %1018 = vmatpush.bf16.msra.mxu0 %v4744_v11  ;;  %v4740_v11 = vld [vmem:[#allocation4] sm:$0xff] }
  0xed   :  { %1047 = vmatpush.bf16.msra.mxu2 %v5124_v44  ;;  %1060 = vmatpush.bf16.msra.mxu3 %v5128_v45 }
  0xef   :  { %1019 = vmatpush.bf16.msra.mxu0 %v4743_v63 }
  0xf0   :  { %865 = vmatmul.bf16.vlgmr.msrb.gmra.mxu2 %v5537_v43  ;;  %878 = vmatmul.bf16.vlgmr.msrb.gmra.mxu3 %v5539_v35 }
  0xf1   :  { %1048 = vmatpush.bf16.msra.mxu2 %v5160_v56  ;;  %1061 = vmatpush.bf16.msra.mxu3 %v5164_v57 }
  0xf3   :  { %1020 = vmatpush.bf16.msra.mxu0 %v4742_v8  ;;  %v6788_v8 = vld [vmem:[#allocation12_spill] sm:$0xff] }
  0xf5   :  { %1049 = vmatpush.bf16.msra.mxu2 %v5196_v5  ;;  %1062 = vmatpush.bf16.msra.mxu3 %v5200_v6 }
  0xf7   :  { %1021 = vmatpush.bf16.msra.mxu0 %v4741_v47 }
  0xf9   :  { %1050 = vmatpush.bf16.msra.mxu2 %v5232_v23  ;;  %1063 = vmatpush.bf16.msra.mxu3 %v5236_v24 }
  0xfb   :  { %1022 = vmatpush.bf16.msra.mxu0 %v4740_v11  ;;  %v6791_v11 = vld [vmem:[#allocation11_spill] sm:$0xff] }
  0xfd   :  { %1051 = vmatpush.bf16.msra.mxu2 %v5268_v40  ;;  %1064 = vmatpush.bf16.msra.mxu3 %v5272_v41 }
 0x100   :  { %1052 = vmatmul.bf16.vlgmr.msra.gmra.mxu2 %v5331_v10  ;;  %1065 = vmatmul.bf16.vlgmr.msra.gmra.mxu3 %v5564_v2 }
 0x101   :  { %1106 = vmatpush.bf16.msrb.mxu2 %v5321_v54  ;;  %1119 = vmatpush.bf16.msrb.mxu3 %v5323_v61 }
 0x105   :  { %1107 = vmatpush.bf16.msrb.mxu2 %v5337_v13  ;;  %1120 = vmatpush.bf16.msrb.mxu3 %v5343_v22 }
 0x109   :  { %1108 = vmatpush.bf16.msrb.mxu2 %v5352_v37  ;;  %1121 = vmatpush.bf16.msrb.mxu3 %v5358_v48 }
 0x10d   :  { %1109 = vmatpush.bf16.msrb.mxu2 %v5364_v0  ;;  %1122 = vmatpush.bf16.msrb.mxu3 %v5370_v19 }
 0x111   :  { %1110 = vmatpush.bf16.msrb.mxu2 %v5376_v39  ;;  %1123 = vmatpush.bf16.msrb.mxu3 %v5382_v51 }
 0x115   :  { %1111 = vmatpush.bf16.msrb.mxu2 %v5386_v60  ;;  %1124 = vmatpush.bf16.msrb.mxu3 %v5390_v1 }
 0x119   :  { %1112 = vmatpush.bf16.msrb.mxu2 %v5393_v28  ;;  %1125 = vmatpush.bf16.msrb.mxu3 %v5396_v30 }
 0x11d   :  { %1113 = vmatpush.bf16.msrb.mxu2 %v5399_v18  ;;  %1126 = vmatpush.bf16.msrb.mxu3 %v5402_v4 }
 0x120   :  { %1114 = vmatmul.bf16.vlgmr.msrb.gmra.mxu2 %v5537_v43  ;;  %1127 = vmatmul.bf16.vlgmr.msrb.gmra.mxu3 %v5539_v35 }
 0x121   :  { %1158 = vmatpush.bf16.msra.mxu2 %v5404_v15  ;;  %1171 = vmatpush.bf16.msra.mxu3 %v5406_v20 }
 0x125   :  { %1159 = vmatpush.bf16.msra.mxu2 %v5417_v55  ;;  %1172 = vmatpush.bf16.msra.mxu3 %v5420_v36 }
 0x129   :  { %1160 = vmatpush.bf16.msra.mxu2 %v5429_v49  ;;  %1173 = vmatpush.bf16.msra.mxu3 %v5432_v59 }
 0x12d   :  { %1161 = vmatpush.bf16.msra.mxu2 %v5441_v27  ;;  %1174 = vmatpush.bf16.msra.mxu3 %v5444_v53 }
 0x131   :  { %1162 = vmatpush.bf16.msra.mxu2 %v5459_v52  ;;  %1175 = vmatpush.bf16.msra.mxu3 %v6779_v25 }
 0x135   :  { %1163 = vmatpush.bf16.msra.mxu2 %v6780_v21  ;;  %1176 = vmatpush.bf16.msra.mxu3 %v6781_v14 }
 0x139   :  { %1164 = vmatpush.bf16.msra.mxu2 %v6782_v50  ;;  %1177 = vmatpush.bf16.msra.mxu3 %v6783_v12  ;;  %v6800_v50 = vld [vmem:[#allocation19_spill] sm:$0xff] }
 0x13d   :  { %1165 = vmatpush.bf16.msra.mxu2 %v6784_v38  ;;  %1178 = vmatpush.bf16.msra.mxu3 %v6785_v62  ;;  %v788_v46 = vpop.f32.mrf.mxu0  ;;  %v801_v42 = vpop.f32.mrf.mxu1  ;;  %v6786_v62 = vld [vmem:[#allocation8_spill] sm:$0xff]  ;;  %v4749_v38 = vld [vmem:[#allocation4 + $0x48] sm:$0xff] }
 0x13e   :  { %1070 = vmatpush.bf16.msrb.mxu0 %v6786_v62  ;;  %1034 = vmatpush.bf16.msra.mxu1 %v4749_v38  ;;  %v6792_v62 = vld [vmem:[#allocation16_spill] sm:$0xff] }
 0x13f   :  { %v64_v38 = vld [vmem:[%s6596_s4] sm:$0x3] }
 0x140   :  { %1166 = vmatmul.bf16.vlgmr.msra.gmra.mxu2 %v5537_v43  ;;  %1179 = vmatmul.bf16.vlgmr.msra.gmra.mxu3 %v5539_v35  ;;  %v6787_v43 = vld [vmem:[#allocation10_spill] sm:$0xff]  ;;  %v4748_v35 = vld [vmem:[#allocation4 + $0x40] sm:$0xff]  ;;  %v5625_v52 = vperm.slane %v64_v38, 1 }
 0x142   :  { %1071 = vmatpush.bf16.msrb.mxu0 %v6787_v43  ;;  %1035 = vmatpush.bf16.msra.mxu1 %v4748_v35  ;;  %v5616_v35 = vperm.slane %v64_v38, 0  ;;  %v6797_v43 = vld [vmem:[#allocation20_spill] sm:$0xff]  ;;  %6802 = vst [vmem:[#allocation67_spill] sm:$0xff] %v5625_v52 }
 0x144   :  { %6795 = vst [vmem:[#allocation66_spill] sm:$0xff] %v5616_v35 }
 0x145   :  { %v790_v63 = vpop.f32.mrf.mxu0  ;;  %v803_v26 = vpop.f32.mrf.mxu1 }
 0x146   :  { %1072 = vmatpush.bf16.msrb.mxu0 %v6788_v8  ;;  %1083 = vmatpush.bf16.msrb.mxu1 %v6789_v58  ;;  %v6794_v8 = vld [vmem:[#allocation18_spill] sm:$0xff]  ;;  %v6796_v58 = vld [vmem:[#allocation15_spill] sm:$0xff] }
 0x14a   :  { %1073 = vmatpush.bf16.msrb.mxu0 %v6790_v34  ;;  %1084 = vmatpush.bf16.msrb.mxu1 %v6791_v11  ;;  %v789_v11 = vadd.f32 %v788_v46, %v5616_v35  ;;  %v6798_v34 = vld [vmem:[#allocation17_spill] sm:$0xff] }
 0x14d   :  { %v840_v47 = vpop.f32.mrf.mxu0  ;;  %v853_v12 = vpop.f32.mrf.mxu1 }
 0x14e   :  { %1074 = vmatpush.bf16.msrb.mxu0 %v6792_v62  ;;  %1085 = vmatpush.bf16.msrb.mxu1 %v6793_v31  ;;  %v6799_v62 = vld [vmem:[#allocation22_spill] sm:$0xff]  ;;  %v802_v31 = vadd.f32 %v801_v42, %v789_v11  ;;  %v841_v42 = vadd.f32 %v840_v47, %v5625_v52  ;;  %v6809_v47 = vld [vmem:[#allocation32_spill] sm:$0xff] }
 0x14f   :  { %v6805_v11 = vld [vmem:[#allocation26_spill] sm:$0xff] }
 0x152   :  { %1075 = vmatpush.bf16.msrb.mxu0 %v6794_v8  ;;  %1086 = vmatpush.bf16.msrb.mxu1 %v6796_v58  ;;  %v6801_v8 = vld [vmem:[#allocation21_spill] sm:$0xff] }
 0x155   :  { %v842_v63 = vpop.f32.mrf.mxu0  ;;  %v855_v26 = vpop.f32.mrf.mxu1 }
 0x156   :  { %1076 = vmatpush.bf16.msrb.mxu0 %v6797_v43  ;;  %1087 = vmatpush.bf16.msrb.mxu1 %v6798_v34  ;;  %v6803_v43 = vld [vmem:[#allocation23_spill] sm:$0xff]  ;;  %v6804_v34 = vld [vmem:[#allocation24_spill] sm:$0xff] }
 0x15a   :  { %1077 = vmatpush.bf16.msrb.mxu0 %v6799_v62  ;;  %1088 = vmatpush.bf16.msrb.mxu1 %v6800_v50  ;;  %v854_v50 = vadd.f32 %v853_v12, %v841_v42  ;;  %v6810_v12 = vld [vmem:[#allocation27_spill] sm:$0xff]  ;;  %v6811_v42 = vld [vmem:[#allocation34_spill] sm:$0xff] }
 0x15e   :  { %1089 = vmatpush.bf16.msrb.mxu1 %v6801_v8 }
 0x162   :  { %1090 = vmatpush.bf16.msrb.mxu1 %v6803_v43 }
 0x163   :  { %v814_v14 = vpop.f32.mrf.mxu2  ;;  %v827_v63 = vpop.f32.mrf.mxu3 }
 0x164   :  { %v815_v26 = vadd.f32 %v814_v14, %v802_v31 }
 0x166   :  { %v828_v21 = vadd.f32 %v827_v63, %v815_v26  ;;  %v6806_v26 = vld [vmem:[#allocation28_spill] sm:$0xff] }
 0x168   :  { %v883_v25 = vmax.f32 %v828_v21, 0.0 }
 0x16a   :  { %v885_v58 = vpack.c.bf16 %v883_v25, %v883_v25  ;;  %v6807_v25 = vld [vmem:[#allocation30_spill] sm:$0xff] }
 0x16b   :  { %v816_v46 = vpop.f32.mrf.mxu2  ;;  %v829_v53 = vpop.f32.mrf.mxu3 }
 0x16c   :  { %1023 = vmatmul.bf16.vlgmr.msra.gmra.mxu0 %v885_v58  ;;  %v6808_v58 = vld [vmem:[#allocation25_spill] sm:$0xff] }
 0x16d   :  { %1132 = vmatpush.bf16.msra.mxu0 %v6804_v34 }
 0x171   :  { %1133 = vmatpush.bf16.msra.mxu0 %v6805_v11 }
 0x173   :  { %v866_v14 = vpop.f32.mrf.mxu2  ;;  %v879_v31 = vpop.f32.mrf.mxu3 }
 0x174   :  { %v867_v63 = vadd.f32 %v866_v14, %v854_v50 }
 0x175   :  { %1134 = vmatpush.bf16.msra.mxu0 %v6806_v26 }
 0x176   :  { %v880_v21 = vadd.f32 %v879_v31, %v867_v63  ;;  %v6812_v63 = vld [vmem:[#allocation29_spill] sm:$0xff] }
 0x178   :  { %v884_v38 = vmax.f32 %v880_v21, 0.0  ;;  %v6813_v21 = vld [vmem:[#allocation36_spill] sm:$0xff] }
 0x179   :  { %1135 = vmatpush.bf16.msra.mxu0 %v6807_v25 }
 0x17a   :  { %v886_v43 = vpack.c.bf16 %v884_v38, %v884_v38 }
 0x17b   :  { %v868_v46 = vpop.f32.mrf.mxu2  ;;  %v881_v53 = vpop.f32.mrf.mxu3 }
 0x17c   :  { %1036 = vmatmul.bf16.vlgmr.msra.gmra.mxu1 %v886_v43  ;;  %1078 = vmatmul.bf16.vlgmr.msrb.gmra.mxu0 %v5331_v10  ;;  %v6814_v43 = vld [vmem:[#allocation31_spill] sm:$0xff]  ;;  %v6816_v46 = vld [vmem:[#allocation41_spill] sm:$0xff] }
 0x17d   :  { %1145 = vmatpush.bf16.msra.mxu1 %v6808_v58  ;;  %1136 = vmatpush.bf16.msra.mxu0 %v6809_v47  ;;  %v6815_v10 = vld [vmem:[#allocation39_spill] sm:$0xff]  ;;  %v6835_v58 = vld [vmem:[#allocation65_spill] sm:$0xff] }
 0x181   :  { %1146 = vmatpush.bf16.msra.mxu1 %v6810_v12  ;;  %1137 = vmatpush.bf16.msra.mxu0 %v6811_v42  ;;  %v6817_v42 = vld [vmem:[#allocation33_spill] sm:$0xff] }
 0x182   :  { %v6818_v12 = vld [vmem:[#allocation45_spill] sm:$0xff] }
 0x183   :  { %v1053_v50 = vpop.f32.mrf.mxu2  ;;  %v1066_v14 = vpop.f32.mrf.mxu3 }
 0x184   :  { %v1054_v31 = vadd.f32 %v1053_v50, %v5489_v9  ;;  %v6819_v50 = vld [vmem:[#allocation35_spill] sm:$0xff] }
 0x185   :  { %1147 = vmatpush.bf16.msra.mxu1 %v6812_v63  ;;  %1138 = vmatpush.bf16.msra.mxu0 %v6813_v21  ;;  %v6820_v63 = vld [vmem:[#allocation49_spill] sm:$0xff]  ;;  %v6832_v9 = vld [vmem:[#allocation59_spill] sm:$0xff] }
 0x186   :  { %v1067_v38 = vadd.f32 %v1066_v14, %v1054_v31  ;;  %v6821_v21 = vld [vmem:[#allocation37_spill] sm:$0xff]  ;;  %v6822_v14 = vld [vmem:[#allocation54_spill] sm:$0xff]  ;;  %v6823_v31 = vld [vmem:[#allocation40_spill] sm:$0xff] }
 0x189   :  { %1148 = vmatpush.bf16.msra.mxu1 %v6814_v43  ;;  %1139 = vmatpush.bf16.msra.mxu0 %v6815_v10  ;;  %v6824_v10 = vld [vmem:[#allocation42_spill] sm:$0xff] }
 0x18a   :  { %v6828_v43 = vld [vmem:[#allocation50_spill] sm:$0xff] }
 0x18b   :  { %v1055_v53 = vpop.f32.mrf.mxu2  ;;  %v1068_v47 = vpop.f32.mrf.mxu3 }
 0x18c   :  { %1091 = vmatmul.bf16.vlgmr.msrb.gmra.mxu1 %v5564_v2  ;;  %v6825_v53 = vld [vmem:[#allocation58_spill] sm:$0xff] }
 0x18d   :  { %1184 = vmatpush.bf16.msrb.mxu0 %v6816_v46  ;;  %1149 = vmatpush.bf16.msra.mxu1 %v6817_v42  ;;  %v6826_v47 = vld [vmem:[#allocation46_spill] sm:$0xff]  ;;  %v6827_v46 = vld [vmem:[#allocation60_spill] sm:$0xff] }
 0x191   :  { %1185 = vmatpush.bf16.msrb.mxu0 %v6818_v12  ;;  %1150 = vmatpush.bf16.msra.mxu1 %v6819_v50 }
 0x195   :  { %1186 = vmatpush.bf16.msrb.mxu0 %v6820_v63  ;;  %1151 = vmatpush.bf16.msra.mxu1 %v6821_v21  ;;  %v6829_v63 = vld [vmem:[#allocation62_spill] sm:$0xff] }
 0x199   :  { %1187 = vmatpush.bf16.msrb.mxu0 %v6822_v14  ;;  %1152 = vmatpush.bf16.msra.mxu1 %v6823_v31  ;;  %v6830_v14 = vld [vmem:[#allocation55_spill] sm:$0xff]  ;;  %v6831_v31 = vld [vmem:[#allocation64_spill] sm:$0xff] }
 0x19d   :  { %1197 = vmatpush.bf16.msrb.mxu1 %v6824_v10  ;;  %1188 = vmatpush.bf16.msrb.mxu0 %v6825_v53 }
 0x1a1   :  { %1198 = vmatpush.bf16.msrb.mxu1 %v6826_v47  ;;  %1189 = vmatpush.bf16.msrb.mxu0 %v6827_v46  ;;  %v6833_v47 = vld [vmem:[#allocation61_spill] sm:$0xff]  ;;  %v6834_v46 = vld [vmem:[#allocation63_spill] sm:$0xff] }
 0x1a3   :  { %v1115_v42 = vpop.f32.mrf.mxu2  ;;  %v1128_v12 = vpop.f32.mrf.mxu3 }
 0x1a4   :  { %v1116_v50 = vadd.f32 %v1115_v42, %v5616_v35 }
 0x1a5   :  { %1199 = vmatpush.bf16.msrb.mxu1 %v6828_v43  ;;  %1190 = vmatpush.bf16.msrb.mxu0 %v6829_v63 }
 0x1a6   :  { %v5659_v21 = vadd.f32 %v1128_v12, %v1116_v50 }
 0x1a9   :  { %1200 = vmatpush.bf16.msrb.mxu1 %v6830_v14  ;;  %1191 = vmatpush.bf16.msrb.mxu0 %v6831_v31 }
 0x1ab   :  { %v1117_v10 = vpop.f32.mrf.mxu2  ;;  %v1130_v53 = vpop.f32.mrf.mxu3 }
 0x1ad   :  { %1201 = vmatpush.bf16.msrb.mxu1 %v6832_v9 }
 0x1b1   :  { %1202 = vmatpush.bf16.msrb.mxu1 %v6833_v47 }
 0x1b5   :  { %1203 = vmatpush.bf16.msrb.mxu1 %v6834_v46 }
 0x1b9   :  { %1204 = vmatpush.bf16.msrb.mxu1 %v6835_v58  ;;  %v1096_v58 = vmax.f32 %v1067_v38, 0.0  ;;  %v4760_v38 = vld [vmem:[#allocation4 + $0xa0] sm:$0xff] }
 0x1c3   :  { %v1167_v42 = vpop.f32.mrf.mxu2  ;;  %v1180_v43 = vpop.f32.mrf.mxu3 }
 0x1c4   :  { %v1168_v63 = vadd.f32 %v1167_v42, %v5625_v52 }
 0x1c6   :  { %v5668_v12 = vadd.f32 %v1180_v43, %v1168_v63 }
 0x1cb   :  { %v1169_v50 = vpop.f32.mrf.mxu2  ;;  %v1182_v14 = vpop.f32.mrf.mxu3 }
 0x1e9   :  { %v1024_v35 = vpop.f32.mrf.mxu0 }
 0x1f1   :  { %v1026_v31 = vpop.f32.mrf.mxu0 }
 0x1f2   :  { %v6836_v31 = vld [vmem:[#allocation38_spill] sm:$0xff] }
 0x1f9   :  { %v1037_v10 = vpop.f32.mrf.mxu1  ;;  %v1079_v53 = vpop.f32.mrf.mxu0 }
 0x1fa   :  { %v5670_v25 = vadd.f32 %v1037_v10, %v1024_v35  ;;  %v1080_v46 = vadd.f32 %v1079_v53, %v5506_v32  ;;  %v4762_v35 = vld [vmem:[#allocation4 + $0xb0] sm:$0xff]  ;;  %v4767_v10 = vld [vmem:[#allocation4 + $0xd8] sm:$0xff] }
 0x1fb   :  { %v6837_v53 = vld [vmem:[#allocation43_spill] sm:$0xff] }
 0x201   :  { %v1039_v9 = vpop.f32.mrf.mxu1  ;;  %v1081_v47 = vpop.f32.mrf.mxu0 }
 0x202   :  { %v5700_v9 = vld [vmem:[%s6592_s0 + $0x10] sm:$0xf]  ;;  %v4759_v47 = vld [vmem:[#allocation4 + $0x98] sm:$0xff] }
 0x209   :  { %v1092_v26 = vpop.f32.mrf.mxu1 }
 0x20a   :  { %v1093_v11 = vadd.f32 %v1092_v26, %v1080_v46  ;;  %v4761_v26 = vld [vmem:[#allocation4 + $0xa8] sm:$0xff]  ;;  %v4768_v46 = vld [vmem:[#allocation4 + $0xe0] sm:$0xff] }
 0x20c   :  { %v1097_v34 = vmax.f32 %v1093_v11, 0.0  ;;  %v4770_v11 = vld [vmem:[#allocation4 + $0xf0] sm:$0xff] }
 0x20e   :  { %v1098_v8 = vpack.c.bf16 %v1097_v34, %v1096_v58  ;;  %v4771_v34 = vld [vmem:[#allocation4 + $0xf8] sm:$0xff]  ;;  %v4769_v58 = vld [vmem:[#allocation4 + $0xe8] sm:$0xff] }
 0x20f   :  { %1356 = vmatpush.bf16.msrb.mxu3 %v4771_v34  ;;  %v4757_v34 = vld [vmem:[#allocation4 + $0x88] sm:$0xff] }
 0x210   :  { %v1100_v42 = vunpack.c.l.b16 %v1098_v8  ;;  %v1101_v63 = vunpack.c.h.b16 %v1098_v8  ;;  %v4763_v8 = vld [vmem:[#allocation4 + $0xb8] sm:$0xff] }
 0x211   :  { %v1094_v43 = vpop.f32.mrf.mxu1  ;;  %1343 = vmatpush.bf16.msrb.mxu2 %v4763_v8  ;;  %v6840_v8 = vld [vmem:[#allocation48_spill] sm:$0xff] }
 0x212   :  { %v5673_v50 = vpack.c.b16 %v1100_v42, %v1100_v42  ;;  %v5675_v14 = vpack.c.b16 %v1101_v63, %v1101_v63  ;;  %v6838_v42 = vld [vmem:[#allocation44_spill] sm:$0xff]  ;;  %v4758_v63 = vld [vmem:[#allocation4 + $0x90] sm:$0xff]  ;;  %v6839_v43 = vld [vmem:[#allocation47_spill] sm:$0xff] }
 0x213   :  { %1357 = vmatpush.bf16.msrb.mxu3 %v4770_v11  ;;  %v6842_v11 = vld [vmem:[#allocation52_spill] sm:$0xff] }
 0x214   :  { %1140 = vmatmul.bf16.vlgmr.msra.gmra.mxu0 %v5673_v50  ;;  %1153 = vmatmul.bf16.vlgmr.msra.gmra.mxu1 %v5675_v14 }
 0x215   :  { %1372 = vmatpush.bf16.msra.mxu0 %v5004_v3  ;;  %1385 = vmatpush.bf16.msra.mxu1 %v5015_v7 }
 0x216   :  { %1344 = vmatpush.bf16.msrb.mxu2 %v4762_v35  ;;  %v6841_v35 = vld [vmem:[#allocation51_spill] sm:$0xff] }
 0x217   :  { %1358 = vmatpush.bf16.msrb.mxu3 %v4769_v58  ;;  %v6843_v58 = vld [vmem:[#allocation56_spill] sm:$0xff] }
 0x219   :  { %1373 = vmatpush.bf16.msra.mxu0 %v5042_v16  ;;  %1386 = vmatpush.bf16.msra.mxu1 %v5044_v17 }
 0x21a   :  { %1345 = vmatpush.bf16.msrb.mxu2 %v4761_v26  ;;  %v4756_v26 = vld [vmem:[#allocation4 + $0x80] sm:$0xff] }
 0x21b   :  { %1359 = vmatpush.bf16.msrb.mxu3 %v4768_v46  ;;  %v6845_v46 = vld [vmem:[#allocation8_spill] sm:$0xff] }
 0x21d   :  { %1374 = vmatpush.bf16.msra.mxu0 %v5079_v29  ;;  %1387 = vmatpush.bf16.msra.mxu1 %v5092_v33 }
 0x21e   :  { %1346 = vmatpush.bf16.msrb.mxu2 %v4760_v38  ;;  %v6844_v38 = vld [vmem:[#allocation57_spill] sm:$0xff] }
 0x21f   :  { %1360 = vmatpush.bf16.msrb.mxu3 %v4767_v10  ;;  %v6846_v10 = vld [vmem:[#allocation10_spill] sm:$0xff] }
 0x221   :  { %1375 = vmatpush.bf16.msra.mxu0 %v5124_v44  ;;  %1388 = vmatpush.bf16.msra.mxu1 %v5128_v45 }
 0x222   :  { %1347 = vmatpush.bf16.msrb.mxu2 %v4759_v47  ;;  %v4766_v47 = vld [vmem:[#allocation4 + $0xd0] sm:$0xff] }
 0x223   :  { %1361 = vmatpush.bf16.msrb.mxu3 %v4766_v47  ;;  %v6855_v47 = vld [vmem:[#allocation15_spill] sm:$0xff] }
 0x224   :  { %1192 = vmatmul.bf16.vlgmr.msrb.gmra.mxu0 %v5673_v50  ;;  %1205 = vmatmul.bf16.vlgmr.msrb.gmra.mxu1 %v5675_v14 }
 0x225   :  { %1376 = vmatpush.bf16.msra.mxu0 %v5160_v56  ;;  %1389 = vmatpush.bf16.msra.mxu1 %v5164_v57 }
 0x226   :  { %1348 = vmatpush.bf16.msrb.mxu2 %v4758_v63  ;;  %v4765_v63 = vld [vmem:[#allocation4 + $0xc8] sm:$0xff] }
 0x227   :  { %1362 = vmatpush.bf16.msrb.mxu3 %v4765_v63  ;;  %v6856_v63 = vld [vmem:[#allocation17_spill] sm:$0xff] }
 0x229   :  { %1377 = vmatpush.bf16.msra.mxu0 %v5196_v5  ;;  %1390 = vmatpush.bf16.msra.mxu1 %v5200_v6 }
 0x22a   :  { %1349 = vmatpush.bf16.msrb.mxu2 %v4757_v34  ;;  %v4764_v34 = vld [vmem:[#allocation4 + $0xc0] sm:$0xff] }
 0x22b   :  { %1363 = vmatpush.bf16.msrb.mxu3 %v4764_v34 }
 0x22d   :  { %1378 = vmatpush.bf16.msra.mxu0 %v5232_v23  ;;  %1391 = vmatpush.bf16.msra.mxu1 %v5236_v24 }
 0x22e   :  { %1350 = vmatpush.bf16.msrb.mxu2 %v4756_v26  ;;  %v6850_v26 = vld [vmem:[#allocation16_spill] sm:$0xff] }
 0x231   :  { %1379 = vmatpush.bf16.msra.mxu0 %v5268_v40  ;;  %1392 = vmatpush.bf16.msra.mxu1 %v5272_v41 }
 0x232   :  { %1398 = vmatpush.bf16.msra.mxu2 %v6845_v46  ;;  %v6851_v46 = vld [vmem:[#allocation11_spill] sm:$0xff] }
 0x234   :  { %1380 = vmatmul.bf16.vlgmr.msra.gmra.mxu0 %v5564_v2  ;;  %1393 = vmatmul.bf16.vlgmr.msra.gmra.mxu1 %v5700_v9 }
 0x235   :  { %1434 = vmatpush.bf16.msrb.mxu0 %v5321_v54  ;;  %1447 = vmatpush.bf16.msrb.mxu1 %v5323_v61 }
 0x236   :  { %1399 = vmatpush.bf16.msra.mxu2 %v6846_v10  ;;  %v6854_v10 = vld [vmem:[#allocation20_spill] sm:$0xff] }
 0x239   :  { %1435 = vmatpush.bf16.msrb.mxu0 %v5337_v13  ;;  %1448 = vmatpush.bf16.msrb.mxu1 %v5343_v22 }
 0x23d   :  { %1436 = vmatpush.bf16.msrb.mxu0 %v5352_v37  ;;  %1449 = vmatpush.bf16.msrb.mxu1 %v5358_v48 }
 0x241   :  { %1437 = vmatpush.bf16.msrb.mxu0 %v5364_v0  ;;  %1450 = vmatpush.bf16.msrb.mxu1 %v5370_v19 }
 0x245   :  { %1438 = vmatpush.bf16.msrb.mxu0 %v5376_v39  ;;  %1451 = vmatpush.bf16.msrb.mxu1 %v5382_v51 }
 0x249   :  { %1439 = vmatpush.bf16.msrb.mxu0 %v5386_v60  ;;  %1452 = vmatpush.bf16.msrb.mxu1 %v5390_v1 }
 0x24d   :  { %1440 = vmatpush.bf16.msrb.mxu0 %v5393_v28  ;;  %1453 = vmatpush.bf16.msrb.mxu1 %v5396_v30 }
 0x251   :  { %1441 = vmatpush.bf16.msrb.mxu0 %v5399_v18  ;;  %1454 = vmatpush.bf16.msrb.mxu1 %v5402_v4 }
 0x254   :  { %1442 = vmatmul.bf16.vlgmr.msrb.gmra.mxu0 %v5673_v50  ;;  %1455 = vmatmul.bf16.vlgmr.msrb.gmra.mxu1 %v5675_v14 }
 0x255   :  { %1486 = vmatpush.bf16.msra.mxu0 %v5404_v15  ;;  %1499 = vmatpush.bf16.msra.mxu1 %v5406_v20 }
 0x259   :  { %1487 = vmatpush.bf16.msra.mxu0 %v5417_v55  ;;  %1500 = vmatpush.bf16.msra.mxu1 %v5420_v36 }
 0x25d   :  { %1488 = vmatpush.bf16.msra.mxu0 %v5429_v49  ;;  %1501 = vmatpush.bf16.msra.mxu1 %v5432_v59 }
 0x261   :  { %1489 = vmatpush.bf16.msra.mxu0 %v5441_v27  ;;  %1502 = vmatpush.bf16.msra.mxu1 %v6836_v31 }
 0x265   :  { %1490 = vmatpush.bf16.msra.mxu0 %v6837_v53  ;;  %1503 = vmatpush.bf16.msra.mxu1 %v6838_v42  ;;  %v6862_v42 = vld [vmem:[#allocation28_spill] sm:$0xff] }
 0x269   :  { %1491 = vmatpush.bf16.msra.mxu0 %v6839_v43  ;;  %1504 = vmatpush.bf16.msra.mxu1 %v6840_v8 }
 0x26d   :  { %1492 = vmatpush.bf16.msra.mxu0 %v6841_v35  ;;  %1505 = vmatpush.bf16.msra.mxu1 %v6842_v11  ;;  %v6847_v35 = vld [vmem:[#allocation12_spill] sm:$0xff]  ;;  %v6848_v11 = vld [vmem:[#allocation14_spill] sm:$0xff] }
 0x26e   :  { %1400 = vmatpush.bf16.msra.mxu2 %v6847_v35 }
 0x271   :  { %1493 = vmatpush.bf16.msra.mxu0 %v6843_v58  ;;  %1506 = vmatpush.bf16.msra.mxu1 %v6844_v38  ;;  %v6849_v38 = vld [vmem:[#allocation9_spill] sm:$0xff] }
 0x272   :  { %1401 = vmatpush.bf16.msra.mxu2 %v6848_v11  ;;  %1411 = vmatpush.bf16.msra.mxu3 %v6849_v38  ;;  %v6857_v11 = vld [vmem:[#allocation19_spill] sm:$0xff] }
 0x274   :  { %1494 = vmatmul.bf16.vlgmr.msra.gmra.mxu0 %v5673_v50  ;;  %1507 = vmatmul.bf16.vlgmr.msra.gmra.mxu1 %v5675_v14  ;;  %v6852_v50 = vld [vmem:[#allocation18_spill] sm:$0xff]  ;;  %v6853_v14 = vld [vmem:[#allocation13_spill] sm:$0xff] }
 0x276   :  { %1402 = vmatpush.bf16.msra.mxu2 %v6850_v26  ;;  %1412 = vmatpush.bf16.msra.mxu3 %v6851_v46  ;;  %v6858_v46 = vld [vmem:[#allocation21_spill] sm:$0xff] }
 0x27a   :  { %1403 = vmatpush.bf16.msra.mxu2 %v6852_v50  ;;  %1413 = vmatpush.bf16.msra.mxu3 %v6853_v14  ;;  %v6859_v14 = vld [vmem:[#allocation23_spill] sm:$0xff] }
 0x27e   :  { %1404 = vmatpush.bf16.msra.mxu2 %v6854_v10  ;;  %1414 = vmatpush.bf16.msra.mxu3 %v6855_v47  ;;  %v6860_v47 = vld [vmem:[#allocation24_spill] sm:$0xff] }
 0x282   :  { %1405 = vmatpush.bf16.msra.mxu2 %v6799_v62  ;;  %1415 = vmatpush.bf16.msra.mxu3 %v6856_v63  ;;  %v6861_v62 = vld [vmem:[#allocation26_spill] sm:$0xff] }
 0x286   :  { %1416 = vmatpush.bf16.msra.mxu3 %v6857_v11 }
 0x28a   :  { %1417 = vmatpush.bf16.msra.mxu3 %v6858_v46 }
 0x28e   :  { %1418 = vmatpush.bf16.msra.mxu3 %v6859_v14 }
 0x291   :  { %v1141_v34 = vpop.f32.mrf.mxu0  ;;  %v1154_v38 = vpop.f32.mrf.mxu1 }
 0x292   :  { %v1142_v26 = vadd.f32 %v1141_v34, %v5659_v21 }
 0x294   :  { %v1155_v35 = vadd.f32 %v1154_v38, %v1142_v26  ;;  %v6863_v26 = vld [vmem:[#allocation30_spill] sm:$0xff] }
 0x296   :  { %v1210_v50 = vmax.f32 %v1155_v35, 0.0 }
 0x298   :  { %v1212_v58 = vpack.c.bf16 %v1210_v50, %v1210_v50 }
 0x299   :  { %v1143_v10 = vpop.f32.mrf.mxu0  ;;  %v1156_v8 = vpop.f32.mrf.mxu1 }
 0x29a   :  { %1351 = vmatmul.bf16.vlgmr.msrb.gmra.mxu2 %v1212_v58  ;;  %v6864_v8 = vld [vmem:[#allocation25_spill] sm:$0xff]  ;;  %v6865_v58 = vld [vmem:[#allocation32_spill] sm:$0xff]  ;;  %v6866_v10 = vld [vmem:[#allocation27_spill] sm:$0xff] }
 0x29b   :  { %1460 = vmatpush.bf16.msrb.mxu2 %v6860_v47 }
 0x29f   :  { %1461 = vmatpush.bf16.msrb.mxu2 %v6861_v62  ;;  %v6867_v62 = vld [vmem:[#allocation34_spill] sm:$0xff] }
 0x2a1   :  { %v1193_v63 = vpop.f32.mrf.mxu0  ;;  %v1206_v11 = vpop.f32.mrf.mxu1 }
 0x2a2   :  { %v1194_v43 = vadd.f32 %v1193_v63, %v5668_v12 }
 0x2a3   :  { %1462 = vmatpush.bf16.msrb.mxu2 %v6862_v42  ;;  %v6894_v42 = vld [vmem:[#allocation65_spill] sm:$0xff] }
 0x2a4   :  { %v1207_v21 = vadd.f32 %v1206_v11, %v1194_v43  ;;  %v6868_v43 = vld [vmem:[#allocation53_spill] sm:$0xff] }
 0x2a6   :  { %v1211_v38 = vmax.f32 %v1207_v21, 0.0  ;;  %v6869_v21 = vld [vmem:[#allocation29_spill] sm:$0xff] }
 0x2a7   :  { %1463 = vmatpush.bf16.msrb.mxu2 %v6863_v26  ;;  %v6891_v26 = vld [vmem:[#allocation59_spill] sm:$0xff] }
 0x2a8   :  { %v1213_v35 = vpack.c.bf16 %v1211_v38, %v1211_v38  ;;  %v6870_v38 = vld [vmem:[#allocation36_spill] sm:$0xff] }
 0x2a9   :  { %v1195_v50 = vpop.f32.mrf.mxu0  ;;  %v1208_v34 = vpop.f32.mrf.mxu1 }
 0x2aa   :  { %1364 = vmatmul.bf16.vlgmr.msrb.gmra.mxu3 %v1213_v35  ;;  %1406 = vmatmul.bf16.vlgmr.msra.gmra.mxu2 %v5564_v2  ;;  %v6871_v35 = vld [vmem:[#allocation31_spill] sm:$0xff]  ;;  %v6873_v34 = vld [vmem:[#allocation41_spill] sm:$0xff] }
 0x2ab   :  { %1473 = vmatpush.bf16.msrb.mxu3 %v6864_v8  ;;  %1464 = vmatpush.bf16.msrb.mxu2 %v6865_v58  ;;  %v6872_v2 = vld [vmem:[#allocation39_spill] sm:$0xff] }
 0x2af   :  { %1474 = vmatpush.bf16.msrb.mxu3 %v6866_v10  ;;  %1465 = vmatpush.bf16.msrb.mxu2 %v6867_v62  ;;  %v6874_v62 = vld [vmem:[#allocation33_spill] sm:$0xff] }
 0x2b0   :  { %v6875_v10 = vld [vmem:[#allocation45_spill] sm:$0xff] }
 0x2b1   :  { %v1381_v12 = vpop.f32.mrf.mxu0  ;;  %v1394_v63 = vpop.f32.mrf.mxu1 }
 0x2b2   :  { %v1382_v11 = vadd.f32 %v1381_v12, %v6868_v43  ;;  %v6876_v12 = vld [vmem:[#allocation35_spill] sm:$0xff]  ;;  %v6886_v43 = vld [vmem:[#allocation50_spill] sm:$0xff] }
 0x2b3   :  { %1475 = vmatpush.bf16.msrb.mxu3 %v6869_v21  ;;  %1466 = vmatpush.bf16.msrb.mxu2 %v6870_v38  ;;  %v6877_v21 = vld [vmem:[#allocation49_spill] sm:$0xff] }
 0x2b4   :  { %v1395_v50 = vadd.f32 %v1394_v63, %v1382_v11  ;;  %v6878_v38 = vld [vmem:[#allocation37_spill] sm:$0xff]  ;;  %v6879_v63 = vld [vmem:[#allocation54_spill] sm:$0xff]  ;;  %v6880_v11 = vld [vmem:[#allocation40_spill] sm:$0xff] }
 0x2b7   :  { %1476 = vmatpush.bf16.msrb.mxu3 %v6871_v35  ;;  %1467 = vmatpush.bf16.msrb.mxu2 %v6872_v2  ;;  %v6881_v2 = vld [vmem:[#allocation42_spill] sm:$0xff] }
 0x2b8   :  { %v6885_v35 = vld [vmem:[#allocation66_spill] sm:$0xff] }
 0x2b9   :  { %v1383_v58 = vpop.f32.mrf.mxu0  ;;  %v1396_v8 = vpop.f32.mrf.mxu1 }
 0x2ba   :  { %1419 = vmatmul.bf16.vlgmr.msra.gmra.mxu3 %v5700_v9  ;;  %v6882_v58 = vld [vmem:[#allocation58_spill] sm:$0xff] }
 0x2bb   :  { %1512 = vmatpush.bf16.msra.mxu2 %v6873_v34  ;;  %1477 = vmatpush.bf16.msrb.mxu3 %v6874_v62  ;;  %v6883_v8 = vld [vmem:[#allocation46_spill] sm:$0xff]  ;;  %v6884_v34 = vld [vmem:[#allocation60_spill] sm:$0xff] }
 0x2bf   :  { %1513 = vmatpush.bf16.msra.mxu2 %v6875_v10  ;;  %1478 = vmatpush.bf16.msrb.mxu3 %v6876_v12 }
 0x2c3   :  { %1514 = vmatpush.bf16.msra.mxu2 %v6877_v21  ;;  %1479 = vmatpush.bf16.msrb.mxu3 %v6878_v38  ;;  %v6887_v21 = vld [vmem:[#allocation62_spill] sm:$0xff] }
 0x2c7   :  { %1515 = vmatpush.bf16.msra.mxu2 %v6879_v63  ;;  %1480 = vmatpush.bf16.msrb.mxu3 %v6880_v11  ;;  %v6889_v63 = vld [vmem:[#allocation55_spill] sm:$0xff]  ;;  %v6890_v11 = vld [vmem:[#allocation64_spill] sm:$0xff] }
 0x2cb   :  { %1525 = vmatpush.bf16.msra.mxu3 %v6881_v2  ;;  %1516 = vmatpush.bf16.msra.mxu2 %v6882_v58 }
 0x2cf   :  { %1526 = vmatpush.bf16.msra.mxu3 %v6883_v8  ;;  %1517 = vmatpush.bf16.msra.mxu2 %v6884_v34  ;;  %v6892_v8 = vld [vmem:[#allocation61_spill] sm:$0xff]  ;;  %v6893_v34 = vld [vmem:[#allocation63_spill] sm:$0xff] }
 0x2d1   :  { %v1443_v62 = vpop.f32.mrf.mxu0  ;;  %v1456_v10 = vpop.f32.mrf.mxu1 }
 0x2d2   :  { %v1444_v12 = vadd.f32 %v1443_v62, %v6885_v35 }
 0x2d3   :  { %1527 = vmatpush.bf16.msra.mxu3 %v6886_v43  ;;  %1518 = vmatpush.bf16.msra.mxu2 %v6887_v21 }
 0x2d4   :  { %v5788_v38 = vadd.f32 %v1456_v10, %v1444_v12 }
 0x2d6   :  { %6888 = vst [vmem:[#allocation38_spill] sm:$0xff] %v5788_v38 }
 0x2d7   :  { %1528 = vmatpush.bf16.msra.mxu3 %v6889_v63  ;;  %1519 = vmatpush.bf16.msra.mxu2 %v6890_v11 }
 0x2d9   :  { %v1445_v2 = vpop.f32.mrf.mxu0  ;;  %v1458_v58 = vpop.f32.mrf.mxu1 }
 0x2da   :  { %v4890_v2 = vld [vmem:[%s6598_s6] ss:$0 sm:$0xff] }
 0x2db   :  { %1529 = vmatpush.bf16.msra.mxu3 %v6891_v26 }
 0x2df   :  { %1530 = vmatpush.bf16.msra.mxu3 %v6892_v8 }
 0x2e3   :  { %1531 = vmatpush.bf16.msra.mxu3 %v6893_v34  ;;  %v1041_v34 = vadd.f32 %v4890_v2, %v5670_v25  ;;  %v4779_v25 = vld [vmem:[#allocation4 + $0x138] sm:$0xff] }
 0x2e4   :  { %1671 = vmatpush.bf16.msrb.mxu0 %v4779_v25  ;;  %v6896_v2 = vld [vmem:[#allocation43_spill] sm:$0xff]  ;;  %v4772_v25 = vld [vmem:[#allocation4 + $0x100] sm:$0xff] }
 0x2e7   :  { %1532 = vmatpush.bf16.msra.mxu3 %v6894_v42 }
 0x2f1   :  { %v1495_v62 = vpop.f32.mrf.mxu0  ;;  %v1508_v43 = vpop.f32.mrf.mxu1 }
 0x2f2   :  { %v1496_v21 = vadd.f32 %v1495_v62, %v5625_v52  ;;  %v1424_v62 = vmax.f32 %v1395_v50, 0.0  ;;  %v4785_v50 = vld [vmem:[#allocation4 + $0x168] sm:$0xff] }
 0x2f4   :  { %v5797_v10 = vadd.f32 %v1508_v43, %v1496_v21 }
 0x2f6   :  { %6895 = vst [vmem:[#allocation68_spill] sm:$0xff] %v5797_v10 }
 0x2f9   :  { %v1497_v12 = vpop.f32.mrf.mxu0  ;;  %v1510_v63 = vpop.f32.mrf.mxu1 }
 0x31d   :  { %v1352_v35 = vpop.f32.mrf.mxu2 }
 0x325   :  { %v1354_v11 = vpop.f32.mrf.mxu2 }
 0x32d   :  { %v1365_v58 = vpop.f32.mrf.mxu3  ;;  %v1407_v8 = vpop.f32.mrf.mxu2 }
 0x32e   :  { %v1366_v26 = vadd.f32 %v1365_v58, %v1352_v35  ;;  %v1408_v43 = vadd.f32 %v1407_v8, %v5506_v32  ;;  %v4776_v35 = vld [vmem:[#allocation4 + $0x120] sm:$0xff]  ;;  %v4775_v8 = vld [vmem:[#allocation4 + $0x118] sm:$0xff] }
 0x32f   :  { %v6897_v58 = vld [vmem:[#allocation44_spill] sm:$0xff] }
 0x330   :  { %v5803_v42 = vadd.f32 %v1366_v26, %v1041_v34  ;;  %v4777_v26 = vld [vmem:[#allocation4 + $0x128] sm:$0xff]  ;;  %v4784_v34 = vld [vmem:[#allocation4 + $0x160] sm:$0xff] }
 0x335   :  { %v1367_v47 = vpop.f32.mrf.mxu3  ;;  %v1409_v14 = vpop.f32.mrf.mxu2 }
 0x336   :  { %v4778_v14 = vld [vmem:[#allocation4 + $0x130] sm:$0xff] }
 0x337   :  { %v4786_v47 = vld [vmem:[#allocation4 + $0x170] sm:$0xff]  ;;  %1672 = vmatpush.bf16.msrb.mxu0 %v4778_v14  ;;  %v6903_v14 = vld [vmem:[#allocation57_spill] sm:$0xff] }
 0x33b   :  { %1673 = vmatpush.bf16.msrb.mxu0 %v4777_v26  ;;  %v6905_v26 = vld [vmem:[#allocation10_spill] sm:$0xff] }
 0x33d   :  { %v1420_v21 = vpop.f32.mrf.mxu3 }
 0x33e   :  { %v1421_v63 = vadd.f32 %v1420_v21, %v1408_v43  ;;  %v4774_v43 = vld [vmem:[#allocation4 + $0x110] sm:$0xff]  ;;  %v6898_v21 = vld [vmem:[#allocation47_spill] sm:$0xff] }
 0x33f   :  { %1674 = vmatpush.bf16.msrb.mxu0 %v4776_v35  ;;  %v4782_v35 = vld [vmem:[#allocation4 + $0x150] sm:$0xff] }
 0x340   :  { %v1425_v12 = vmax.f32 %v1421_v63, 0.0  ;;  %v4773_v63 = vld [vmem:[#allocation4 + $0x108] sm:$0xff] }
 0x342   :  { %v1426_v11 = vpack.c.bf16 %v1425_v12, %v1424_v62  ;;  %v6899_v62 = vld [vmem:[#allocation48_spill] sm:$0xff]  ;;  %v6900_v12 = vld [vmem:[#allocation51_spill] sm:$0xff] }
 0x343   :  { %1675 = vmatpush.bf16.msrb.mxu0 %v4775_v8  ;;  %v4781_v8 = vld [vmem:[#allocation4 + $0x148] sm:$0xff] }
 0x344   :  { %v1428_v52 = vunpack.c.l.b16 %v1426_v11  ;;  %v1429_v10 = vunpack.c.h.b16 %v1426_v11  ;;  %v6901_v11 = vld [vmem:[#allocation52_spill] sm:$0xff] }
 0x345   :  { %v1422_v46 = vpop.f32.mrf.mxu3 }
 0x346   :  { %v5806_v38 = vpack.c.b16 %v1428_v52, %v1428_v52  ;;  %v5808_v53 = vpack.c.b16 %v1429_v10, %v1429_v10  ;;  %v5833_v52 = vld [vmem:[%s6592_s0 + $0x14] sm:$0xf]  ;;  %v4787_v46 = vld [vmem:[#allocation4 + $0x178] sm:$0xff] }
 0x347   :  { %1684 = vmatpush.bf16.msrb.mxu1 %v4787_v46  ;;  %v4783_v10 = vld [vmem:[#allocation4 + $0x158] sm:$0xff]  ;;  %1676 = vmatpush.bf16.msrb.mxu0 %v4774_v43  ;;  %v6902_v46 = vld [vmem:[#allocation56_spill] sm:$0xff] }
 0x348   :  { %1468 = vmatmul.bf16.vlgmr.msrb.gmra.mxu2 %v5806_v38  ;;  %1481 = vmatmul.bf16.vlgmr.msrb.gmra.mxu3 %v5808_v53  ;;  %v4780_v43 = vld [vmem:[#allocation4 + $0x140] sm:$0xff] }
 0x349   :  { %1700 = vmatpush.bf16.msrb.mxu2 %v5004_v3  ;;  %1713 = vmatpush.bf16.msrb.mxu3 %v5015_v7 }
 0x34b   :  { %1685 = vmatpush.bf16.msrb.mxu1 %v4786_v47  ;;  %1677 = vmatpush.bf16.msrb.mxu0 %v4773_v63  ;;  %v6904_v47 = vld [vmem:[#allocation8_spill] sm:$0xff]  ;;  %v6909_v63 = vld [vmem:[#allocation18_spill] sm:$0xff] }
 0x34d   :  { %1701 = vmatpush.bf16.msrb.mxu2 %v5042_v16  ;;  %1714 = vmatpush.bf16.msrb.mxu3 %v5044_v17 }
 0x34f   :  { %1686 = vmatpush.bf16.msrb.mxu1 %v4785_v50  ;;  %1678 = vmatpush.bf16.msrb.mxu0 %v4772_v25  ;;  %v6906_v50 = vld [vmem:[#allocation12_spill] sm:$0xff]  ;;  %v6910_v25 = vld [vmem:[#allocation9_spill] sm:$0xff] }
 0x351   :  { %1702 = vmatpush.bf16.msrb.mxu2 %v5079_v29  ;;  %1715 = vmatpush.bf16.msrb.mxu3 %v5092_v33 }
 0x353   :  { %1687 = vmatpush.bf16.msrb.mxu1 %v4784_v34  ;;  %1726 = vmatpush.bf16.msra.mxu0 %v6904_v47  ;;  %v6907_v34 = vld [vmem:[#allocation14_spill] sm:$0xff] }
 0x354   :  { %v6918_v47 = vld [vmem:[#allocation38_spill] sm:$0xff] }
 0x355   :  { %1703 = vmatpush.bf16.msrb.mxu2 %v5124_v44  ;;  %1716 = vmatpush.bf16.msrb.mxu3 %v5128_v45 }
 0x357   :  { %1688 = vmatpush.bf16.msrb.mxu1 %v4783_v10  ;;  %1727 = vmatpush.bf16.msra.mxu0 %v6905_v26  ;;  %v6908_v10 = vld [vmem:[#allocation16_spill] sm:$0xff]  ;;  %v6913_v26 = vld [vmem:[#allocation22_spill] sm:$0xff] }
 0x358   :  { %1520 = vmatmul.bf16.vlgmr.msra.gmra.mxu2 %v5806_v38  ;;  %1533 = vmatmul.bf16.vlgmr.msra.gmra.mxu3 %v5808_v53 }
 0x359   :  { %1704 = vmatpush.bf16.msrb.mxu2 %v5160_v56  ;;  %1717 = vmatpush.bf16.msrb.mxu3 %v5164_v57 }
 0x35b   :  { %1728 = vmatpush.bf16.msra.mxu0 %v6906_v50  ;;  %1689 = vmatpush.bf16.msrb.mxu1 %v4782_v35  ;;  %v6914_v50 = vld [vmem:[#allocation13_spill] sm:$0xff]  ;;  %v6915_v35 = vld [vmem:[#allocation15_spill] sm:$0xff] }
 0x35d   :  { %1705 = vmatpush.bf16.msrb.mxu2 %v5196_v5  ;;  %1718 = vmatpush.bf16.msrb.mxu3 %v5200_v6 }
 0x35f   :  { %1729 = vmatpush.bf16.msra.mxu0 %v6907_v34  ;;  %1690 = vmatpush.bf16.msrb.mxu1 %v4781_v8  ;;  %v6916_v34 = vld [vmem:[#allocation17_spill] sm:$0xff]  ;;  %v6917_v8 = vld [vmem:[#allocation19_spill] sm:$0xff] }
 0x361   :  { %1706 = vmatpush.bf16.msrb.mxu2 %v5232_v23  ;;  %1719 = vmatpush.bf16.msrb.mxu3 %v5236_v24 }
 0x363   :  { %1730 = vmatpush.bf16.msra.mxu0 %v6908_v10  ;;  %1691 = vmatpush.bf16.msrb.mxu1 %v4780_v43 }
 0x365   :  { %1707 = vmatpush.bf16.msrb.mxu2 %v5268_v40  ;;  %1720 = vmatpush.bf16.msrb.mxu3 %v5272_v41 }
 0x367   :  { %1731 = vmatpush.bf16.msra.mxu0 %v6909_v63  ;;  %1739 = vmatpush.bf16.msra.mxu1 %v6910_v25  ;;  %v6919_v25 = vld [vmem:[#allocation21_spill] sm:$0xff] }
 0x368   :  { %1708 = vmatmul.bf16.vlgmr.msrb.gmra.mxu2 %v5700_v9  ;;  %1721 = vmatmul.bf16.vlgmr.msrb.gmra.mxu3 %v5833_v52 }
 0x369   :  { %1762 = vmatpush.bf16.msra.mxu2 %v5321_v54  ;;  %1775 = vmatpush.bf16.msra.mxu3 %v5323_v61 }
 0x36d   :  { %1763 = vmatpush.bf16.msra.mxu2 %v5337_v13  ;;  %1776 = vmatpush.bf16.msra.mxu3 %v5343_v22 }
 0x371   :  { %1764 = vmatpush.bf16.msra.mxu2 %v5352_v37  ;;  %1777 = vmatpush.bf16.msra.mxu3 %v5358_v48 }
 0x375   :  { %1765 = vmatpush.bf16.msra.mxu2 %v5364_v0  ;;  %1778 = vmatpush.bf16.msra.mxu3 %v5370_v19 }
 0x379   :  { %1766 = vmatpush.bf16.msra.mxu2 %v5376_v39  ;;  %1779 = vmatpush.bf16.msra.mxu3 %v5382_v51 }
 0x37d   :  { %1767 = vmatpush.bf16.msra.mxu2 %v5386_v60  ;;  %1780 = vmatpush.bf16.msra.mxu3 %v5390_v1 }
 0x381   :  { %1768 = vmatpush.bf16.msra.mxu2 %v5393_v28  ;;  %1781 = vmatpush.bf16.msra.mxu3 %v5396_v30 }
 0x385   :  { %1769 = vmatpush.bf16.msra.mxu2 %v5399_v18  ;;  %1782 = vmatpush.bf16.msra.mxu3 %v5402_v4 }
 0x388   :  { %1770 = vmatmul.bf16.vlgmr.msra.gmra.mxu2 %v5806_v38  ;;  %1783 = vmatmul.bf16.vlgmr.msra.gmra.mxu3 %v5808_v53 }
 0x389   :  { %1814 = vmatpush.bf16.msrb.mxu2 %v5404_v15  ;;  %1827 = vmatpush.bf16.msrb.mxu3 %v5406_v20 }
 0x38d   :  { %1815 = vmatpush.bf16.msrb.mxu2 %v5417_v55  ;;  %1828 = vmatpush.bf16.msrb.mxu3 %v5420_v36 }
 0x391   :  { %1816 = vmatpush.bf16.msrb.mxu2 %v5429_v49  ;;  %1829 = vmatpush.bf16.msrb.mxu3 %v5432_v59 }
 0x395   :  { %1817 = vmatpush.bf16.msrb.mxu2 %v5441_v27  ;;  %1830 = vmatpush.bf16.msrb.mxu3 %v6836_v31 }
 0x399   :  { %1818 = vmatpush.bf16.msrb.mxu2 %v6896_v2  ;;  %1831 = vmatpush.bf16.msrb.mxu3 %v6897_v58 }
 0x39d   :  { %1819 = vmatpush.bf16.msrb.mxu2 %v6898_v21  ;;  %1832 = vmatpush.bf16.msrb.mxu3 %v6899_v62  ;;  %v6924_v21 = vld [vmem:[#allocation28_spill] sm:$0xff] }
 0x3a1   :  { %1820 = vmatpush.bf16.msrb.mxu2 %v6900_v12  ;;  %1833 = vmatpush.bf16.msrb.mxu3 %v6901_v11  ;;  %v6923_v12 = vld [vmem:[#allocation68_spill] sm:$0xff] }
 0x3a5   :  { %1821 = vmatpush.bf16.msrb.mxu2 %v6902_v46  ;;  %1834 = vmatpush.bf16.msrb.mxu3 %v6903_v14 }
 0x3a8   :  { %1822 = vmatmul.bf16.vlgmr.msrb.gmra.mxu2 %v5806_v38  ;;  %1835 = vmatmul.bf16.vlgmr.msrb.gmra.mxu3 %v5808_v53  ;;  %v6911_v38 = vld [vmem:[#allocation20_spill] sm:$0xff]  ;;  %v6912_v53 = vld [vmem:[#allocation11_spill] sm:$0xff] }
 0x3a9   :  { %1732 = vmatpush.bf16.msra.mxu0 %v6911_v38  ;;  %1740 = vmatpush.bf16.msra.mxu1 %v6912_v53  ;;  %v6920_v53 = vld [vmem:[#allocation23_spill] sm:$0xff] }
 0x3ad   :  { %1733 = vmatpush.bf16.msra.mxu0 %v6913_v26  ;;  %1741 = vmatpush.bf16.msra.mxu1 %v6914_v50  ;;  %v6921_v50 = vld [vmem:[#allocation24_spill] sm:$0xff] }
 0x3b1   :  { %1742 = vmatpush.bf16.msra.mxu1 %v6915_v35  ;;  %v6922_v35 = vld [vmem:[#allocation26_spill] sm:$0xff] }
 0x3b5   :  { %1743 = vmatpush.bf16.msra.mxu1 %v6916_v34 }
 0x3b9   :  { %1744 = vmatpush.bf16.msra.mxu1 %v6917_v8 }
 0x3bd   :  { %1745 = vmatpush.bf16.msra.mxu1 %v6919_v25 }
 0x3c1   :  { %1746 = vmatpush.bf16.msra.mxu1 %v6920_v53 }
 0x3cb   :  { %v1469_v10 = vpop.f32.mrf.mxu2  ;;  %v1482_v43 = vpop.f32.mrf.mxu3 }
 0x3cc   :  { %v1470_v63 = vadd.f32 %v1469_v10, %v6918_v47 }
 0x3ce   :  { %v1483_v14 = vadd.f32 %v1482_v43, %v1470_v63  ;;  %v6925_v63 = vld [vmem:[#allocation30_spill] sm:$0xff] }
 0x3d0   :  { %v1538_v38 = vmax.f32 %v1483_v14, 0.0 }
 0x3d2   :  { %v1540_v46 = vpack.c.bf16 %v1538_v38, %v1538_v38 }
 0x3d3   :  { %v1471_v26 = vpop.f32.mrf.mxu2  ;;  %v1484_v11 = vpop.f32.mrf.mxu3 }
 0x3d4   :  { %1679 = vmatmul.bf16.vlgmr.msrb.gmra.mxu0 %v1540_v46  ;;  %v6926_v11 = vld [vmem:[#allocation25_spill] sm:$0xff]  ;;  %v6927_v46 = vld [vmem:[#allocation32_spill] sm:$0xff]  ;;  %v6928_v26 = vld [vmem:[#allocation27_spill] sm:$0xff] }
 0x3d5   :  { %1788 = vmatpush.bf16.msrb.mxu0 %v6921_v50 }
 0x3d9   :  { %1789 = vmatpush.bf16.msrb.mxu0 %v6922_v35  ;;  %v6929_v35 = vld [vmem:[#allocation34_spill] sm:$0xff] }
 0x3db   :  { %v1521_v34 = vpop.f32.mrf.mxu2  ;;  %v1534_v8 = vpop.f32.mrf.mxu3 }
 0x3dc   :  { %v1522_v62 = vadd.f32 %v1521_v34, %v6923_v12 }
 0x3dd   :  { %1790 = vmatpush.bf16.msrb.mxu0 %v6924_v21  ;;  %v6956_v21 = vld [vmem:[#allocation65_spill] sm:$0xff] }
 0x3de   :  { %v1535_v47 = vadd.f32 %v1534_v8, %v1522_v62  ;;  %v6930_v62 = vld [vmem:[#allocation53_spill] sm:$0xff] }
 0x3e0   :  { %v1539_v10 = vmax.f32 %v1535_v47, 0.0  ;;  %v6931_v47 = vld [vmem:[#allocation29_spill] sm:$0xff] }
 0x3e1   :  { %1791 = vmatpush.bf16.msrb.mxu0 %v6925_v63  ;;  %v6953_v63 = vld [vmem:[#allocation59_spill] sm:$0xff] }
 0x3e2   :  { %v1541_v14 = vpack.c.bf16 %v1539_v10, %v1539_v10  ;;  %v6932_v10 = vld [vmem:[#allocation36_spill] sm:$0xff] }
 0x3e3   :  { %v1523_v38 = vpop.f32.mrf.mxu2  ;;  %v1536_v43 = vpop.f32.mrf.mxu3 }
 0x3e4   :  { %1692 = vmatmul.bf16.vlgmr.msrb.gmra.mxu1 %v1541_v14  ;;  %1734 = vmatmul.bf16.vlgmr.msra.gmra.mxu0 %v5700_v9  ;;  %v6933_v14 = vld [vmem:[#allocation31_spill] sm:$0xff]  ;;  %v6935_v43 = vld [vmem:[#allocation41_spill] sm:$0xff] }
 0x3e5   :  { %1801 = vmatpush.bf16.msrb.mxu1 %v6926_v11  ;;  %1792 = vmatpush.bf16.msrb.mxu0 %v6927_v46  ;;  %v6934_v9 = vld [vmem:[#allocation39_spill] sm:$0xff] }
 0x3e9   :  { %1802 = vmatpush.bf16.msrb.mxu1 %v6928_v26  ;;  %1793 = vmatpush.bf16.msrb.mxu0 %v6929_v35  ;;  %v6936_v35 = vld [vmem:[#allocation33_spill] sm:$0xff] }
 0x3ea   :  { %v6937_v26 = vld [vmem:[#allocation45_spill] sm:$0xff] }
 0x3eb   :  { %v1709_v12 = vpop.f32.mrf.mxu2  ;;  %v1722_v34 = vpop.f32.mrf.mxu3 }
 0x3ec   :  { %v1710_v8 = vadd.f32 %v1709_v12, %v6930_v62  ;;  %v6938_v12 = vld [vmem:[#allocation35_spill] sm:$0xff]  ;;  %v6948_v62 = vld [vmem:[#allocation50_spill] sm:$0xff] }
 0x3ed   :  { %1803 = vmatpush.bf16.msrb.mxu1 %v6931_v47  ;;  %1794 = vmatpush.bf16.msrb.mxu0 %v6932_v10  ;;  %v6939_v47 = vld [vmem:[#allocation49_spill] sm:$0xff] }
 0x3ee   :  { %v1723_v38 = vadd.f32 %v1722_v34, %v1710_v8  ;;  %v6940_v10 = vld [vmem:[#allocation37_spill] sm:$0xff]  ;;  %v6941_v34 = vld [vmem:[#allocation54_spill] sm:$0xff]  ;;  %v6942_v8 = vld [vmem:[#allocation40_spill] sm:$0xff] }
 0x3f1   :  { %1804 = vmatpush.bf16.msrb.mxu1 %v6933_v14  ;;  %1795 = vmatpush.bf16.msrb.mxu0 %v6934_v9  ;;  %v6943_v9 = vld [vmem:[#allocation42_spill] sm:$0xff] }
 0x3f2   :  { %v6947_v14 = vld [vmem:[#allocation66_spill] sm:$0xff] }
 0x3f3   :  { %v1711_v46 = vpop.f32.mrf.mxu2  ;;  %v1724_v11 = vpop.f32.mrf.mxu3 }
 0x3f4   :  { %1747 = vmatmul.bf16.vlgmr.msra.gmra.mxu1 %v5833_v52  ;;  %v6944_v46 = vld [vmem:[#allocation58_spill] sm:$0xff] }
 0x3f5   :  { %1840 = vmatpush.bf16.msra.mxu0 %v6935_v43  ;;  %1805 = vmatpush.bf16.msrb.mxu1 %v6936_v35  ;;  %v6945_v11 = vld [vmem:[#allocation46_spill] sm:$0xff]  ;;  %v6946_v43 = vld [vmem:[#allocation60_spill] sm:$0xff] }
 0x3f9   :  { %1841 = vmatpush.bf16.msra.mxu0 %v6937_v26  ;;  %1806 = vmatpush.bf16.msrb.mxu1 %v6938_v12 }
 0x3fd   :  { %1842 = vmatpush.bf16.msra.mxu0 %v6939_v47  ;;  %1807 = vmatpush.bf16.msrb.mxu1 %v6940_v10  ;;  %v6949_v47 = vld [vmem:[#allocation62_spill] sm:$0xff] }
 0x401   :  { %1843 = vmatpush.bf16.msra.mxu0 %v6941_v34  ;;  %1808 = vmatpush.bf16.msrb.mxu1 %v6942_v8  ;;  %v6951_v34 = vld [vmem:[#allocation55_spill] sm:$0xff]  ;;  %v6952_v8 = vld [vmem:[#allocation64_spill] sm:$0xff] }
 0x405   :  { %1853 = vmatpush.bf16.msra.mxu1 %v6943_v9  ;;  %1844 = vmatpush.bf16.msra.mxu0 %v6944_v46 }
 0x409   :  { %1854 = vmatpush.bf16.msra.mxu1 %v6945_v11  ;;  %1845 = vmatpush.bf16.msra.mxu0 %v6946_v43  ;;  %v6954_v11 = vld [vmem:[#allocation61_spill] sm:$0xff]  ;;  %v6955_v43 = vld [vmem:[#allocation63_spill] sm:$0xff] }
 0x40b   :  { %v1771_v35 = vpop.f32.mrf.mxu2  ;;  %v1784_v26 = vpop.f32.mrf.mxu3 }
 0x40c   :  { %v1772_v12 = vadd.f32 %v1771_v35, %v6947_v14  ;;  %v6957_v14 = vld [vmem:[#allocation67_spill] sm:$0xff] }
 0x40d   :  { %1855 = vmatpush.bf16.msra.mxu1 %v6948_v62  ;;  %1846 = vmatpush.bf16.msra.mxu0 %v6949_v47 }
 0x40e   :  { %v5921_v10 = vadd.f32 %v1784_v26, %v1772_v12 }
 0x410   :  { %6950 = vst [vmem:[#allocation43_spill] sm:$0xff] %v5921_v10  ;;  %v1752_v10 = vmax.f32 %v1723_v38, 0.0  ;;  %v4792_v38 = vld [vmem:[#allocation4 + $0x1a0] sm:$0xff] }
 0x411   :  { %1856 = vmatpush.bf16.msra.mxu1 %v6951_v34  ;;  %1847 = vmatpush.bf16.msra.mxu0 %v6952_v8 }
 0x413   :  { %v1773_v9 = vpop.f32.mrf.mxu2  ;;  %v1786_v46 = vpop.f32.mrf.mxu3 }
 0x415   :  { %1857 = vmatpush.bf16.msra.mxu1 %v6953_v63 }
 0x419   :  { %1858 = vmatpush.bf16.msra.mxu1 %v6954_v11 }
 0x41d   :  { %1859 = vmatpush.bf16.msra.mxu1 %v6955_v43 }
 0x421   :  { %1860 = vmatpush.bf16.msra.mxu1 %v6956_v21 }
 0x42b   :  { %v1823_v35 = vpop.f32.mrf.mxu2  ;;  %v1836_v62 = vpop.f32.mrf.mxu3 }
 0x42c   :  { %v1824_v47 = vadd.f32 %v1823_v35, %v6957_v14 }
 0x42e   :  { %v5930_v26 = vadd.f32 %v1836_v62, %v1824_v47 }
 0x433   :  { %v1825_v12 = vpop.f32.mrf.mxu2  ;;  %v1838_v34 = vpop.f32.mrf.mxu3 }
 0x451   :  { %v1680_v50 = vpop.f32.mrf.mxu0 }
 0x459   :  { %v1682_v8 = vpop.f32.mrf.mxu0 }
 0x461   :  { %v1693_v9 = vpop.f32.mrf.mxu1  ;;  %v1735_v46 = vpop.f32.mrf.mxu0 }
 0x462   :  { %v1694_v53 = vadd.f32 %v1693_v9, %v1680_v50  ;;  %v1736_v21 = vadd.f32 %v1735_v46, %v5506_v32  ;;  %v4794_v50 = vld [vmem:[#allocation4 + $0x1b0] sm:$0xff]  ;;  %v4799_v9 = vld [vmem:[#allocation4 + $0x1d8] sm:$0xff]  ;;  %v6958_v46 = vld [vmem:[#allocation44_spill] sm:$0xff] }
 0x464   :  { %v5933_v63 = vadd.f32 %v1694_v53, %v5803_v42  ;;  %v5963_v42 = vld [vmem:[%s6592_s0 + $0x18] sm:$0xf]  ;;  %v4793_v53 = vld [vmem:[#allocation4 + $0x1a8] sm:$0xff] }
 0x469   :  { %v1695_v11 = vpop.f32.mrf.mxu1  ;;  %v1737_v43 = vpop.f32.mrf.mxu0 }
 0x46a   :  { %v4800_v43 = vld [vmem:[#allocation4 + $0x1e0] sm:$0xff]  ;;  %v4791_v11 = vld [vmem:[#allocation4 + $0x198] sm:$0xff] }
 0x471   :  { %v1748_v25 = vpop.f32.mrf.mxu1 }
 0x472   :  { %v1749_v58 = vadd.f32 %v1748_v25, %v1736_v21  ;;  %v4803_v21 = vld [vmem:[#allocation4 + $0x1f8] sm:$0xff]  ;;  %v4802_v25 = vld [vmem:[#allocation4 + $0x1f0] sm:$0xff] }
 0x473   :  { %2012 = vmatpush.bf16.msra.mxu3 %v4803_v21  ;;  %v4788_v21 = vld [vmem:[#allocation4 + $0x180] sm:$0xff] }
 0x474   :  { %v1753_v35 = vmax.f32 %v1749_v58, 0.0  ;;  %v4795_v58 = vld [vmem:[#allocation4 + $0x1b8] sm:$0xff] }
 0x475   :  { %1999 = vmatpush.bf16.msra.mxu2 %v4795_v58  ;;  %v6962_v58 = vld [vmem:[#allocation52_spill] sm:$0xff] }
 0x476   :  { %v1754_v62 = vpack.c.bf16 %v1753_v35, %v1752_v10  ;;  %v4801_v10 = vld [vmem:[#allocation4 + $0x1e8] sm:$0xff]  ;;  %v4790_v35 = vld [vmem:[#allocation4 + $0x190] sm:$0xff] }
 0x477   :  { %2013 = vmatpush.bf16.msra.mxu3 %v4802_v25  ;;  %v6964_v25 = vld [vmem:[#allocation57_spill] sm:$0xff] }
 0x478   :  { %v1756_v47 = vunpack.c.l.b16 %v1754_v62  ;;  %v1757_v12 = vunpack.c.h.b16 %v1754_v62  ;;  %v6959_v62 = vld [vmem:[#allocation47_spill] sm:$0xff] }
 0x479   :  { %v1750_v34 = vpop.f32.mrf.mxu1  ;;  %2000 = vmatpush.bf16.msra.mxu2 %v4794_v50  ;;  %v6963_v50 = vld [vmem:[#allocation56_spill] sm:$0xff] }
 0x47a   :  { %v5936_v14 = vpack.c.b16 %v1756_v47, %v1756_v47  ;;  %v5938_v8 = vpack.c.b16 %v1757_v12, %v1757_v12  ;;  %v6960_v47 = vld [vmem:[#allocation48_spill] sm:$0xff]  ;;  %v4789_v12 = vld [vmem:[#allocation4 + $0x188] sm:$0xff]  ;;  %v6961_v34 = vld [vmem:[#allocation51_spill] sm:$0xff] }
 0x47b   :  { %2014 = vmatpush.bf16.msra.mxu3 %v4801_v10  ;;  %v4798_v10 = vld [vmem:[#allocation4 + $0x1d0] sm:$0xff] }
 0x47c   :  { %1796 = vmatmul.bf16.vlgmr.msrb.gmra.mxu0 %v5936_v14  ;;  %1809 = vmatmul.bf16.vlgmr.msrb.gmra.mxu1 %v5938_v8 }
 0x47d   :  { %2028 = vmatpush.bf16.msrb.mxu0 %v5004_v3  ;;  %2041 = vmatpush.bf16.msrb.mxu1 %v5015_v7 }
 0x47e   :  { %2001 = vmatpush.bf16.msra.mxu2 %v4793_v53  ;;  %v6965_v53 = vld [vmem:[#allocation8_spill] sm:$0xff] }
 0x47f   :  { %2015 = vmatpush.bf16.msra.mxu3 %v4800_v43  ;;  %v4797_v43 = vld [vmem:[#allocation4 + $0x1c8] sm:$0xff] }
 0x481   :  { %2029 = vmatpush.bf16.msrb.mxu0 %v5042_v16  ;;  %2042 = vmatpush.bf16.msrb.mxu1 %v5044_v17 }
 0x482   :  { %2002 = vmatpush.bf16.msra.mxu2 %v4792_v38  ;;  %v6966_v38 = vld [vmem:[#allocation10_spill] sm:$0xff] }
 0x483   :  { %2016 = vmatpush.bf16.msra.mxu3 %v4799_v9  ;;  %v4796_v9 = vld [vmem:[#allocation4 + $0x1c0] sm:$0xff] }
 0x485   :  { %2030 = vmatpush.bf16.msrb.mxu0 %v5079_v29  ;;  %2043 = vmatpush.bf16.msrb.mxu1 %v5092_v33 }
 0x486   :  { %2003 = vmatpush.bf16.msra.mxu2 %v4791_v11  ;;  %v6967_v11 = vld [vmem:[#allocation12_spill] sm:$0xff] }
 0x487   :  { %2017 = vmatpush.bf16.msra.mxu3 %v4798_v10  ;;  %v6975_v10 = vld [vmem:[#allocation15_spill] sm:$0xff] }
 0x489   :  { %2031 = vmatpush.bf16.msrb.mxu0 %v5124_v44  ;;  %2044 = vmatpush.bf16.msrb.mxu1 %v5128_v45 }
 0x48a   :  { %2004 = vmatpush.bf16.msra.mxu2 %v4790_v35  ;;  %v6968_v35 = vld [vmem:[#allocation14_spill] sm:$0xff] }
 0x48b   :  { %2018 = vmatpush.bf16.msra.mxu3 %v4797_v43  ;;  %v6977_v43 = vld [vmem:[#allocation17_spill] sm:$0xff] }
 0x48c   :  { %1848 = vmatmul.bf16.vlgmr.msra.gmra.mxu0 %v5936_v14  ;;  %1861 = vmatmul.bf16.vlgmr.msra.gmra.mxu1 %v5938_v8 }
 0x48d   :  { %2032 = vmatpush.bf16.msrb.mxu0 %v5160_v56  ;;  %2045 = vmatpush.bf16.msrb.mxu1 %v5164_v57 }
 0x48e   :  { %2005 = vmatpush.bf16.msra.mxu2 %v4789_v12  ;;  %v6969_v12 = vld [vmem:[#allocation9_spill] sm:$0xff] }
 0x48f   :  { %2019 = vmatpush.bf16.msra.mxu3 %v4796_v9 }
 0x491   :  { %2033 = vmatpush.bf16.msrb.mxu0 %v5196_v5  ;;  %2046 = vmatpush.bf16.msrb.mxu1 %v5200_v6 }
 0x492   :  { %2006 = vmatpush.bf16.msra.mxu2 %v4788_v21  ;;  %v6970_v21 = vld [vmem:[#allocation16_spill] sm:$0xff] }
 0x493   :  { %2067 = vmatpush.bf16.msrb.mxu3 %v6969_v12 }
 0x495   :  { %2034 = vmatpush.bf16.msrb.mxu0 %v5232_v23  ;;  %2047 = vmatpush.bf16.msrb.mxu1 %v5236_v24 }
 0x496   :  { %2054 = vmatpush.bf16.msrb.mxu2 %v6965_v53  ;;  %v6971_v53 = vld [vmem:[#allocation11_spill] sm:$0xff] }
 0x497   :  { %2068 = vmatpush.bf16.msrb.mxu3 %v6971_v53  ;;  %v6980_v53 = vld [vmem:[#allocation21_spill] sm:$0xff] }
 0x499   :  { %2035 = vmatpush.bf16.msrb.mxu0 %v5268_v40  ;;  %2048 = vmatpush.bf16.msrb.mxu1 %v5272_v41 }
 0x49a   :  { %2055 = vmatpush.bf16.msrb.mxu2 %v6966_v38  ;;  %v6974_v38 = vld [vmem:[#allocation20_spill] sm:$0xff] }
 0x49c   :  { %2036 = vmatmul.bf16.vlgmr.msrb.gmra.mxu0 %v5833_v52  ;;  %2049 = vmatmul.bf16.vlgmr.msrb.gmra.mxu1 %v5963_v42 }
 0x49d   :  { %2090 = vmatpush.bf16.msra.mxu0 %v5321_v54  ;;  %2103 = vmatpush.bf16.msra.mxu1 %v5323_v61 }
 0x49e   :  { %2056 = vmatpush.bf16.msrb.mxu2 %v6967_v11  ;;  %v6976_v11 = vld [vmem:[#allocation22_spill] sm:$0xff] }
 0x4a1   :  { %2091 = vmatpush.bf16.msra.mxu0 %v5337_v13  ;;  %2104 = vmatpush.bf16.msra.mxu1 %v5343_v22 }
 0x4a2   :  { %2057 = vmatpush.bf16.msrb.mxu2 %v6968_v35  ;;  %v6978_v35 = vld [vmem:[#allocation19_spill] sm:$0xff] }
 0x4a5   :  { %2092 = vmatpush.bf16.msra.mxu0 %v5352_v37  ;;  %2105 = vmatpush.bf16.msra.mxu1 %v5358_v48 }
 0x4a6   :  { %2058 = vmatpush.bf16.msrb.mxu2 %v6970_v21 }
 0x4a9   :  { %2093 = vmatpush.bf16.msra.mxu0 %v5364_v0  ;;  %2106 = vmatpush.bf16.msra.mxu1 %v5370_v19 }
 0x4ad   :  { %2094 = vmatpush.bf16.msra.mxu0 %v5376_v39  ;;  %2107 = vmatpush.bf16.msra.mxu1 %v5382_v51 }
 0x4b1   :  { %2095 = vmatpush.bf16.msra.mxu0 %v5386_v60  ;;  %2108 = vmatpush.bf16.msra.mxu1 %v5390_v1 }
 0x4b5   :  { %2096 = vmatpush.bf16.msra.mxu0 %v5393_v28  ;;  %2109 = vmatpush.bf16.msra.mxu1 %v5396_v30 }
 0x4b9   :  { %2097 = vmatpush.bf16.msra.mxu0 %v5399_v18  ;;  %2110 = vmatpush.bf16.msra.mxu1 %v5402_v4 }
 0x4bc   :  { %2098 = vmatmul.bf16.vlgmr.msra.gmra.mxu0 %v5936_v14  ;;  %2111 = vmatmul.bf16.vlgmr.msra.gmra.mxu1 %v5938_v8 }
 0x4bd   :  { %2142 = vmatpush.bf16.msrb.mxu0 %v5404_v15  ;;  %2155 = vmatpush.bf16.msrb.mxu1 %v5406_v20 }
 0x4c1   :  { %2143 = vmatpush.bf16.msrb.mxu0 %v5417_v55  ;;  %2156 = vmatpush.bf16.msrb.mxu1 %v5420_v36 }
 0x4c5   :  { %2144 = vmatpush.bf16.msrb.mxu0 %v5429_v49  ;;  %2157 = vmatpush.bf16.msrb.mxu1 %v5432_v59 }
 0x4c9   :  { %2145 = vmatpush.bf16.msrb.mxu0 %v5441_v27  ;;  %2158 = vmatpush.bf16.msrb.mxu1 %v6836_v31 }
 0x4cd   :  { %2146 = vmatpush.bf16.msrb.mxu0 %v6896_v2  ;;  %2159 = vmatpush.bf16.msrb.mxu1 %v6958_v46 }
 0x4d1   :  { %2147 = vmatpush.bf16.msrb.mxu0 %v6959_v62  ;;  %2160 = vmatpush.bf16.msrb.mxu1 %v6960_v47  ;;  %v6984_v62 = vld [vmem:[#allocation28_spill] sm:$0xff] }
 0x4d5   :  { %2148 = vmatpush.bf16.msrb.mxu0 %v6961_v34  ;;  %2161 = vmatpush.bf16.msrb.mxu1 %v6962_v58 }
 0x4d9   :  { %2149 = vmatpush.bf16.msrb.mxu0 %v6963_v50  ;;  %2162 = vmatpush.bf16.msrb.mxu1 %v6964_v25  ;;  %v6979_v25 = vld [vmem:[#allocation43_spill] sm:$0xff] }
 0x4dc   :  { %2150 = vmatmul.bf16.vlgmr.msrb.gmra.mxu0 %v5936_v14  ;;  %2163 = vmatmul.bf16.vlgmr.msrb.gmra.mxu1 %v5938_v8  ;;  %v6972_v14 = vld [vmem:[#allocation18_spill] sm:$0xff]  ;;  %v6973_v8 = vld [vmem:[#allocation13_spill] sm:$0xff] }
 0x4dd   :  { %2059 = vmatpush.bf16.msrb.mxu2 %v6972_v14  ;;  %2069 = vmatpush.bf16.msrb.mxu3 %v6973_v8  ;;  %v6981_v8 = vld [vmem:[#allocation23_spill] sm:$0xff] }
 0x4e1   :  { %2060 = vmatpush.bf16.msrb.mxu2 %v6974_v38  ;;  %2070 = vmatpush.bf16.msrb.mxu3 %v6975_v10  ;;  %v6982_v10 = vld [vmem:[#allocation24_spill] sm:$0xff] }
 0x4e5   :  { %2061 = vmatpush.bf16.msrb.mxu2 %v6976_v11  ;;  %2071 = vmatpush.bf16.msrb.mxu3 %v6977_v43  ;;  %v6983_v11 = vld [vmem:[#allocation26_spill] sm:$0xff] }
 0x4e9   :  { %2072 = vmatpush.bf16.msrb.mxu3 %v6978_v35 }
 0x4ed   :  { %2073 = vmatpush.bf16.msrb.mxu3 %v6980_v53 }
 0x4f1   :  { %2074 = vmatpush.bf16.msrb.mxu3 %v6981_v8 }
 0x4f9   :  { %v1797_v9 = vpop.f32.mrf.mxu0  ;;  %v1810_v12 = vpop.f32.mrf.mxu1 }
 0x4fa   :  { %v1798_v21 = vadd.f32 %v1797_v9, %v6979_v25 }
 0x4fc   :  { %v1811_v50 = vadd.f32 %v1810_v12, %v1798_v21  ;;  %v6985_v21 = vld [vmem:[#allocation30_spill] sm:$0xff] }
 0x4fe   :  { %v1866_v14 = vmax.f32 %v1811_v50, 0.0 }
 0x500   :  { %v1868_v58 = vpack.c.bf16 %v1866_v14, %v1866_v14 }
 0x501   :  { %v1799_v38 = vpop.f32.mrf.mxu0  ;;  %v1812_v34 = vpop.f32.mrf.mxu1 }
 0x502   :  { %2007 = vmatmul.bf16.vlgmr.msra.gmra.mxu2 %v1868_v58  ;;  %v6986_v34 = vld [vmem:[#allocation25_spill] sm:$0xff]  ;;  %v6987_v58 = vld [vmem:[#allocation32_spill] sm:$0xff]  ;;  %v6988_v38 = vld [vmem:[#allocation27_spill] sm:$0xff] }
 0x503   :  { %2116 = vmatpush.bf16.msra.mxu2 %v6982_v10 }
 0x507   :  { %2117 = vmatpush.bf16.msra.mxu2 %v6983_v11  ;;  %v6989_v11 = vld [vmem:[#allocation34_spill] sm:$0xff] }
 0x509   :  { %v1849_v43 = vpop.f32.mrf.mxu0  ;;  %v1862_v35 = vpop.f32.mrf.mxu1 }
 0x50a   :  { %v1850_v47 = vadd.f32 %v1849_v43, %v5930_v26 }
 0x50b   :  { %2118 = vmatpush.bf16.msra.mxu2 %v6984_v62  ;;  %v7016_v62 = vld [vmem:[#allocation65_spill] sm:$0xff] }
 0x50c   :  { %v1863_v25 = vadd.f32 %v1862_v35, %v1850_v47  ;;  %v6990_v47 = vld [vmem:[#allocation53_spill] sm:$0xff] }
 0x50e   :  { %v1867_v12 = vmax.f32 %v1863_v25, 0.0  ;;  %v6991_v25 = vld [vmem:[#allocation29_spill] sm:$0xff] }
 0x50f   :  { %2119 = vmatpush.bf16.msra.mxu2 %v6985_v21  ;;  %v7013_v21 = vld [vmem:[#allocation59_spill] sm:$0xff] }
 0x510   :  { %v1869_v50 = vpack.c.bf16 %v1867_v12, %v1867_v12  ;;  %v6992_v12 = vld [vmem:[#allocation36_spill] sm:$0xff] }
 0x511   :  { %v1851_v14 = vpop.f32.mrf.mxu0  ;;  %v1864_v9 = vpop.f32.mrf.mxu1 }
 0x512   :  { %2020 = vmatmul.bf16.vlgmr.msra.gmra.mxu3 %v1869_v50  ;;  %2062 = vmatmul.bf16.vlgmr.msrb.gmra.mxu2 %v5833_v52  ;;  %v6993_v50 = vld [vmem:[#allocation31_spill] sm:$0xff]  ;;  %v6995_v9 = vld [vmem:[#allocation41_spill] sm:$0xff] }
 0x513   :  { %2129 = vmatpush.bf16.msra.mxu3 %v6986_v34  ;;  %2120 = vmatpush.bf16.msra.mxu2 %v6987_v58  ;;  %v6994_v52 = vld [vmem:[#allocation39_spill] sm:$0xff] }
 0x517   :  { %2130 = vmatpush.bf16.msra.mxu3 %v6988_v38  ;;  %2121 = vmatpush.bf16.msra.mxu2 %v6989_v11  ;;  %v6996_v11 = vld [vmem:[#allocation33_spill] sm:$0xff] }
 0x518   :  { %v6997_v38 = vld [vmem:[#allocation45_spill] sm:$0xff] }
 0x519   :  { %v2037_v26 = vpop.f32.mrf.mxu0  ;;  %v2050_v43 = vpop.f32.mrf.mxu1 }
 0x51a   :  { %v2038_v35 = vadd.f32 %v2037_v26, %v6990_v47  ;;  %v6998_v26 = vld [vmem:[#allocation35_spill] sm:$0xff]  ;;  %v7008_v47 = vld [vmem:[#allocation50_spill] sm:$0xff] }
 0x51b   :  { %2131 = vmatpush.bf16.msra.mxu3 %v6991_v25  ;;  %2122 = vmatpush.bf16.msra.mxu2 %v6992_v12  ;;  %v6999_v25 = vld [vmem:[#allocation49_spill] sm:$0xff] }
 0x51c   :  { %v2051_v14 = vadd.f32 %v2050_v43, %v2038_v35  ;;  %v7000_v12 = vld [vmem:[#allocation37_spill] sm:$0xff]  ;;  %v7001_v43 = vld [vmem:[#allocation54_spill] sm:$0xff]  ;;  %v7002_v35 = vld [vmem:[#allocation40_spill] sm:$0xff] }
 0x51f   :  { %2132 = vmatpush.bf16.msra.mxu3 %v6993_v50  ;;  %2123 = vmatpush.bf16.msra.mxu2 %v6994_v52  ;;  %v7003_v52 = vld [vmem:[#allocation42_spill] sm:$0xff] }
 0x520   :  { %v7007_v50 = vld [vmem:[#allocation66_spill] sm:$0xff] }
 0x521   :  { %v2039_v58 = vpop.f32.mrf.mxu0  ;;  %v2052_v34 = vpop.f32.mrf.mxu1 }
 0x522   :  { %2075 = vmatmul.bf16.vlgmr.msrb.gmra.mxu3 %v5963_v42  ;;  %v7004_v58 = vld [vmem:[#allocation58_spill] sm:$0xff] }
 0x523   :  { %2168 = vmatpush.bf16.msrb.mxu2 %v6995_v9  ;;  %2133 = vmatpush.bf16.msra.mxu3 %v6996_v11  ;;  %v7005_v34 = vld [vmem:[#allocation46_spill] sm:$0xff]  ;;  %v7006_v9 = vld [vmem:[#allocation60_spill] sm:$0xff] }
 0x527   :  { %2169 = vmatpush.bf16.msrb.mxu2 %v6997_v38  ;;  %2134 = vmatpush.bf16.msra.mxu3 %v6998_v26 }
 0x52b   :  { %2170 = vmatpush.bf16.msrb.mxu2 %v6999_v25  ;;  %2135 = vmatpush.bf16.msra.mxu3 %v7000_v12  ;;  %v7009_v25 = vld [vmem:[#allocation62_spill] sm:$0xff] }
 0x52f   :  { %2171 = vmatpush.bf16.msrb.mxu2 %v7001_v43  ;;  %2136 = vmatpush.bf16.msra.mxu3 %v7002_v35  ;;  %v7011_v43 = vld [vmem:[#allocation55_spill] sm:$0xff]  ;;  %v7012_v35 = vld [vmem:[#allocation64_spill] sm:$0xff] }
 0x533   :  { %2181 = vmatpush.bf16.msrb.mxu3 %v7003_v52  ;;  %2172 = vmatpush.bf16.msrb.mxu2 %v7004_v58 }
 0x537   :  { %2182 = vmatpush.bf16.msrb.mxu3 %v7005_v34  ;;  %2173 = vmatpush.bf16.msrb.mxu2 %v7006_v9  ;;  %v7014_v34 = vld [vmem:[#allocation61_spill] sm:$0xff]  ;;  %v7015_v9 = vld [vmem:[#allocation63_spill] sm:$0xff] }
 0x539   :  { %v2099_v11 = vpop.f32.mrf.mxu0  ;;  %v2112_v38 = vpop.f32.mrf.mxu1 }
 0x53a   :  { %v2100_v26 = vadd.f32 %v2099_v11, %v7007_v50  ;;  %v7017_v50 = vld [vmem:[#allocation67_spill] sm:$0xff] }
 0x53b   :  { %2183 = vmatpush.bf16.msrb.mxu3 %v7008_v47  ;;  %2174 = vmatpush.bf16.msrb.mxu2 %v7009_v25 }
 0x53c   :  { %v6051_v12 = vadd.f32 %v2112_v38, %v2100_v26 }
 0x53e   :  { %7010 = vst [vmem:[#allocation38_spill] sm:$0xff] %v6051_v12  ;;  %v2080_v12 = vmax.f32 %v2051_v14, 0.0  ;;  %v4808_v14 = vld [vmem:[#allocation4 + $0x220] sm:$0xff] }
 0x53f   :  { %2184 = vmatpush.bf16.msrb.mxu3 %v7011_v43  ;;  %2175 = vmatpush.bf16.msrb.mxu2 %v7012_v35 }
 0x541   :  { %v2101_v52 = vpop.f32.mrf.mxu0  ;;  %v2114_v58 = vpop.f32.mrf.mxu1 }
 0x543   :  { %2185 = vmatpush.bf16.msrb.mxu3 %v7013_v21 }
 0x547   :  { %2186 = vmatpush.bf16.msrb.mxu3 %v7014_v34 }
 0x54b   :  { %2187 = vmatpush.bf16.msrb.mxu3 %v7015_v9 }
 0x54f   :  { %2188 = vmatpush.bf16.msrb.mxu3 %v7016_v62 }
 0x559   :  { %v2151_v11 = vpop.f32.mrf.mxu0  ;;  %v2164_v47 = vpop.f32.mrf.mxu1 }
 0x55a   :  { %v2152_v25 = vadd.f32 %v2151_v11, %v7017_v50 }
 0x55c   :  { %v6060_v38 = vadd.f32 %v2164_v47, %v2152_v25 }
 0x561   :  { %v2153_v26 = vpop.f32.mrf.mxu0  ;;  %v2166_v43 = vpop.f32.mrf.mxu1 }
 0x585   :  { %v2008_v10 = vpop.f32.mrf.mxu2 }
 0x58d   :  { %v2010_v35 = vpop.f32.mrf.mxu2 }
 0x595   :  { %v2021_v52 = vpop.f32.mrf.mxu3  ;;  %v2063_v58 = vpop.f32.mrf.mxu2 }
 0x596   :  { %v2022_v8 = vadd.f32 %v2021_v52, %v2008_v10  ;;  %v2064_v62 = vadd.f32 %v2063_v58, %v5506_v32  ;;  %v4809_v10 = vld [vmem:[#allocation4 + $0x228] sm:$0xff]  ;;  %v4815_v52 = vld [vmem:[#allocation4 + $0x258] sm:$0xff]  ;;  %v7018_v58 = vld [vmem:[#allocation44_spill] sm:$0xff] }
 0x598   :  { %v6063_v21 = vadd.f32 %v2022_v8, %v5933_v63  ;;  %v6093_v63 = vld [vmem:[%s6592_s0 + $0x1c] sm:$0xf]  ;;  %v4818_v8 = vld [vmem:[#allocation4 + $0x270] sm:$0xff] }
 0x59d   :  { %v2023_v34 = vpop.f32.mrf.mxu3  ;;  %v2065_v9 = vpop.f32.mrf.mxu2 }
 0x59e   :  { %v4816_v9 = vld [vmem:[#allocation4 + $0x260] sm:$0xff]  ;;  %v4807_v34 = vld [vmem:[#allocation4 + $0x218] sm:$0xff] }
 0x5a5   :  { %v2076_v53 = vpop.f32.mrf.mxu3 }
 0x5a6   :  { %v2077_v46 = vadd.f32 %v2076_v53, %v2064_v62  ;;  %v4819_v62 = vld [vmem:[#allocation4 + $0x278] sm:$0xff]  ;;  %v4810_v53 = vld [vmem:[#allocation4 + $0x230] sm:$0xff] }
 0x5a7   :  { %2340 = vmatpush.bf16.msra.mxu1 %v4819_v62  ;;  %v4804_v62 = vld [vmem:[#allocation4 + $0x200] sm:$0xff] }
 0x5a8   :  { %v2081_v11 = vmax.f32 %v2077_v46, 0.0  ;;  %v4811_v46 = vld [vmem:[#allocation4 + $0x238] sm:$0xff] }
 0x5a9   :  { %2327 = vmatpush.bf16.msra.mxu0 %v4811_v46  ;;  %v7022_v46 = vld [vmem:[#allocation52_spill] sm:$0xff] }
 0x5aa   :  { %v2082_v47 = vpack.c.bf16 %v2081_v11, %v2080_v12  ;;  %v4817_v12 = vld [vmem:[#allocation4 + $0x268] sm:$0xff]  ;;  %v4806_v11 = vld [vmem:[#allocation4 + $0x210] sm:$0xff] }
 0x5ab   :  { %2341 = vmatpush.bf16.msra.mxu1 %v4818_v8  ;;  %v7024_v8 = vld [vmem:[#allocation57_spill] sm:$0xff] }
 0x5ac   :  { %v2084_v25 = vunpack.c.l.b16 %v2082_v47  ;;  %v2085_v26 = vunpack.c.h.b16 %v2082_v47  ;;  %v7019_v47 = vld [vmem:[#allocation47_spill] sm:$0xff] }
 0x5ad   :  { %v2078_v43 = vpop.f32.mrf.mxu3  ;;  %2328 = vmatpush.bf16.msra.mxu0 %v4810_v53  ;;  %v7023_v53 = vld [vmem:[#allocation56_spill] sm:$0xff] }
 0x5ae   :  { %v6066_v50 = vpack.c.b16 %v2084_v25, %v2084_v25  ;;  %v6068_v35 = vpack.c.b16 %v2085_v26, %v2085_v26  ;;  %v7020_v25 = vld [vmem:[#allocation48_spill] sm:$0xff]  ;;  %v4805_v26 = vld [vmem:[#allocation4 + $0x208] sm:$0xff]  ;;  %v7021_v43 = vld [vmem:[#allocation51_spill] sm:$0xff] }
 0x5af   :  { %2342 = vmatpush.bf16.msra.mxu1 %v4817_v12  ;;  %v7026_v12 = vld [vmem:[#allocation10_spill] sm:$0xff] }
 0x5b0   :  { %2124 = vmatmul.bf16.vlgmr.msra.gmra.mxu2 %v6066_v50  ;;  %2137 = vmatmul.bf16.vlgmr.msra.gmra.mxu3 %v6068_v35 }
 0x5b1   :  { %2356 = vmatpush.bf16.msra.mxu2 %v5004_v3  ;;  %2369 = vmatpush.bf16.msra.mxu3 %v5015_v7 }
 0x5b2   :  { %2329 = vmatpush.bf16.msra.mxu0 %v4809_v10  ;;  %v7025_v10 = vld [vmem:[#allocation8_spill] sm:$0xff] }
 0x5b3   :  { %2343 = vmatpush.bf16.msra.mxu1 %v4816_v9  ;;  %v4814_v9 = vld [vmem:[#allocation4 + $0x250] sm:$0xff] }
 0x5b5   :  { %2357 = vmatpush.bf16.msra.mxu2 %v5042_v16  ;;  %2370 = vmatpush.bf16.msra.mxu3 %v5044_v17 }
 0x5b6   :  { %2330 = vmatpush.bf16.msra.mxu0 %v4808_v14  ;;  %v7027_v14 = vld [vmem:[#allocation12_spill] sm:$0xff] }
 0x5b7   :  { %2344 = vmatpush.bf16.msra.mxu1 %v4815_v52  ;;  %v4813_v52 = vld [vmem:[#allocation4 + $0x248] sm:$0xff] }
 0x5b9   :  { %2358 = vmatpush.bf16.msra.mxu2 %v5079_v29  ;;  %2371 = vmatpush.bf16.msra.mxu3 %v5092_v33 }
 0x5ba   :  { %2331 = vmatpush.bf16.msra.mxu0 %v4807_v34  ;;  %v7028_v34 = vld [vmem:[#allocation14_spill] sm:$0xff] }
 0x5bb   :  { %2345 = vmatpush.bf16.msra.mxu1 %v4814_v9  ;;  %v7036_v9 = vld [vmem:[#allocation15_spill] sm:$0xff] }
 0x5bd   :  { %2359 = vmatpush.bf16.msra.mxu2 %v5124_v44  ;;  %2372 = vmatpush.bf16.msra.mxu3 %v5128_v45 }
 0x5be   :  { %2332 = vmatpush.bf16.msra.mxu0 %v4806_v11  ;;  %v7029_v11 = vld [vmem:[#allocation16_spill] sm:$0xff] }
 0x5bf   :  { %2346 = vmatpush.bf16.msra.mxu1 %v4813_v52  ;;  %v7038_v52 = vld [vmem:[#allocation19_spill] sm:$0xff] }
 0x5c0   :  { %2176 = vmatmul.bf16.vlgmr.msrb.gmra.mxu2 %v6066_v50  ;;  %2189 = vmatmul.bf16.vlgmr.msrb.gmra.mxu3 %v6068_v35 }
 0x5c1   :  { %2360 = vmatpush.bf16.msra.mxu2 %v5160_v56  ;;  %2373 = vmatpush.bf16.msra.mxu3 %v5164_v57 }
 0x5c2   :  { %2333 = vmatpush.bf16.msra.mxu0 %v4805_v26  ;;  %v4812_v26 = vld [vmem:[#allocation4 + $0x240] sm:$0xff] }
 0x5c3   :  { %2347 = vmatpush.bf16.msra.mxu1 %v4812_v26 }
 0x5c5   :  { %2361 = vmatpush.bf16.msra.mxu2 %v5196_v5  ;;  %2374 = vmatpush.bf16.msra.mxu3 %v5200_v6 }
 0x5c6   :  { %2334 = vmatpush.bf16.msra.mxu0 %v4804_v62  ;;  %v7030_v62 = vld [vmem:[#allocation18_spill] sm:$0xff] }
 0x5c9   :  { %2362 = vmatpush.bf16.msra.mxu2 %v5232_v23  ;;  %2375 = vmatpush.bf16.msra.mxu3 %v5236_v24 }
 0x5ca   :  { %2382 = vmatpush.bf16.msrb.mxu0 %v7025_v10  ;;  %v7031_v10 = vld [vmem:[#allocation9_spill] sm:$0xff] }
 0x5cb   :  { %2395 = vmatpush.bf16.msrb.mxu1 %v7031_v10  ;;  %v7040_v10 = vld [vmem:[#allocation21_spill] sm:$0xff] }
 0x5cd   :  { %2363 = vmatpush.bf16.msra.mxu2 %v5268_v40  ;;  %2376 = vmatpush.bf16.msra.mxu3 %v5272_v41 }
 0x5ce   :  { %2383 = vmatpush.bf16.msrb.mxu0 %v7026_v12  ;;  %v7034_v12 = vld [vmem:[#allocation22_spill] sm:$0xff] }
 0x5d0   :  { %2364 = vmatmul.bf16.vlgmr.msra.gmra.mxu2 %v5963_v42  ;;  %2377 = vmatmul.bf16.vlgmr.msra.gmra.mxu3 %v6093_v63 }
 0x5d1   :  { %2418 = vmatpush.bf16.msrb.mxu2 %v5321_v54  ;;  %2431 = vmatpush.bf16.msrb.mxu3 %v5323_v61 }
 0x5d2   :  { %2384 = vmatpush.bf16.msrb.mxu0 %v7027_v14  ;;  %v7035_v14 = vld [vmem:[#allocation13_spill] sm:$0xff] }
 0x5d5   :  { %2419 = vmatpush.bf16.msrb.mxu2 %v5337_v13  ;;  %2432 = vmatpush.bf16.msrb.mxu3 %v5343_v22 }
 0x5d6   :  { %2385 = vmatpush.bf16.msrb.mxu0 %v7028_v34  ;;  %v7037_v34 = vld [vmem:[#allocation17_spill] sm:$0xff] }
 0x5d9   :  { %2420 = vmatpush.bf16.msrb.mxu2 %v5352_v37  ;;  %2433 = vmatpush.bf16.msrb.mxu3 %v5358_v48 }
 0x5da   :  { %2386 = vmatpush.bf16.msrb.mxu0 %v7029_v11 }
 0x5dd   :  { %2421 = vmatpush.bf16.msrb.mxu2 %v5364_v0  ;;  %2434 = vmatpush.bf16.msrb.mxu3 %v5370_v19 }
 0x5de   :  { %2387 = vmatpush.bf16.msrb.mxu0 %v7030_v62 }
 0x5e1   :  { %2422 = vmatpush.bf16.msrb.mxu2 %v5376_v39  ;;  %2435 = vmatpush.bf16.msrb.mxu3 %v5382_v51 }
 0x5e5   :  { %2423 = vmatpush.bf16.msrb.mxu2 %v5386_v60  ;;  %2436 = vmatpush.bf16.msrb.mxu3 %v5390_v1 }
 0x5e9   :  { %2424 = vmatpush.bf16.msrb.mxu2 %v5393_v28  ;;  %2437 = vmatpush.bf16.msrb.mxu3 %v5396_v30 }
 0x5ed   :  { %2425 = vmatpush.bf16.msrb.mxu2 %v5399_v18  ;;  %2438 = vmatpush.bf16.msrb.mxu3 %v5402_v4 }
 0x5f0   :  { %2426 = vmatmul.bf16.vlgmr.msrb.gmra.mxu2 %v6066_v50  ;;  %2439 = vmatmul.bf16.vlgmr.msrb.gmra.mxu3 %v6068_v35 }
 0x5f1   :  { %2470 = vmatpush.bf16.msra.mxu2 %v5404_v15  ;;  %2483 = vmatpush.bf16.msra.mxu3 %v5406_v20 }
 0x5f5   :  { %2471 = vmatpush.bf16.msra.mxu2 %v5417_v55  ;;  %2484 = vmatpush.bf16.msra.mxu3 %v5420_v36 }
 0x5f9   :  { %2472 = vmatpush.bf16.msra.mxu2 %v5429_v49  ;;  %2485 = vmatpush.bf16.msra.mxu3 %v5432_v59 }
 0x5fd   :  { %2473 = vmatpush.bf16.msra.mxu2 %v5441_v27  ;;  %2486 = vmatpush.bf16.msra.mxu3 %v6836_v31 }
 0x601   :  { %2474 = vmatpush.bf16.msra.mxu2 %v6896_v2  ;;  %2487 = vmatpush.bf16.msra.mxu3 %v7018_v58 }
 0x605   :  { %2475 = vmatpush.bf16.msra.mxu2 %v7019_v47  ;;  %2488 = vmatpush.bf16.msra.mxu3 %v7020_v25  ;;  %v7044_v47 = vld [vmem:[#allocation28_spill] sm:$0xff] }
 0x609   :  { %2476 = vmatpush.bf16.msra.mxu2 %v7021_v43  ;;  %2489 = vmatpush.bf16.msra.mxu3 %v7022_v46 }
 0x60d   :  { %2477 = vmatpush.bf16.msra.mxu2 %v7023_v53  ;;  %2490 = vmatpush.bf16.msra.mxu3 %v7024_v8  ;;  %v7039_v8 = vld [vmem:[#allocation38_spill] sm:$0xff] }
 0x610   :  { %2478 = vmatmul.bf16.vlgmr.msra.gmra.mxu2 %v6066_v50  ;;  %2491 = vmatmul.bf16.vlgmr.msra.gmra.mxu3 %v6068_v35  ;;  %v7032_v50 = vld [vmem:[#allocation20_spill] sm:$0xff]  ;;  %v7033_v35 = vld [vmem:[#allocation11_spill] sm:$0xff] }
 0x611   :  { %2388 = vmatpush.bf16.msrb.mxu0 %v7032_v50  ;;  %2396 = vmatpush.bf16.msrb.mxu1 %v7033_v35  ;;  %v7041_v35 = vld [vmem:[#allocation23_spill] sm:$0xff] }
 0x615   :  { %2389 = vmatpush.bf16.msrb.mxu0 %v7034_v12  ;;  %2397 = vmatpush.bf16.msrb.mxu1 %v7035_v14  ;;  %v7042_v14 = vld [vmem:[#allocation24_spill] sm:$0xff] }
 0x619   :  { %2398 = vmatpush.bf16.msrb.mxu1 %v7036_v9  ;;  %v7043_v9 = vld [vmem:[#allocation26_spill] sm:$0xff] }
 0x61d   :  { %2399 = vmatpush.bf16.msrb.mxu1 %v7037_v34 }
 0x621   :  { %2400 = vmatpush.bf16.msrb.mxu1 %v7038_v52 }
 0x625   :  { %2401 = vmatpush.bf16.msrb.mxu1 %v7040_v10 }
 0x629   :  { %2402 = vmatpush.bf16.msrb.mxu1 %v7041_v35 }
 0x633   :  { %v2125_v11 = vpop.f32.mrf.mxu2  ;;  %v2138_v26 = vpop.f32.mrf.mxu3 }
 0x634   :  { %v2126_v62 = vadd.f32 %v2125_v11, %v7039_v8 }
 0x636   :  { %v2139_v53 = vadd.f32 %v2138_v26, %v2126_v62  ;;  %v7045_v62 = vld [vmem:[#allocation30_spill] sm:$0xff] }
 0x638   :  { %v2194_v50 = vmax.f32 %v2139_v53, 0.0 }
 0x63a   :  { %v2196_v46 = vpack.c.bf16 %v2194_v50, %v2194_v50 }
 0x63b   :  { %v2127_v12 = vpop.f32.mrf.mxu2  ;;  %v2140_v43 = vpop.f32.mrf.mxu3 }
 0x63c   :  { %2335 = vmatmul.bf16.vlgmr.msra.gmra.mxu0 %v2196_v46  ;;  %v7046_v43 = vld [vmem:[#allocation25_spill] sm:$0xff]  ;;  %v7047_v46 = vld [vmem:[#allocation32_spill] sm:$0xff]  ;;  %v7048_v12 = vld [vmem:[#allocation27_spill] sm:$0xff] }
 0x63d   :  { %2444 = vmatpush.bf16.msra.mxu0 %v7042_v14 }
 0x641   :  { %2445 = vmatpush.bf16.msra.mxu0 %v7043_v9  ;;  %v7049_v9 = vld [vmem:[#allocation34_spill] sm:$0xff] }
 0x643   :  { %v2177_v34 = vpop.f32.mrf.mxu2  ;;  %v2190_v52 = vpop.f32.mrf.mxu3 }
 0x644   :  { %v2178_v25 = vadd.f32 %v2177_v34, %v6060_v38 }
 0x645   :  { %2446 = vmatpush.bf16.msra.mxu0 %v7044_v47  ;;  %v7076_v47 = vld [vmem:[#allocation65_spill] sm:$0xff] }
 0x646   :  { %v2191_v8 = vadd.f32 %v2190_v52, %v2178_v25  ;;  %v7050_v25 = vld [vmem:[#allocation53_spill] sm:$0xff] }
 0x648   :  { %v2195_v11 = vmax.f32 %v2191_v8, 0.0  ;;  %v7051_v8 = vld [vmem:[#allocation29_spill] sm:$0xff] }
 0x649   :  { %2447 = vmatpush.bf16.msra.mxu0 %v7045_v62  ;;  %v7073_v62 = vld [vmem:[#allocation59_spill] sm:$0xff] }
 0x64a   :  { %v2197_v53 = vpack.c.bf16 %v2195_v11, %v2195_v11  ;;  %v7052_v11 = vld [vmem:[#allocation36_spill] sm:$0xff] }
 0x64b   :  { %v2179_v50 = vpop.f32.mrf.mxu2  ;;  %v2192_v26 = vpop.f32.mrf.mxu3 }
 0x64c   :  { %2348 = vmatmul.bf16.vlgmr.msra.gmra.mxu1 %v2197_v53  ;;  %2390 = vmatmul.bf16.vlgmr.msrb.gmra.mxu0 %v5963_v42  ;;  %v7053_v53 = vld [vmem:[#allocation31_spill] sm:$0xff]  ;;  %v7055_v26 = vld [vmem:[#allocation41_spill] sm:$0xff] }
 0x64d   :  { %2457 = vmatpush.bf16.msra.mxu1 %v7046_v43  ;;  %2448 = vmatpush.bf16.msra.mxu0 %v7047_v46  ;;  %v7054_v42 = vld [vmem:[#allocation39_spill] sm:$0xff] }
 0x651   :  { %2458 = vmatpush.bf16.msra.mxu1 %v7048_v12  ;;  %2449 = vmatpush.bf16.msra.mxu0 %v7049_v9  ;;  %v7056_v9 = vld [vmem:[#allocation33_spill] sm:$0xff] }
 0x652   :  { %v7057_v12 = vld [vmem:[#allocation45_spill] sm:$0xff] }
 0x653   :  { %v2365_v38 = vpop.f32.mrf.mxu2  ;;  %v2378_v34 = vpop.f32.mrf.mxu3 }
 0x654   :  { %v2366_v52 = vadd.f32 %v2365_v38, %v7050_v25  ;;  %v7058_v38 = vld [vmem:[#allocation35_spill] sm:$0xff]  ;;  %v7068_v25 = vld [vmem:[#allocation50_spill] sm:$0xff] }
 0x655   :  { %2459 = vmatpush.bf16.msra.mxu1 %v7051_v8  ;;  %2450 = vmatpush.bf16.msra.mxu0 %v7052_v11  ;;  %v7059_v8 = vld [vmem:[#allocation49_spill] sm:$0xff] }
 0x656   :  { %v2379_v50 = vadd.f32 %v2378_v34, %v2366_v52  ;;  %v7060_v11 = vld [vmem:[#allocation37_spill] sm:$0xff]  ;;  %v7061_v34 = vld [vmem:[#allocation54_spill] sm:$0xff]  ;;  %v7062_v52 = vld [vmem:[#allocation40_spill] sm:$0xff] }
 0x659   :  { %2460 = vmatpush.bf16.msra.mxu1 %v7053_v53  ;;  %2451 = vmatpush.bf16.msra.mxu0 %v7054_v42  ;;  %v7063_v42 = vld [vmem:[#allocation42_spill] sm:$0xff] }
 0x65a   :  { %v7067_v53 = vld [vmem:[#allocation66_spill] sm:$0xff] }
 0x65b   :  { %v2367_v46 = vpop.f32.mrf.mxu2  ;;  %v2380_v43 = vpop.f32.mrf.mxu3 }
 0x65c   :  { %2403 = vmatmul.bf16.vlgmr.msrb.gmra.mxu1 %v6093_v63  ;;  %v7064_v46 = vld [vmem:[#allocation58_spill] sm:$0xff] }
 0x65d   :  { %2496 = vmatpush.bf16.msrb.mxu0 %v7055_v26  ;;  %2461 = vmatpush.bf16.msra.mxu1 %v7056_v9  ;;  %v7065_v43 = vld [vmem:[#allocation46_spill] sm:$0xff]  ;;  %v7066_v26 = vld [vmem:[#allocation60_spill] sm:$0xff] }
 0x661   :  { %2497 = vmatpush.bf16.msrb.mxu0 %v7057_v12  ;;  %2462 = vmatpush.bf16.msra.mxu1 %v7058_v38 }
 0x665   :  { %2498 = vmatpush.bf16.msrb.mxu0 %v7059_v8  ;;  %2463 = vmatpush.bf16.msra.mxu1 %v7060_v11  ;;  %v7069_v8 = vld [vmem:[#allocation62_spill] sm:$0xff] }
 0x669   :  { %2499 = vmatpush.bf16.msrb.mxu0 %v7061_v34  ;;  %2464 = vmatpush.bf16.msra.mxu1 %v7062_v52  ;;  %v7071_v34 = vld [vmem:[#allocation55_spill] sm:$0xff]  ;;  %v7072_v52 = vld [vmem:[#allocation64_spill] sm:$0xff] }
 0x66d   :  { %2509 = vmatpush.bf16.msrb.mxu1 %v7063_v42  ;;  %2500 = vmatpush.bf16.msrb.mxu0 %v7064_v46 }
 0x671   :  { %2510 = vmatpush.bf16.msrb.mxu1 %v7065_v43  ;;  %2501 = vmatpush.bf16.msrb.mxu0 %v7066_v26  ;;  %v7074_v43 = vld [vmem:[#allocation61_spill] sm:$0xff]  ;;  %v7075_v26 = vld [vmem:[#allocation63_spill] sm:$0xff] }
 0x673   :  { %v2427_v9 = vpop.f32.mrf.mxu2  ;;  %v2440_v12 = vpop.f32.mrf.mxu3 }
 0x674   :  { %v2428_v38 = vadd.f32 %v2427_v9, %v7067_v53  ;;  %v7077_v53 = vld [vmem:[#allocation67_spill] sm:$0xff] }
 0x675   :  { %2511 = vmatpush.bf16.msrb.mxu1 %v7068_v25  ;;  %2502 = vmatpush.bf16.msrb.mxu0 %v7069_v8 }
 0x676   :  { %v6181_v11 = vadd.f32 %v2440_v12, %v2428_v38 }
 0x678   :  { %7070 = vst [vmem:[#allocation68_spill] sm:$0xff] %v6181_v11  ;;  %v2408_v11 = vmax.f32 %v2379_v50, 0.0  ;;  %v4824_v50 = vld [vmem:[#allocation4 + $0x2a0] sm:$0xff] }
 0x679   :  { %2512 = vmatpush.bf16.msrb.mxu1 %v7071_v34  ;;  %2503 = vmatpush.bf16.msrb.mxu0 %v7072_v52 }
 0x67b   :  { %v2429_v42 = vpop.f32.mrf.mxu2  ;;  %v2442_v46 = vpop.f32.mrf.mxu3 }
 0x67d   :  { %2513 = vmatpush.bf16.msrb.mxu1 %v7073_v62 }
 0x681   :  { %2514 = vmatpush.bf16.msrb.mxu1 %v7074_v43 }
 0x685   :  { %2515 = vmatpush.bf16.msrb.mxu1 %v7075_v26 }
 0x689   :  { %2516 = vmatpush.bf16.msrb.mxu1 %v7076_v47 }
 0x693   :  { %v2479_v9 = vpop.f32.mrf.mxu2  ;;  %v2492_v25 = vpop.f32.mrf.mxu3 }
 0x694   :  { %v2480_v8 = vadd.f32 %v2479_v9, %v7077_v53 }
 0x696   :  { %v6190_v12 = vadd.f32 %v2492_v25, %v2480_v8 }
 0x69b   :  { %v2481_v38 = vpop.f32.mrf.mxu2  ;;  %v2494_v34 = vpop.f32.mrf.mxu3 }
 0x6b9   :  { %v2336_v14 = vpop.f32.mrf.mxu0 }
 0x6c1   :  { %v2338_v52 = vpop.f32.mrf.mxu0 }
 0x6c9   :  { %v2349_v42 = vpop.f32.mrf.mxu1  ;;  %v2391_v46 = vpop.f32.mrf.mxu0 }
 0x6ca   :  { %v2350_v35 = vadd.f32 %v2349_v42, %v2336_v14  ;;  %v2392_v47 = vadd.f32 %v2391_v46, %v5506_v32  ;;  %v4834_v14 = vld [vmem:[#allocation4 + $0x2f0] sm:$0xff]  ;;  %v4831_v42 = vld [vmem:[#allocation4 + $0x2d8] sm:$0xff]  ;;  %v7078_v46 = vld [vmem:[#allocation44_spill] sm:$0xff] }
 0x6cc   :  { %v6193_v62 = vadd.f32 %v2350_v35, %v6063_v21  ;;  %v6223_v21 = vld [vmem:[%s6592_s0 + $0x20] sm:$0xf]  ;;  %v4825_v35 = vld [vmem:[#allocation4 + $0x2a8] sm:$0xff] }
 0x6d1   :  { %v2351_v43 = vpop.f32.mrf.mxu1  ;;  %v2393_v26 = vpop.f32.mrf.mxu0 }
 0x6d2   :  { %v4832_v26 = vld [vmem:[#allocation4 + $0x2e0] sm:$0xff]  ;;  %v4823_v43 = vld [vmem:[#allocation4 + $0x298] sm:$0xff] }
 0x6d9   :  { %v2404_v10 = vpop.f32.mrf.mxu1 }
 0x6da   :  { %v2405_v58 = vadd.f32 %v2404_v10, %v2392_v47  ;;  %v4835_v47 = vld [vmem:[#allocation4 + $0x2f8] sm:$0xff]  ;;  %v4826_v10 = vld [vmem:[#allocation4 + $0x2b0] sm:$0xff] }
 0x6db   :  { %2668 = vmatpush.bf16.msrb.mxu3 %v4835_v47  ;;  %v4820_v47 = vld [vmem:[#allocation4 + $0x280] sm:$0xff] }
 0x6dc   :  { %v2409_v9 = vmax.f32 %v2405_v58, 0.0  ;;  %v4827_v58 = vld [vmem:[#allocation4 + $0x2b8] sm:$0xff] }
 0x6dd   :  { %2655 = vmatpush.bf16.msrb.mxu2 %v4827_v58  ;;  %v7082_v58 = vld [vmem:[#allocation52_spill] sm:$0xff] }
 0x6de   :  { %v2410_v25 = vpack.c.bf16 %v2409_v9, %v2408_v11  ;;  %v4833_v11 = vld [vmem:[#allocation4 + $0x2e8] sm:$0xff]  ;;  %v4822_v9 = vld [vmem:[#allocation4 + $0x290] sm:$0xff] }
 0x6df   :  { %2669 = vmatpush.bf16.msrb.mxu3 %v4834_v14  ;;  %v7084_v14 = vld [vmem:[#allocation57_spill] sm:$0xff] }
 0x6e0   :  { %v2412_v8 = vunpack.c.l.b16 %v2410_v25  ;;  %v2413_v38 = vunpack.c.h.b16 %v2410_v25  ;;  %v7079_v25 = vld [vmem:[#allocation47_spill] sm:$0xff] }
 0x6e1   :  { %v2406_v34 = vpop.f32.mrf.mxu1  ;;  %2656 = vmatpush.bf16.msrb.mxu2 %v4826_v10  ;;  %v7083_v10 = vld [vmem:[#allocation56_spill] sm:$0xff] }
 0x6e2   :  { %v6196_v53 = vpack.c.b16 %v2412_v8, %v2412_v8  ;;  %v6198_v52 = vpack.c.b16 %v2413_v38, %v2413_v38  ;;  %v7080_v8 = vld [vmem:[#allocation48_spill] sm:$0xff]  ;;  %v4821_v38 = vld [vmem:[#allocation4 + $0x288] sm:$0xff]  ;;  %v7081_v34 = vld [vmem:[#allocation51_spill] sm:$0xff] }
 0x6e3   :  { %2670 = vmatpush.bf16.msrb.mxu3 %v4833_v11  ;;  %v4830_v11 = vld [vmem:[#allocation4 + $0x2d0] sm:$0xff] }
 0x6e4   :  { %2452 = vmatmul.bf16.vlgmr.msra.gmra.mxu0 %v6196_v53  ;;  %2465 = vmatmul.bf16.vlgmr.msra.gmra.mxu1 %v6198_v52 }
 0x6e5   :  { %2684 = vmatpush.bf16.msra.mxu0 %v5004_v3  ;;  %2697 = vmatpush.bf16.msra.mxu1 %v5015_v7 }
 0x6e6   :  { %2657 = vmatpush.bf16.msrb.mxu2 %v4825_v35  ;;  %v7085_v35 = vld [vmem:[#allocation8_spill] sm:$0xff] }
 0x6e7   :  { %2671 = vmatpush.bf16.msrb.mxu3 %v4832_v26  ;;  %v4829_v26 = vld [vmem:[#allocation4 + $0x2c8] sm:$0xff] }
 0x6e9   :  { %2685 = vmatpush.bf16.msra.mxu0 %v5042_v16  ;;  %2698 = vmatpush.bf16.msra.mxu1 %v5044_v17 }
 0x6ea   :  { %2658 = vmatpush.bf16.msrb.mxu2 %v4824_v50  ;;  %v7086_v50 = vld [vmem:[#allocation10_spill] sm:$0xff] }
 0x6eb   :  { %2672 = vmatpush.bf16.msrb.mxu3 %v4831_v42  ;;  %v4828_v42 = vld [vmem:[#allocation4 + $0x2c0] sm:$0xff] }
 0x6ed   :  { %2686 = vmatpush.bf16.msra.mxu0 %v5079_v29  ;;  %2699 = vmatpush.bf16.msra.mxu1 %v5092_v33 }
 0x6ee   :  { %2659 = vmatpush.bf16.msrb.mxu2 %v4823_v43  ;;  %v7087_v43 = vld [vmem:[#allocation12_spill] sm:$0xff] }
 0x6ef   :  { %2673 = vmatpush.bf16.msrb.mxu3 %v4830_v11  ;;  %v7095_v11 = vld [vmem:[#allocation15_spill] sm:$0xff] }
 0x6f1   :  { %2687 = vmatpush.bf16.msra.mxu0 %v5124_v44  ;;  %2700 = vmatpush.bf16.msra.mxu1 %v5128_v45 }
 0x6f2   :  { %2660 = vmatpush.bf16.msrb.mxu2 %v4822_v9  ;;  %v7088_v9 = vld [vmem:[#allocation14_spill] sm:$0xff] }
 0x6f3   :  { %2674 = vmatpush.bf16.msrb.mxu3 %v4829_v26  ;;  %v7097_v26 = vld [vmem:[#allocation17_spill] sm:$0xff] }
 0x6f4   :  { %2504 = vmatmul.bf16.vlgmr.msrb.gmra.mxu0 %v6196_v53  ;;  %2517 = vmatmul.bf16.vlgmr.msrb.gmra.mxu1 %v6198_v52 }
 0x6f5   :  { %2688 = vmatpush.bf16.msra.mxu0 %v5160_v56  ;;  %2701 = vmatpush.bf16.msra.mxu1 %v5164_v57 }
 0x6f6   :  { %2661 = vmatpush.bf16.msrb.mxu2 %v4821_v38  ;;  %v7089_v38 = vld [vmem:[#allocation9_spill] sm:$0xff] }
 0x6f7   :  { %2675 = vmatpush.bf16.msrb.mxu3 %v4828_v42 }
 0x6f9   :  { %2689 = vmatpush.bf16.msra.mxu0 %v5196_v5  ;;  %2702 = vmatpush.bf16.msra.mxu1 %v5200_v6 }
 0x6fa   :  { %2662 = vmatpush.bf16.msrb.mxu2 %v4820_v47  ;;  %v7090_v47 = vld [vmem:[#allocation16_spill] sm:$0xff] }
 0x6fb   :  { %2723 = vmatpush.bf16.msra.mxu3 %v7089_v38 }
 0x6fd   :  { %2690 = vmatpush.bf16.msra.mxu0 %v5232_v23  ;;  %2703 = vmatpush.bf16.msra.mxu1 %v5236_v24 }
 0x6fe   :  { %2710 = vmatpush.bf16.msra.mxu2 %v7085_v35  ;;  %v7091_v35 = vld [vmem:[#allocation11_spill] sm:$0xff] }
 0x6ff   :  { %2724 = vmatpush.bf16.msra.mxu3 %v7091_v35  ;;  %v7100_v35 = vld [vmem:[#allocation21_spill] sm:$0xff] }
 0x701   :  { %2691 = vmatpush.bf16.msra.mxu0 %v5268_v40  ;;  %2704 = vmatpush.bf16.msra.mxu1 %v5272_v41 }
 0x702   :  { %2711 = vmatpush.bf16.msra.mxu2 %v7086_v50  ;;  %v7094_v50 = vld [vmem:[#allocation20_spill] sm:$0xff] }
 0x704   :  { %2692 = vmatmul.bf16.vlgmr.msra.gmra.mxu0 %v6093_v63  ;;  %2705 = vmatmul.bf16.vlgmr.msra.gmra.mxu1 %v6223_v21 }
 0x705   :  { %2746 = vmatpush.bf16.msrb.mxu0 %v5321_v54  ;;  %2759 = vmatpush.bf16.msrb.mxu1 %v5323_v61 }
 0x706   :  { %2712 = vmatpush.bf16.msra.mxu2 %v7087_v43  ;;  %v7096_v43 = vld [vmem:[#allocation22_spill] sm:$0xff] }
 0x709   :  { %2747 = vmatpush.bf16.msrb.mxu0 %v5337_v13  ;;  %2760 = vmatpush.bf16.msrb.mxu1 %v5343_v22 }
 0x70a   :  { %2713 = vmatpush.bf16.msra.mxu2 %v7088_v9  ;;  %v7098_v9 = vld [vmem:[#allocation19_spill] sm:$0xff] }
 0x70d   :  { %2748 = vmatpush.bf16.msrb.mxu0 %v5352_v37  ;;  %2761 = vmatpush.bf16.msrb.mxu1 %v5358_v48 }
 0x70e   :  { %2714 = vmatpush.bf16.msra.mxu2 %v7090_v47 }
 0x711   :  { %2749 = vmatpush.bf16.msrb.mxu0 %v5364_v0  ;;  %2762 = vmatpush.bf16.msrb.mxu1 %v5370_v19 }
 0x715   :  { %2750 = vmatpush.bf16.msrb.mxu0 %v5376_v39  ;;  %2763 = vmatpush.bf16.msrb.mxu1 %v5382_v51 }
 0x719   :  { %2751 = vmatpush.bf16.msrb.mxu0 %v5386_v60  ;;  %2764 = vmatpush.bf16.msrb.mxu1 %v5390_v1 }
 0x71d   :  { %2752 = vmatpush.bf16.msrb.mxu0 %v5393_v28  ;;  %2765 = vmatpush.bf16.msrb.mxu1 %v5396_v30 }
 0x721   :  { %2753 = vmatpush.bf16.msrb.mxu0 %v5399_v18  ;;  %2766 = vmatpush.bf16.msrb.mxu1 %v5402_v4 }
 0x724   :  { %2754 = vmatmul.bf16.vlgmr.msrb.gmra.mxu0 %v6196_v53  ;;  %2767 = vmatmul.bf16.vlgmr.msrb.gmra.mxu1 %v6198_v52 }
 0x725   :  { %2798 = vmatpush.bf16.msra.mxu0 %v5404_v15  ;;  %2811 = vmatpush.bf16.msra.mxu1 %v5406_v20 }
 0x729   :  { %2799 = vmatpush.bf16.msra.mxu0 %v5417_v55  ;;  %2812 = vmatpush.bf16.msra.mxu1 %v5420_v36 }
 0x72d   :  { %2800 = vmatpush.bf16.msra.mxu0 %v5429_v49  ;;  %2813 = vmatpush.bf16.msra.mxu1 %v5432_v59 }
 0x731   :  { %2801 = vmatpush.bf16.msra.mxu0 %v5441_v27  ;;  %2814 = vmatpush.bf16.msra.mxu1 %v6836_v31 }
 0x735   :  { %2802 = vmatpush.bf16.msra.mxu0 %v6896_v2  ;;  %2815 = vmatpush.bf16.msra.mxu1 %v7078_v46 }
 0x739   :  { %2803 = vmatpush.bf16.msra.mxu0 %v7079_v25  ;;  %2816 = vmatpush.bf16.msra.mxu1 %v7080_v8  ;;  %v7104_v25 = vld [vmem:[#allocation28_spill] sm:$0xff] }
 0x73d   :  { %2804 = vmatpush.bf16.msra.mxu0 %v7081_v34  ;;  %2817 = vmatpush.bf16.msra.mxu1 %v7082_v58 }
 0x741   :  { %2805 = vmatpush.bf16.msra.mxu0 %v7083_v10  ;;  %2818 = vmatpush.bf16.msra.mxu1 %v7084_v14  ;;  %v7099_v14 = vld [vmem:[#allocation68_spill] sm:$0xff] }
 0x744   :  { %2806 = vmatmul.bf16.vlgmr.msra.gmra.mxu0 %v6196_v53  ;;  %2819 = vmatmul.bf16.vlgmr.msra.gmra.mxu1 %v6198_v52  ;;  %v7092_v53 = vld [vmem:[#allocation18_spill] sm:$0xff]  ;;  %v7093_v52 = vld [vmem:[#allocation13_spill] sm:$0xff] }
 0x745   :  { %2715 = vmatpush.bf16.msra.mxu2 %v7092_v53  ;;  %2725 = vmatpush.bf16.msra.mxu3 %v7093_v52  ;;  %v7101_v52 = vld [vmem:[#allocation23_spill] sm:$0xff] }
 0x749   :  { %2716 = vmatpush.bf16.msra.mxu2 %v7094_v50  ;;  %2726 = vmatpush.bf16.msra.mxu3 %v7095_v11  ;;  %v7102_v11 = vld [vmem:[#allocation24_spill] sm:$0xff] }
 0x74d   :  { %2717 = vmatpush.bf16.msra.mxu2 %v7096_v43  ;;  %2727 = vmatpush.bf16.msra.mxu3 %v7097_v26  ;;  %v7103_v43 = vld [vmem:[#allocation26_spill] sm:$0xff] }
 0x751   :  { %2728 = vmatpush.bf16.msra.mxu3 %v7098_v9 }
 0x755   :  { %2729 = vmatpush.bf16.msra.mxu3 %v7100_v35 }
 0x759   :  { %2730 = vmatpush.bf16.msra.mxu3 %v7101_v52 }
 0x761   :  { %v2453_v42 = vpop.f32.mrf.mxu0  ;;  %v2466_v38 = vpop.f32.mrf.mxu1 }
 0x762   :  { %v2454_v47 = vadd.f32 %v2453_v42, %v7099_v14 }
 0x764   :  { %v2467_v10 = vadd.f32 %v2466_v38, %v2454_v47  ;;  %v7105_v47 = vld [vmem:[#allocation30_spill] sm:$0xff] }
 0x766   :  { %v2522_v53 = vmax.f32 %v2467_v10, 0.0 }
 0x768   :  { %v2524_v58 = vpack.c.bf16 %v2522_v53, %v2522_v53 }
 0x769   :  { %v2455_v50 = vpop.f32.mrf.mxu0  ;;  %v2468_v34 = vpop.f32.mrf.mxu1 }
 0x76a   :  { %2663 = vmatmul.bf16.vlgmr.msrb.gmra.mxu2 %v2524_v58  ;;  %v7106_v34 = vld [vmem:[#allocation25_spill] sm:$0xff]  ;;  %v7107_v58 = vld [vmem:[#allocation32_spill] sm:$0xff]  ;;  %v7108_v50 = vld [vmem:[#allocation27_spill] sm:$0xff] }
 0x76b   :  { %2772 = vmatpush.bf16.msrb.mxu2 %v7102_v11 }
 0x76f   :  { %2773 = vmatpush.bf16.msrb.mxu2 %v7103_v43  ;;  %v7109_v43 = vld [vmem:[#allocation34_spill] sm:$0xff] }
 0x771   :  { %v2505_v26 = vpop.f32.mrf.mxu0  ;;  %v2518_v9 = vpop.f32.mrf.mxu1 }
 0x772   :  { %v2506_v8 = vadd.f32 %v2505_v26, %v6190_v12 }
 0x773   :  { %2774 = vmatpush.bf16.msrb.mxu2 %v7104_v25  ;;  %v7136_v25 = vld [vmem:[#allocation65_spill] sm:$0xff] }
 0x774   :  { %v2519_v14 = vadd.f32 %v2518_v9, %v2506_v8  ;;  %v7110_v8 = vld [vmem:[#allocation53_spill] sm:$0xff] }
 0x776   :  { %v2523_v38 = vmax.f32 %v2519_v14, 0.0  ;;  %v7111_v14 = vld [vmem:[#allocation29_spill] sm:$0xff] }
 0x777   :  { %2775 = vmatpush.bf16.msrb.mxu2 %v7105_v47  ;;  %v7133_v47 = vld [vmem:[#allocation59_spill] sm:$0xff] }
 0x778   :  { %v2525_v10 = vpack.c.bf16 %v2523_v38, %v2523_v38  ;;  %v7112_v38 = vld [vmem:[#allocation36_spill] sm:$0xff] }
 0x779   :  { %v2507_v53 = vpop.f32.mrf.mxu0  ;;  %v2520_v42 = vpop.f32.mrf.mxu1 }
 0x77a   :  { %2676 = vmatmul.bf16.vlgmr.msrb.gmra.mxu3 %v2525_v10  ;;  %2718 = vmatmul.bf16.vlgmr.msra.gmra.mxu2 %v6093_v63  ;;  %v7113_v10 = vld [vmem:[#allocation31_spill] sm:$0xff]  ;;  %v7115_v42 = vld [vmem:[#allocation41_spill] sm:$0xff] }
 0x77b   :  { %2785 = vmatpush.bf16.msrb.mxu3 %v7106_v34  ;;  %2776 = vmatpush.bf16.msrb.mxu2 %v7107_v58  ;;  %v7114_v63 = vld [vmem:[#allocation39_spill] sm:$0xff] }
 0x77f   :  { %2786 = vmatpush.bf16.msrb.mxu3 %v7108_v50  ;;  %2777 = vmatpush.bf16.msrb.mxu2 %v7109_v43  ;;  %v7116_v43 = vld [vmem:[#allocation33_spill] sm:$0xff] }
 0x780   :  { %v7117_v50 = vld [vmem:[#allocation45_spill] sm:$0xff] }
 0x781   :  { %v2693_v12 = vpop.f32.mrf.mxu0  ;;  %v2706_v26 = vpop.f32.mrf.mxu1 }
 0x782   :  { %v2694_v9 = vadd.f32 %v2693_v12, %v7110_v8  ;;  %v7118_v12 = vld [vmem:[#allocation35_spill] sm:$0xff]  ;;  %v7128_v8 = vld [vmem:[#allocation50_spill] sm:$0xff] }
 0x783   :  { %2787 = vmatpush.bf16.msrb.mxu3 %v7111_v14  ;;  %2778 = vmatpush.bf16.msrb.mxu2 %v7112_v38  ;;  %v7119_v14 = vld [vmem:[#allocation49_spill] sm:$0xff] }
 0x784   :  { %v2707_v53 = vadd.f32 %v2706_v26, %v2694_v9  ;;  %v7120_v38 = vld [vmem:[#allocation37_spill] sm:$0xff]  ;;  %v7121_v26 = vld [vmem:[#allocation54_spill] sm:$0xff]  ;;  %v7122_v9 = vld [vmem:[#allocation40_spill] sm:$0xff] }
 0x787   :  { %2788 = vmatpush.bf16.msrb.mxu3 %v7113_v10  ;;  %2779 = vmatpush.bf16.msrb.mxu2 %v7114_v63  ;;  %v7123_v63 = vld [vmem:[#allocation42_spill] sm:$0xff] }
 0x788   :  { %v7127_v10 = vld [vmem:[#allocation66_spill] sm:$0xff] }
 0x789   :  { %v2695_v58 = vpop.f32.mrf.mxu0  ;;  %v2708_v34 = vpop.f32.mrf.mxu1 }
 0x78a   :  { %2731 = vmatmul.bf16.vlgmr.msra.gmra.mxu3 %v6223_v21  ;;  %v7124_v58 = vld [vmem:[#allocation58_spill] sm:$0xff] }
 0x78b   :  { %2824 = vmatpush.bf16.msra.mxu2 %v7115_v42  ;;  %2789 = vmatpush.bf16.msrb.mxu3 %v7116_v43  ;;  %v7125_v34 = vld [vmem:[#allocation46_spill] sm:$0xff]  ;;  %v7126_v42 = vld [vmem:[#allocation60_spill] sm:$0xff] }
 0x78f   :  { %2825 = vmatpush.bf16.msra.mxu2 %v7117_v50  ;;  %2790 = vmatpush.bf16.msrb.mxu3 %v7118_v12 }
 0x793   :  { %2826 = vmatpush.bf16.msra.mxu2 %v7119_v14  ;;  %2791 = vmatpush.bf16.msrb.mxu3 %v7120_v38  ;;  %v7129_v14 = vld [vmem:[#allocation62_spill] sm:$0xff] }
 0x797   :  { %2827 = vmatpush.bf16.msra.mxu2 %v7121_v26  ;;  %2792 = vmatpush.bf16.msrb.mxu3 %v7122_v9  ;;  %v7131_v26 = vld [vmem:[#allocation55_spill] sm:$0xff]  ;;  %v7132_v9 = vld [vmem:[#allocation64_spill] sm:$0xff] }
 0x79b   :  { %2837 = vmatpush.bf16.msra.mxu3 %v7123_v63  ;;  %2828 = vmatpush.bf16.msra.mxu2 %v7124_v58 }
 0x79f   :  { %2838 = vmatpush.bf16.msra.mxu3 %v7125_v34  ;;  %2829 = vmatpush.bf16.msra.mxu2 %v7126_v42  ;;  %v7134_v34 = vld [vmem:[#allocation61_spill] sm:$0xff]  ;;  %v7135_v42 = vld [vmem:[#allocation63_spill] sm:$0xff] }
 0x7a1   :  { %v2755_v43 = vpop.f32.mrf.mxu0  ;;  %v2768_v50 = vpop.f32.mrf.mxu1 }
 0x7a2   :  { %v2756_v12 = vadd.f32 %v2755_v43, %v7127_v10  ;;  %v7137_v10 = vld [vmem:[#allocation67_spill] sm:$0xff] }
 0x7a3   :  { %2839 = vmatpush.bf16.msra.mxu3 %v7128_v8  ;;  %2830 = vmatpush.bf16.msra.mxu2 %v7129_v14 }
 0x7a4   :  { %v6311_v38 = vadd.f32 %v2768_v50, %v2756_v12 }
 0x7a6   :  { %7130 = vst [vmem:[#allocation43_spill] sm:$0xff] %v6311_v38  ;;  %v2736_v38 = vmax.f32 %v2707_v53, 0.0  ;;  %v4840_v53 = vld [vmem:[#allocation4 + $0x320] sm:$0xff] }
 0x7a7   :  { %2840 = vmatpush.bf16.msra.mxu3 %v7131_v26  ;;  %2831 = vmatpush.bf16.msra.mxu2 %v7132_v9 }
 0x7a9   :  { %v2757_v63 = vpop.f32.mrf.mxu0  ;;  %v2770_v58 = vpop.f32.mrf.mxu1 }
 0x7ab   :  { %2841 = vmatpush.bf16.msra.mxu3 %v7133_v47 }
 0x7af   :  { %2842 = vmatpush.bf16.msra.mxu3 %v7134_v34 }
 0x7b3   :  { %2843 = vmatpush.bf16.msra.mxu3 %v7135_v42 }
 0x7b7   :  { %2844 = vmatpush.bf16.msra.mxu3 %v7136_v25 }
 0x7c1   :  { %v2807_v43 = vpop.f32.mrf.mxu0  ;;  %v2820_v8 = vpop.f32.mrf.mxu1 }
 0x7c2   :  { %v2808_v14 = vadd.f32 %v2807_v43, %v7137_v10 }
 0x7c4   :  { %v6320_v50 = vadd.f32 %v2820_v8, %v2808_v14 }
 0x7c9   :  { %v2809_v12 = vpop.f32.mrf.mxu0  ;;  %v2822_v26 = vpop.f32.mrf.mxu1 }
 0x7ed   :  { %v2664_v11 = vpop.f32.mrf.mxu2 }
 0x7f5   :  { %v2666_v9 = vpop.f32.mrf.mxu2 }
 0x7fd   :  { %v2677_v63 = vpop.f32.mrf.mxu3  ;;  %v2719_v58 = vpop.f32.mrf.mxu2 }
 0x7fe   :  { %v2678_v52 = vadd.f32 %v2677_v63, %v2664_v11  ;;  %v2720_v25 = vadd.f32 %v2719_v58, %v5506_v32  ;;  %v4841_v11 = vld [vmem:[#allocation4 + $0x328] sm:$0xff]  ;;  %v4847_v63 = vld [vmem:[#allocation4 + $0x358] sm:$0xff]  ;;  %v7138_v58 = vld [vmem:[#allocation44_spill] sm:$0xff] }
 0x800   :  { %v6323_v47 = vadd.f32 %v2678_v52, %v6193_v62  ;;  %v6353_v62 = vld [vmem:[%s6592_s0 + $0x24] sm:$0xf]  ;;  %v4850_v52 = vld [vmem:[#allocation4 + $0x370] sm:$0xff] }
 0x805   :  { %v2679_v34 = vpop.f32.mrf.mxu3  ;;  %v2721_v42 = vpop.f32.mrf.mxu2 }
 0x806   :  { %v4848_v42 = vld [vmem:[#allocation4 + $0x360] sm:$0xff]  ;;  %v4839_v34 = vld [vmem:[#allocation4 + $0x318] sm:$0xff] }
 0x80d   :  { %v2732_v35 = vpop.f32.mrf.mxu3 }
 0x80e   :  { %v2733_v46 = vadd.f32 %v2732_v35, %v2720_v25  ;;  %v4851_v25 = vld [vmem:[#allocation4 + $0x378] sm:$0xff]  ;;  %v4842_v35 = vld [vmem:[#allocation4 + $0x330] sm:$0xff] }
 0x80f   :  { %2996 = vmatpush.bf16.msrb.mxu1 %v4851_v25  ;;  %v4836_v25 = vld [vmem:[#allocation4 + $0x300] sm:$0xff] }
 0x810   :  { %v2737_v43 = vmax.f32 %v2733_v46, 0.0  ;;  %v4843_v46 = vld [vmem:[#allocation4 + $0x338] sm:$0xff] }
 0x811   :  { %2983 = vmatpush.bf16.msrb.mxu0 %v4843_v46  ;;  %v7142_v46 = vld [vmem:[#allocation52_spill] sm:$0xff] }
 0x812   :  { %v2738_v8 = vpack.c.bf16 %v2737_v43, %v2736_v38  ;;  %v4849_v38 = vld [vmem:[#allocation4 + $0x368] sm:$0xff]  ;;  %v4838_v43 = vld [vmem:[#allocation4 + $0x310] sm:$0xff] }
 0x813   :  { %2997 = vmatpush.bf16.msrb.mxu1 %v4850_v52  ;;  %v7144_v52 = vld [vmem:[#allocation57_spill] sm:$0xff] }
 0x814   :  { %v2740_v14 = vunpack.c.l.b16 %v2738_v8  ;;  %v2741_v12 = vunpack.c.h.b16 %v2738_v8  ;;  %v7139_v8 = vld [vmem:[#allocation47_spill] sm:$0xff] }
 0x815   :  { %v2734_v26 = vpop.f32.mrf.mxu3  ;;  %2984 = vmatpush.bf16.msrb.mxu0 %v4842_v35  ;;  %v7143_v35 = vld [vmem:[#allocation56_spill] sm:$0xff] }
 0x816   :  { %v6326_v10 = vpack.c.b16 %v2740_v14, %v2740_v14  ;;  %v6328_v9 = vpack.c.b16 %v2741_v12, %v2741_v12  ;;  %v7140_v14 = vld [vmem:[#allocation48_spill] sm:$0xff]  ;;  %v4837_v12 = vld [vmem:[#allocation4 + $0x308] sm:$0xff]  ;;  %v7141_v26 = vld [vmem:[#allocation51_spill] sm:$0xff] }
 0x817   :  { %2998 = vmatpush.bf16.msrb.mxu1 %v4849_v38  ;;  %v7146_v38 = vld [vmem:[#allocation10_spill] sm:$0xff] }
 0x818   :  { %2780 = vmatmul.bf16.vlgmr.msrb.gmra.mxu2 %v6326_v10  ;;  %2793 = vmatmul.bf16.vlgmr.msrb.gmra.mxu3 %v6328_v9 }
 0x819   :  { %3012 = vmatpush.bf16.msrb.mxu2 %v5004_v3  ;;  %3025 = vmatpush.bf16.msrb.mxu3 %v5015_v7 }
 0x81a   :  { %2985 = vmatpush.bf16.msrb.mxu0 %v4841_v11  ;;  %v7145_v11 = vld [vmem:[#allocation8_spill] sm:$0xff] }
 0x81b   :  { %2999 = vmatpush.bf16.msrb.mxu1 %v4848_v42  ;;  %v4846_v42 = vld [vmem:[#allocation4 + $0x350] sm:$0xff] }
 0x81d   :  { %3013 = vmatpush.bf16.msrb.mxu2 %v5042_v16  ;;  %3026 = vmatpush.bf16.msrb.mxu3 %v5044_v17 }
 0x81e   :  { %2986 = vmatpush.bf16.msrb.mxu0 %v4840_v53  ;;  %v7147_v53 = vld [vmem:[#allocation12_spill] sm:$0xff] }
 0x81f   :  { %3000 = vmatpush.bf16.msrb.mxu1 %v4847_v63  ;;  %v4845_v63 = vld [vmem:[#allocation4 + $0x348] sm:$0xff] }
 0x821   :  { %3014 = vmatpush.bf16.msrb.mxu2 %v5079_v29  ;;  %3027 = vmatpush.bf16.msrb.mxu3 %v5092_v33 }
 0x822   :  { %2987 = vmatpush.bf16.msrb.mxu0 %v4839_v34  ;;  %v7148_v34 = vld [vmem:[#allocation14_spill] sm:$0xff] }
 0x823   :  { %3001 = vmatpush.bf16.msrb.mxu1 %v4846_v42  ;;  %v7156_v42 = vld [vmem:[#allocation15_spill] sm:$0xff] }
 0x825   :  { %3015 = vmatpush.bf16.msrb.mxu2 %v5124_v44  ;;  %3028 = vmatpush.bf16.msrb.mxu3 %v5128_v45 }
 0x826   :  { %2988 = vmatpush.bf16.msrb.mxu0 %v4838_v43  ;;  %v7149_v43 = vld [vmem:[#allocation16_spill] sm:$0xff] }
 0x827   :  { %3002 = vmatpush.bf16.msrb.mxu1 %v4845_v63  ;;  %v7158_v63 = vld [vmem:[#allocation19_spill] sm:$0xff] }
 0x828   :  { %2832 = vmatmul.bf16.vlgmr.msra.gmra.mxu2 %v6326_v10  ;;  %2845 = vmatmul.bf16.vlgmr.msra.gmra.mxu3 %v6328_v9 }
 0x829   :  { %3016 = vmatpush.bf16.msrb.mxu2 %v5160_v56  ;;  %3029 = vmatpush.bf16.msrb.mxu3 %v5164_v57 }
 0x82a   :  { %2989 = vmatpush.bf16.msrb.mxu0 %v4837_v12  ;;  %v4844_v12 = vld [vmem:[#allocation4 + $0x340] sm:$0xff] }
 0x82b   :  { %3003 = vmatpush.bf16.msrb.mxu1 %v4844_v12 }
 0x82d   :  { %3017 = vmatpush.bf16.msrb.mxu2 %v5196_v5  ;;  %3030 = vmatpush.bf16.msrb.mxu3 %v5200_v6 }
 0x82e   :  { %2990 = vmatpush.bf16.msrb.mxu0 %v4836_v25  ;;  %v7150_v25 = vld [vmem:[#allocation18_spill] sm:$0xff] }
 0x831   :  { %3018 = vmatpush.bf16.msrb.mxu2 %v5232_v23  ;;  %3031 = vmatpush.bf16.msrb.mxu3 %v5236_v24 }
 0x832   :  { %3038 = vmatpush.bf16.msra.mxu0 %v7145_v11  ;;  %v7151_v11 = vld [vmem:[#allocation9_spill] sm:$0xff] }
 0x833   :  { %3051 = vmatpush.bf16.msra.mxu1 %v7151_v11  ;;  %v7160_v11 = vld [vmem:[#allocation21_spill] sm:$0xff] }
 0x835   :  { %3019 = vmatpush.bf16.msrb.mxu2 %v5268_v40  ;;  %3032 = vmatpush.bf16.msrb.mxu3 %v5272_v41 }
 0x836   :  { %3039 = vmatpush.bf16.msra.mxu0 %v7146_v38  ;;  %v7154_v38 = vld [vmem:[#allocation22_spill] sm:$0xff] }
 0x838   :  { %3020 = vmatmul.bf16.vlgmr.msrb.gmra.mxu2 %v6223_v21  ;;  %3033 = vmatmul.bf16.vlgmr.msrb.gmra.mxu3 %v6353_v62 }
 0x839   :  { %3074 = vmatpush.bf16.msra.mxu2 %v5321_v54  ;;  %3087 = vmatpush.bf16.msra.mxu3 %v5323_v61 }
 0x83a   :  { %3040 = vmatpush.bf16.msra.mxu0 %v7147_v53  ;;  %v7155_v53 = vld [vmem:[#allocation13_spill] sm:$0xff] }
 0x83d   :  { %3075 = vmatpush.bf16.msra.mxu2 %v5337_v13  ;;  %3088 = vmatpush.bf16.msra.mxu3 %v5343_v22 }
 0x83e   :  { %3041 = vmatpush.bf16.msra.mxu0 %v7148_v34  ;;  %v7157_v34 = vld [vmem:[#allocation17_spill] sm:$0xff] }
 0x841   :  { %3076 = vmatpush.bf16.msra.mxu2 %v5352_v37  ;;  %3089 = vmatpush.bf16.msra.mxu3 %v5358_v48 }
 0x842   :  { %3042 = vmatpush.bf16.msra.mxu0 %v7149_v43 }
 0x845   :  { %3077 = vmatpush.bf16.msra.mxu2 %v5364_v0  ;;  %3090 = vmatpush.bf16.msra.mxu3 %v5370_v19 }
 0x846   :  { %3043 = vmatpush.bf16.msra.mxu0 %v7150_v25 }
 0x849   :  { %3078 = vmatpush.bf16.msra.mxu2 %v5376_v39  ;;  %3091 = vmatpush.bf16.msra.mxu3 %v5382_v51 }
 0x84d   :  { %3079 = vmatpush.bf16.msra.mxu2 %v5386_v60  ;;  %3092 = vmatpush.bf16.msra.mxu3 %v5390_v1 }
 0x851   :  { %3080 = vmatpush.bf16.msra.mxu2 %v5393_v28  ;;  %3093 = vmatpush.bf16.msra.mxu3 %v5396_v30 }
 0x855   :  { %3081 = vmatpush.bf16.msra.mxu2 %v5399_v18  ;;  %3094 = vmatpush.bf16.msra.mxu3 %v5402_v4 }
 0x858   :  { %3082 = vmatmul.bf16.vlgmr.msra.gmra.mxu2 %v6326_v10  ;;  %3095 = vmatmul.bf16.vlgmr.msra.gmra.mxu3 %v6328_v9 }
 0x859   :  { %3126 = vmatpush.bf16.msrb.mxu2 %v5404_v15  ;;  %3139 = vmatpush.bf16.msrb.mxu3 %v5406_v20 }
 0x85d   :  { %3127 = vmatpush.bf16.msrb.mxu2 %v5417_v55  ;;  %3140 = vmatpush.bf16.msrb.mxu3 %v5420_v36 }
 0x861   :  { %3128 = vmatpush.bf16.msrb.mxu2 %v5429_v49  ;;  %3141 = vmatpush.bf16.msrb.mxu3 %v5432_v59 }
 0x865   :  { %3129 = vmatpush.bf16.msrb.mxu2 %v5441_v27  ;;  %3142 = vmatpush.bf16.msrb.mxu3 %v6836_v31 }
 0x869   :  { %3130 = vmatpush.bf16.msrb.mxu2 %v6896_v2  ;;  %3143 = vmatpush.bf16.msrb.mxu3 %v7138_v58 }
 0x86d   :  { %3131 = vmatpush.bf16.msrb.mxu2 %v7139_v8  ;;  %3144 = vmatpush.bf16.msrb.mxu3 %v7140_v14  ;;  %v7164_v8 = vld [vmem:[#allocation28_spill] sm:$0xff] }
 0x871   :  { %3132 = vmatpush.bf16.msrb.mxu2 %v7141_v26  ;;  %3145 = vmatpush.bf16.msrb.mxu3 %v7142_v46 }
 0x875   :  { %3133 = vmatpush.bf16.msrb.mxu2 %v7143_v35  ;;  %3146 = vmatpush.bf16.msrb.mxu3 %v7144_v52  ;;  %v7159_v52 = vld [vmem:[#allocation43_spill] sm:$0xff] }
 0x878   :  { %3134 = vmatmul.bf16.vlgmr.msrb.gmra.mxu2 %v6326_v10  ;;  %3147 = vmatmul.bf16.vlgmr.msrb.gmra.mxu3 %v6328_v9  ;;  %v7152_v10 = vld [vmem:[#allocation20_spill] sm:$0xff]  ;;  %v7153_v9 = vld [vmem:[#allocation11_spill] sm:$0xff] }
 0x879   :  { %3044 = vmatpush.bf16.msra.mxu0 %v7152_v10  ;;  %3052 = vmatpush.bf16.msra.mxu1 %v7153_v9  ;;  %v7161_v9 = vld [vmem:[#allocation23_spill] sm:$0xff] }
 0x87d   :  { %3045 = vmatpush.bf16.msra.mxu0 %v7154_v38  ;;  %3053 = vmatpush.bf16.msra.mxu1 %v7155_v53  ;;  %v7162_v53 = vld [vmem:[#allocation24_spill] sm:$0xff] }
 0x881   :  { %3054 = vmatpush.bf16.msra.mxu1 %v7156_v42  ;;  %v7163_v42 = vld [vmem:[#allocation26_spill] sm:$0xff] }
 0x885   :  { %3055 = vmatpush.bf16.msra.mxu1 %v7157_v34 }
 0x889   :  { %3056 = vmatpush.bf16.msra.mxu1 %v7158_v63 }
 0x88d   :  { %3057 = vmatpush.bf16.msra.mxu1 %v7160_v11 }
 0x891   :  { %3058 = vmatpush.bf16.msra.mxu1 %v7161_v9 }
 0x89b   :  { %v2781_v43 = vpop.f32.mrf.mxu2  ;;  %v2794_v12 = vpop.f32.mrf.mxu3 }
 0x89c   :  { %v2782_v25 = vadd.f32 %v2781_v43, %v7159_v52 }
 0x89e   :  { %v2795_v35 = vadd.f32 %v2794_v12, %v2782_v25  ;;  %v7165_v25 = vld [vmem:[#allocation30_spill] sm:$0xff] }
 0x8a0   :  { %v2850_v10 = vmax.f32 %v2795_v35, 0.0 }
 0x8a2   :  { %v2852_v46 = vpack.c.bf16 %v2850_v10, %v2850_v10 }
 0x8a3   :  { %v2783_v38 = vpop.f32.mrf.mxu2  ;;  %v2796_v26 = vpop.f32.mrf.mxu3 }
 0x8a4   :  { %2991 = vmatmul.bf16.vlgmr.msrb.gmra.mxu0 %v2852_v46  ;;  %v7166_v26 = vld [vmem:[#allocation25_spill] sm:$0xff]  ;;  %v7167_v46 = vld [vmem:[#allocation32_spill] sm:$0xff]  ;;  %v7168_v38 = vld [vmem:[#allocation27_spill] sm:$0xff] }
 0x8a5   :  { %3100 = vmatpush.bf16.msrb.mxu0 %v7162_v53 }
 0x8a9   :  { %3101 = vmatpush.bf16.msrb.mxu0 %v7163_v42  ;;  %v7169_v42 = vld [vmem:[#allocation34_spill] sm:$0xff] }
 0x8ab   :  { %v2833_v34 = vpop.f32.mrf.mxu2  ;;  %v2846_v63 = vpop.f32.mrf.mxu3 }
 0x8ac   :  { %v2834_v14 = vadd.f32 %v2833_v34, %v6320_v50 }
 0x8ad   :  { %3102 = vmatpush.bf16.msrb.mxu0 %v7164_v8  ;;  %v7196_v8 = vld [vmem:[#allocation65_spill] sm:$0xff] }
 0x8ae   :  { %v2847_v52 = vadd.f32 %v2846_v63, %v2834_v14  ;;  %v7170_v14 = vld [vmem:[#allocation53_spill] sm:$0xff] }
 0x8b0   :  { %v2851_v43 = vmax.f32 %v2847_v52, 0.0  ;;  %v7171_v52 = vld [vmem:[#allocation29_spill] sm:$0xff] }
 0x8b1   :  { %3103 = vmatpush.bf16.msrb.mxu0 %v7165_v25  ;;  %v7193_v25 = vld [vmem:[#allocation59_spill] sm:$0xff] }
 0x8b2   :  { %v2853_v35 = vpack.c.bf16 %v2851_v43, %v2851_v43  ;;  %v7172_v43 = vld [vmem:[#allocation36_spill] sm:$0xff] }
 0x8b3   :  { %v2835_v10 = vpop.f32.mrf.mxu2  ;;  %v2848_v12 = vpop.f32.mrf.mxu3 }
 0x8b4   :  { %3004 = vmatmul.bf16.vlgmr.msrb.gmra.mxu1 %v2853_v35  ;;  %3046 = vmatmul.bf16.vlgmr.msra.gmra.mxu0 %v6223_v21  ;;  %v7173_v35 = vld [vmem:[#allocation31_spill] sm:$0xff]  ;;  %v7175_v12 = vld [vmem:[#allocation41_spill] sm:$0xff] }
 0x8b5   :  { %3113 = vmatpush.bf16.msrb.mxu1 %v7166_v26  ;;  %3104 = vmatpush.bf16.msrb.mxu0 %v7167_v46  ;;  %v7174_v21 = vld [vmem:[#allocation39_spill] sm:$0xff] }
 0x8b9   :  { %3114 = vmatpush.bf16.msrb.mxu1 %v7168_v38  ;;  %3105 = vmatpush.bf16.msrb.mxu0 %v7169_v42  ;;  %v7176_v42 = vld [vmem:[#allocation33_spill] sm:$0xff] }
 0x8ba   :  { %v7177_v38 = vld [vmem:[#allocation45_spill] sm:$0xff] }
 0x8bb   :  { %v3021_v50 = vpop.f32.mrf.mxu2  ;;  %v3034_v34 = vpop.f32.mrf.mxu3 }
 0x8bc   :  { %v3022_v63 = vadd.f32 %v3021_v50, %v7170_v14  ;;  %v7178_v50 = vld [vmem:[#allocation35_spill] sm:$0xff]  ;;  %v7188_v14 = vld [vmem:[#allocation50_spill] sm:$0xff] }
 0x8bd   :  { %3115 = vmatpush.bf16.msrb.mxu1 %v7171_v52  ;;  %3106 = vmatpush.bf16.msrb.mxu0 %v7172_v43  ;;  %v7179_v52 = vld [vmem:[#allocation49_spill] sm:$0xff] }
 0x8be   :  { %v3035_v10 = vadd.f32 %v3034_v34, %v3022_v63  ;;  %v7180_v43 = vld [vmem:[#allocation37_spill] sm:$0xff]  ;;  %v7181_v34 = vld [vmem:[#allocation54_spill] sm:$0xff]  ;;  %v7182_v63 = vld [vmem:[#allocation40_spill] sm:$0xff] }
 0x8c1   :  { %3116 = vmatpush.bf16.msrb.mxu1 %v7173_v35  ;;  %3107 = vmatpush.bf16.msrb.mxu0 %v7174_v21  ;;  %v7183_v21 = vld [vmem:[#allocation42_spill] sm:$0xff] }
 0x8c2   :  { %v7187_v35 = vld [vmem:[#allocation66_spill] sm:$0xff] }
 0x8c3   :  { %v3023_v46 = vpop.f32.mrf.mxu2  ;;  %v3036_v26 = vpop.f32.mrf.mxu3 }
 0x8c4   :  { %3059 = vmatmul.bf16.vlgmr.msra.gmra.mxu1 %v6353_v62  ;;  %v7184_v46 = vld [vmem:[#allocation58_spill] sm:$0xff] }
 0x8c5   :  { %3152 = vmatpush.bf16.msra.mxu0 %v7175_v12  ;;  %3117 = vmatpush.bf16.msrb.mxu1 %v7176_v42  ;;  %v7185_v26 = vld [vmem:[#allocation46_spill] sm:$0xff]  ;;  %v7186_v12 = vld [vmem:[#allocation60_spill] sm:$0xff] }
 0x8c9   :  { %3153 = vmatpush.bf16.msra.mxu0 %v7177_v38  ;;  %3118 = vmatpush.bf16.msrb.mxu1 %v7178_v50 }
 0x8cd   :  { %3154 = vmatpush.bf16.msra.mxu0 %v7179_v52  ;;  %3119 = vmatpush.bf16.msrb.mxu1 %v7180_v43  ;;  %v7189_v52 = vld [vmem:[#allocation62_spill] sm:$0xff] }
 0x8d1   :  { %3155 = vmatpush.bf16.msra.mxu0 %v7181_v34  ;;  %3120 = vmatpush.bf16.msrb.mxu1 %v7182_v63  ;;  %v7191_v34 = vld [vmem:[#allocation55_spill] sm:$0xff]  ;;  %v7192_v63 = vld [vmem:[#allocation64_spill] sm:$0xff] }
 0x8d5   :  { %3165 = vmatpush.bf16.msra.mxu1 %v7183_v21  ;;  %3156 = vmatpush.bf16.msra.mxu0 %v7184_v46 }
 0x8d9   :  { %3166 = vmatpush.bf16.msra.mxu1 %v7185_v26  ;;  %3157 = vmatpush.bf16.msra.mxu0 %v7186_v12  ;;  %v7194_v26 = vld [vmem:[#allocation61_spill] sm:$0xff]  ;;  %v7195_v12 = vld [vmem:[#allocation63_spill] sm:$0xff] }
 0x8db   :  { %v3083_v42 = vpop.f32.mrf.mxu2  ;;  %v3096_v38 = vpop.f32.mrf.mxu3 }
 0x8dc   :  { %v3084_v50 = vadd.f32 %v3083_v42, %v7187_v35  ;;  %v7197_v35 = vld [vmem:[#allocation67_spill] sm:$0xff] }
 0x8dd   :  { %3167 = vmatpush.bf16.msra.mxu1 %v7188_v14  ;;  %3158 = vmatpush.bf16.msra.mxu0 %v7189_v52 }
 0x8de   :  { %v6441_v43 = vadd.f32 %v3096_v38, %v3084_v50 }
 0x8e0   :  { %7190 = vst [vmem:[#allocation38_spill] sm:$0xff] %v6441_v43  ;;  %v3064_v43 = vmax.f32 %v3035_v10, 0.0 }
 0x8e1   :  { %3168 = vmatpush.bf16.msra.mxu1 %v7191_v34  ;;  %3159 = vmatpush.bf16.msra.mxu0 %v7192_v63 }
 0x8e3   :  { %v3085_v21 = vpop.f32.mrf.mxu2  ;;  %v3098_v46 = vpop.f32.mrf.mxu3 }
 0x8e5   :  { %3169 = vmatpush.bf16.msra.mxu1 %v7193_v25 }
 0x8e9   :  { %3170 = vmatpush.bf16.msra.mxu1 %v7194_v26 }
 0x8ed   :  { %3171 = vmatpush.bf16.msra.mxu1 %v7195_v12 }
 0x8f1   :  { %3172 = vmatpush.bf16.msra.mxu1 %v7196_v8 }
 0x8fb   :  { %v3135_v42 = vpop.f32.mrf.mxu2  ;;  %v3148_v14 = vpop.f32.mrf.mxu3 }
 0x8fc   :  { %v3136_v52 = vadd.f32 %v3135_v42, %v7197_v35 }
 0x8fe   :  { %v6450_v38 = vadd.f32 %v3148_v14, %v3136_v52 }
 0x903   :  { %v3137_v50 = vpop.f32.mrf.mxu2  ;;  %v3150_v34 = vpop.f32.mrf.mxu3 }
 0x921   :  { %v2992_v53 = vpop.f32.mrf.mxu0 }
 0x929   :  { %v2994_v63 = vpop.f32.mrf.mxu0 }
 0x931   :  { %v3005_v21 = vpop.f32.mrf.mxu1  ;;  %v3047_v46 = vpop.f32.mrf.mxu0 }
 0x932   :  { %v3006_v9 = vadd.f32 %v3005_v21, %v2992_v53  ;;  %v3048_v8 = vadd.f32 %v3047_v46, %v5506_v32 }
 0x934   :  { %v6453_v25 = vadd.f32 %v3006_v9, %v6323_v47  ;;  %v7221_v9 = vld [vmem:[#allocation23_spill] sm:$0xff] }
 0x939   :  { %v3007_v26 = vpop.f32.mrf.mxu1  ;;  %v3049_v12 = vpop.f32.mrf.mxu0 }
 0x93a   :  { %v7223_v12 = vld [vmem:[#allocation26_spill] sm:$0xff] }
 0x941   :  { %v3060_v11 = vpop.f32.mrf.mxu1 }
 0x942   :  { %v3061_v58 = vadd.f32 %v3060_v11, %v3048_v8  ;;  %v7220_v8 = vld [vmem:[#allocation21_spill] sm:$0xff] }
 0x944   :  { %v3065_v42 = vmax.f32 %v3061_v58, 0.0 }
 0x946   :  { %v3066_v14 = vpack.c.bf16 %v3065_v42, %v3064_v43  ;;  %v7224_v42 = vld [vmem:[#allocation28_spill] sm:$0xff] }
 0x948   :  { %v3068_v52 = vunpack.c.l.b16 %v3066_v14  ;;  %v3069_v50 = vunpack.c.h.b16 %v3066_v14 }
 0x949   :  { %v3062_v34 = vpop.f32.mrf.mxu1 }
 0x94a   :  { %v6456_v35 = vpack.c.b16 %v3068_v52, %v3068_v52  ;;  %v6458_v63 = vpack.c.b16 %v3069_v50, %v3069_v50  ;;  %v7225_v50 = vld [vmem:[#allocation30_spill] sm:$0xff] }
 0x94c   :  { %3108 = vmatmul.bf16.vlgmr.msrb.gmra.mxu0 %v6456_v35  ;;  %3121 = vmatmul.bf16.vlgmr.msrb.gmra.mxu1 %v6458_v63 }
 0x94d   :  { %3340 = vmatpush.bf16.msrb.mxu0 %v5004_v3  ;;  %3353 = vmatpush.bf16.msrb.mxu1 %v5015_v7  ;;  %v6483_v3 = vld [vmem:[%s6592_s0 + $0x28] sm:$0xf]  ;;  %v4859_v7 = vld [vmem:[#allocation4 + $0x3b8] sm:$0xff] }
 0x94e   :  { %3311 = vmatpush.bf16.msra.mxu2 %v4859_v7 }
 0x951   :  { %3341 = vmatpush.bf16.msrb.mxu0 %v5042_v16  ;;  %3354 = vmatpush.bf16.msrb.mxu1 %v5044_v17  ;;  %v4867_v16 = vld [vmem:[#allocation4 + $0x3f8] sm:$0xff]  ;;  %v4858_v17 = vld [vmem:[#allocation4 + $0x3b0] sm:$0xff] }
 0x952   :  { %3324 = vmatpush.bf16.msra.mxu3 %v4867_v16  ;;  %3312 = vmatpush.bf16.msra.mxu2 %v4858_v17  ;;  %v7226_v16 = vld [vmem:[#allocation25_spill] sm:$0xff]  ;;  %v7227_v17 = vld [vmem:[#allocation32_spill] sm:$0xff] }
 0x955   :  { %3342 = vmatpush.bf16.msrb.mxu0 %v5079_v29  ;;  %3355 = vmatpush.bf16.msrb.mxu1 %v5092_v33  ;;  %v4866_v29 = vld [vmem:[#allocation4 + $0x3f0] sm:$0xff]  ;;  %v4857_v33 = vld [vmem:[#allocation4 + $0x3a8] sm:$0xff] }
 0x956   :  { %3325 = vmatpush.bf16.msra.mxu3 %v4866_v29  ;;  %3313 = vmatpush.bf16.msra.mxu2 %v4857_v33  ;;  %v7228_v29 = vld [vmem:[#allocation27_spill] sm:$0xff]  ;;  %v7229_v33 = vld [vmem:[#allocation34_spill] sm:$0xff] }
 0x959   :  { %3343 = vmatpush.bf16.msrb.mxu0 %v5124_v44  ;;  %3356 = vmatpush.bf16.msrb.mxu1 %v5128_v45  ;;  %v4865_v44 = vld [vmem:[#allocation4 + $0x3e8] sm:$0xff]  ;;  %v4856_v45 = vld [vmem:[#allocation4 + $0x3a0] sm:$0xff] }
 0x95a   :  { %3326 = vmatpush.bf16.msra.mxu3 %v4865_v44  ;;  %3314 = vmatpush.bf16.msra.mxu2 %v4856_v45  ;;  %v7230_v45 = vld [vmem:[#allocation53_spill] sm:$0xff] }
 0x95c   :  { %3160 = vmatmul.bf16.vlgmr.msra.gmra.mxu0 %v6456_v35  ;;  %3173 = vmatmul.bf16.vlgmr.msra.gmra.mxu1 %v6458_v63 }
 0x95d   :  { %3344 = vmatpush.bf16.msrb.mxu0 %v5160_v56  ;;  %3357 = vmatpush.bf16.msrb.mxu1 %v5164_v57  ;;  %v4864_v56 = vld [vmem:[#allocation4 + $0x3e0] sm:$0xff]  ;;  %v4855_v57 = vld [vmem:[#allocation4 + $0x398] sm:$0xff] }
 0x95e   :  { %3327 = vmatpush.bf16.msra.mxu3 %v4864_v56  ;;  %3315 = vmatpush.bf16.msra.mxu2 %v4855_v57  ;;  %v7231_v57 = vld [vmem:[#allocation29_spill] sm:$0xff] }
 0x961   :  { %3345 = vmatpush.bf16.msrb.mxu0 %v5196_v5  ;;  %3358 = vmatpush.bf16.msrb.mxu1 %v5200_v6  ;;  %v4863_v5 = vld [vmem:[#allocation4 + $0x3d8] sm:$0xff]  ;;  %v7198_v6 = vld [vmem:[#allocation44_spill] sm:$0xff] }
 0x962   :  { %3328 = vmatpush.bf16.msra.mxu3 %v4863_v5  ;;  %v7232_v5 = vld [vmem:[#allocation36_spill] sm:$0xff] }
 0x965   :  { %3346 = vmatpush.bf16.msrb.mxu0 %v5232_v23  ;;  %3359 = vmatpush.bf16.msrb.mxu1 %v5236_v24  ;;  %v4854_v23 = vld [vmem:[#allocation4 + $0x390] sm:$0xff]  ;;  %v7199_v24 = vld [vmem:[#allocation47_spill] sm:$0xff] }
 0x966   :  { %3316 = vmatpush.bf16.msra.mxu2 %v4854_v23  ;;  %v7233_v23 = vld [vmem:[#allocation31_spill] sm:$0xff] }
 0x969   :  { %3347 = vmatpush.bf16.msrb.mxu0 %v5268_v40  ;;  %3360 = vmatpush.bf16.msrb.mxu1 %v5272_v41  ;;  %v7200_v40 = vld [vmem:[#allocation48_spill] sm:$0xff]  ;;  %v4853_v41 = vld [vmem:[#allocation4 + $0x388] sm:$0xff] }
 0x96a   :  { %3317 = vmatpush.bf16.msra.mxu2 %v4853_v41 }
 0x96c   :  { %3348 = vmatmul.bf16.vlgmr.msrb.gmra.mxu0 %v6353_v62  ;;  %3361 = vmatmul.bf16.vlgmr.msrb.gmra.mxu1 %v6483_v3 }
 0x96d   :  { %3402 = vmatpush.bf16.msra.mxu0 %v5321_v54  ;;  %3415 = vmatpush.bf16.msra.mxu1 %v5323_v61  ;;  %v7201_v54 = vld [vmem:[#allocation51_spill] sm:$0xff]  ;;  %v7202_v61 = vld [vmem:[#allocation52_spill] sm:$0xff] }
 0x971   :  { %3403 = vmatpush.bf16.msra.mxu0 %v5337_v13  ;;  %3416 = vmatpush.bf16.msra.mxu1 %v5343_v22  ;;  %v4852_v13 = vld [vmem:[#allocation4 + $0x380] sm:$0xff]  ;;  %v7204_v22 = vld [vmem:[#allocation57_spill] sm:$0xff] }
 0x972   :  { %3318 = vmatpush.bf16.msra.mxu2 %v4852_v13  ;;  %v7238_v13 = vld [vmem:[#allocation35_spill] sm:$0xff] }
 0x975   :  { %3404 = vmatpush.bf16.msra.mxu0 %v5352_v37  ;;  %3417 = vmatpush.bf16.msra.mxu1 %v5358_v48  ;;  %v4862_v37 = vld [vmem:[#allocation4 + $0x3d0] sm:$0xff] }
 0x976   :  { %v7206_v48 = vld [vmem:[#allocation10_spill] sm:$0xff]  ;;  %3329 = vmatpush.bf16.msra.mxu3 %v4862_v37  ;;  %v7242_v37 = vld [vmem:[#allocation40_spill] sm:$0xff] }
 0x979   :  { %3405 = vmatpush.bf16.msra.mxu0 %v5364_v0  ;;  %3418 = vmatpush.bf16.msra.mxu1 %v5370_v19  ;;  %v4861_v0 = vld [vmem:[#allocation4 + $0x3c8] sm:$0xff]  ;;  %v7207_v19 = vld [vmem:[#allocation12_spill] sm:$0xff] }
 0x97a   :  { %3330 = vmatpush.bf16.msra.mxu3 %v4861_v0  ;;  %v7244_v0 = vld [vmem:[#allocation58_spill] sm:$0xff] }
 0x97d   :  { %3406 = vmatpush.bf16.msra.mxu0 %v5376_v39  ;;  %3419 = vmatpush.bf16.msra.mxu1 %v5382_v51  ;;  %v4860_v39 = vld [vmem:[#allocation4 + $0x3c0] sm:$0xff]  ;;  %v7208_v51 = vld [vmem:[#allocation14_spill] sm:$0xff] }
 0x97e   :  { %3331 = vmatpush.bf16.msra.mxu3 %v4860_v39 }
 0x981   :  { %3407 = vmatpush.bf16.msra.mxu0 %v5386_v60  ;;  %3420 = vmatpush.bf16.msra.mxu1 %v5390_v1  ;;  %v7209_v60 = vld [vmem:[#allocation9_spill] sm:$0xff]  ;;  %v7210_v1 = vld [vmem:[#allocation16_spill] sm:$0xff] }
 0x982   :  { %3379 = vmatpush.bf16.msrb.mxu3 %v7209_v60  ;;  %v7247_v60 = vld [vmem:[#allocation66_spill] sm:$0xff] }
 0x985   :  { %3408 = vmatpush.bf16.msra.mxu0 %v5393_v28  ;;  %3421 = vmatpush.bf16.msra.mxu1 %v5396_v30  ;;  %v7211_v28 = vld [vmem:[#allocation11_spill] sm:$0xff]  ;;  %v7212_v30 = vld [vmem:[#allocation18_spill] sm:$0xff] }
 0x986   :  { %3380 = vmatpush.bf16.msrb.mxu3 %v7211_v28  ;;  %v7248_v28 = vld [vmem:[#allocation50_spill] sm:$0xff] }
 0x989   :  { %3409 = vmatpush.bf16.msra.mxu0 %v5399_v18  ;;  %3422 = vmatpush.bf16.msra.mxu1 %v5402_v4  ;;  %v7203_v18 = vld [vmem:[#allocation56_spill] sm:$0xff]  ;;  %v7213_v4 = vld [vmem:[#allocation13_spill] sm:$0xff] }
 0x98a   :  { %3381 = vmatpush.bf16.msrb.mxu3 %v7213_v4 }
 0x98c   :  { %3410 = vmatmul.bf16.vlgmr.msra.gmra.mxu0 %v6456_v35  ;;  %3423 = vmatmul.bf16.vlgmr.msra.gmra.mxu1 %v6458_v63 }
 0x98d   :  { %3454 = vmatpush.bf16.msrb.mxu0 %v5404_v15  ;;  %3467 = vmatpush.bf16.msrb.mxu1 %v5406_v20  ;;  %v7214_v15 = vld [vmem:[#allocation20_spill] sm:$0xff]  ;;  %v7215_v20 = vld [vmem:[#allocation15_spill] sm:$0xff] }
 0x98e   :  { %3382 = vmatpush.bf16.msrb.mxu3 %v7215_v20  ;;  %v7251_v20 = vld [vmem:[#allocation64_spill] sm:$0xff] }
 0x991   :  { %3455 = vmatpush.bf16.msrb.mxu0 %v5417_v55  ;;  %3468 = vmatpush.bf16.msrb.mxu1 %v5420_v36  ;;  %v7205_v36 = vld [vmem:[#allocation8_spill] sm:$0xff]  ;;  %v7217_v55 = vld [vmem:[#allocation17_spill] sm:$0xff] }
 0x992   :  { %3366 = vmatpush.bf16.msrb.mxu2 %v7205_v36  ;;  %3383 = vmatpush.bf16.msrb.mxu3 %v7217_v55  ;;  %v7241_v36 = vld [vmem:[#allocation54_spill] sm:$0xff] }
 0x995   :  { %3456 = vmatpush.bf16.msrb.mxu0 %v5429_v49  ;;  %3469 = vmatpush.bf16.msrb.mxu1 %v5432_v59  ;;  %v7216_v49 = vld [vmem:[#allocation22_spill] sm:$0xff] }
 0x996   :  { %3367 = vmatpush.bf16.msrb.mxu2 %v7206_v48  ;;  %v7243_v48 = vld [vmem:[#allocation42_spill] sm:$0xff] }
 0x999   :  { %3457 = vmatpush.bf16.msrb.mxu0 %v5441_v27  ;;  %3470 = vmatpush.bf16.msrb.mxu1 %v6836_v31  ;;  %v7218_v27 = vld [vmem:[#allocation19_spill] sm:$0xff] }
 0x99a   :  { %3368 = vmatpush.bf16.msrb.mxu2 %v7207_v19  ;;  %3384 = vmatpush.bf16.msrb.mxu3 %v7218_v27  ;;  %v7245_v19 = vld [vmem:[#allocation46_spill] sm:$0xff]  ;;  %v7252_v27 = vld [vmem:[#allocation59_spill] sm:$0xff] }
 0x99d   :  { %3458 = vmatpush.bf16.msrb.mxu0 %v6896_v2  ;;  %3471 = vmatpush.bf16.msrb.mxu1 %v7198_v6  ;;  %v7219_v2 = vld [vmem:[#allocation38_spill] sm:$0xff] }
 0x99e   :  { %3369 = vmatpush.bf16.msrb.mxu2 %v7208_v51  ;;  %3385 = vmatpush.bf16.msrb.mxu3 %v7220_v8  ;;  %v7256_v8 = vld [vmem:[#allocation67_spill] sm:$0xff] }
 0x9a1   :  { %3459 = vmatpush.bf16.msrb.mxu0 %v7199_v24  ;;  %3472 = vmatpush.bf16.msrb.mxu1 %v7200_v40  ;;  %v7235_v24 = vld [vmem:[#allocation41_spill] sm:$0xff] }
 0x9a2   :  { %3370 = vmatpush.bf16.msrb.mxu2 %v7210_v1  ;;  %3386 = vmatpush.bf16.msrb.mxu3 %v7221_v9 }
 0x9a5   :  { %3460 = vmatpush.bf16.msrb.mxu0 %v7201_v54  ;;  %3473 = vmatpush.bf16.msrb.mxu1 %v7202_v61  ;;  %v7236_v54 = vld [vmem:[#allocation33_spill] sm:$0xff] }
 0x9a6   :  { %3371 = vmatpush.bf16.msrb.mxu2 %v7212_v30  ;;  %v7237_v61 = vld [vmem:[#allocation45_spill] sm:$0xff]  ;;  %v7249_v30 = vld [vmem:[#allocation62_spill] sm:$0xff] }
 0x9a9   :  { %3461 = vmatpush.bf16.msrb.mxu0 %v7203_v18  ;;  %3474 = vmatpush.bf16.msrb.mxu1 %v7204_v22  ;;  %v7239_v18 = vld [vmem:[#allocation49_spill] sm:$0xff] }
 0x9aa   :  { %3372 = vmatpush.bf16.msrb.mxu2 %v7214_v15  ;;  %v7240_v22 = vld [vmem:[#allocation37_spill] sm:$0xff]  ;;  %v7250_v15 = vld [vmem:[#allocation55_spill] sm:$0xff] }
 0x9ac   :  { %3462 = vmatmul.bf16.vlgmr.msrb.gmra.mxu0 %v6456_v35  ;;  %3475 = vmatmul.bf16.vlgmr.msrb.gmra.mxu1 %v6458_v63  ;;  %v7222_v35 = vld [vmem:[#allocation24_spill] sm:$0xff] }
 0x9ae   :  { %3373 = vmatpush.bf16.msrb.mxu2 %v7216_v49 }
 0x9c9   :  { %v3109_v59 = vpop.f32.mrf.mxu0  ;;  %v3122_v31 = vpop.f32.mrf.mxu1 }
 0x9ca   :  { %v3110_v47 = vadd.f32 %v3109_v59, %v7219_v2  ;;  %v7253_v59 = vld [vmem:[#allocation61_spill] sm:$0xff] }
 0x9cb   :  { %v7255_v2 = vld [vmem:[#allocation65_spill] sm:$0xff] }
 0x9cc   :  { %v3123_v58 = vadd.f32 %v3122_v31, %v3110_v47  ;;  %v7254_v31 = vld [vmem:[#allocation63_spill] sm:$0xff] }
 0x9ce   :  { %v3178_v11 = vmax.f32 %v3123_v58, 0.0 }
 0x9d0   :  { %v3180_v53 = vpack.c.bf16 %v3178_v11, %v3178_v11 }
 0x9d1   :  { %v3111_v43 = vpop.f32.mrf.mxu0  ;;  %v3124_v10 = vpop.f32.mrf.mxu1 }
 0x9d2   :  { %3319 = vmatmul.bf16.vlgmr.msra.gmra.mxu2 %v3180_v53 }
 0x9d3   :  { %3428 = vmatpush.bf16.msra.mxu2 %v7222_v35 }
 0x9d7   :  { %3429 = vmatpush.bf16.msra.mxu2 %v7223_v12 }
 0x9d9   :  { %v3161_v26 = vpop.f32.mrf.mxu0  ;;  %v3174_v21 = vpop.f32.mrf.mxu1 }
 0x9da   :  { %v3162_v46 = vadd.f32 %v3161_v26, %v6450_v38 }
 0x9db   :  { %3430 = vmatpush.bf16.msra.mxu2 %v7224_v42 }
 0x9dc   :  { %v3175_v14 = vadd.f32 %v3174_v21, %v3162_v46 }
 0x9de   :  { %v3179_v52 = vmax.f32 %v3175_v14, 0.0 }
 0x9df   :  { %3431 = vmatpush.bf16.msra.mxu2 %v7225_v50  ;;  %v4883_v50 = vld [vmem:[#allocation4 + $0x478] sm:$0xff] }
 0x9e0   :  { %v3181_v34 = vpack.c.bf16 %v3179_v52, %v3179_v52  ;;  %v4875_v52 = vld [vmem:[#allocation4 + $0x438] sm:$0xff]  ;;  %3652 = vmatpush.bf16.msra.mxu1 %v4883_v50 }
 0x9e1   :  { %v3163_v63 = vpop.f32.mrf.mxu0  ;;  %v3176_v7 = vpop.f32.mrf.mxu1  ;;  %3639 = vmatpush.bf16.msra.mxu0 %v4875_v52 }
 0x9e2   :  { %3332 = vmatmul.bf16.vlgmr.msra.gmra.mxu3 %v3181_v34  ;;  %3374 = vmatmul.bf16.vlgmr.msrb.gmra.mxu2 %v6353_v62  ;;  %v7234_v62 = vld [vmem:[#allocation39_spill] sm:$0xff]  ;;  %v4874_v63 = vld [vmem:[#allocation4 + $0x430] sm:$0xff] }
 0x9e3   :  { %3441 = vmatpush.bf16.msra.mxu3 %v7226_v16  ;;  %3432 = vmatpush.bf16.msra.mxu2 %v7227_v17  ;;  %v4882_v7 = vld [vmem:[#allocation4 + $0x470] sm:$0xff] }
 0x9e4   :  { %3653 = vmatpush.bf16.msra.mxu1 %v4882_v7 }
 0x9e5   :  { %3640 = vmatpush.bf16.msra.mxu0 %v4874_v63 }
 0x9e7   :  { %3442 = vmatpush.bf16.msra.mxu3 %v7228_v29  ;;  %3433 = vmatpush.bf16.msra.mxu2 %v7229_v33  ;;  %v4873_v33 = vld [vmem:[#allocation4 + $0x428] sm:$0xff] }
 0x9e9   :  { %v3349_v38 = vpop.f32.mrf.mxu0  ;;  %v3362_v44 = vpop.f32.mrf.mxu1  ;;  %3641 = vmatpush.bf16.msra.mxu0 %v4873_v33 }
 0x9ea   :  { %v3350_v56 = vadd.f32 %v3349_v38, %v7230_v45 }
 0x9eb   :  { %3443 = vmatpush.bf16.msra.mxu3 %v7231_v57  ;;  %3434 = vmatpush.bf16.msra.mxu2 %v7232_v5 }
 0x9ec   :  { %v3363_v6 = vadd.f32 %v3362_v44, %v3350_v56 }
 0x9ee   :  { %v3392_v17 = vmax.f32 %v3363_v6, 0.0  ;;  %v4869_v6 = vld [vmem:[#allocation4 + $0x408] sm:$0xff] }
 0x9ef   :  { %3444 = vmatpush.bf16.msra.mxu3 %v7233_v23  ;;  %3435 = vmatpush.bf16.msra.mxu2 %v7234_v62  ;;  %v4870_v62 = vld [vmem:[#allocation4 + $0x410] sm:$0xff] }
 0x9f1   :  { %v3351_v40 = vpop.f32.mrf.mxu0  ;;  %v3364_v41 = vpop.f32.mrf.mxu1 }
 0x9f2   :  { %3387 = vmatmul.bf16.vlgmr.msrb.gmra.mxu3 %v6483_v3  ;;  %v7246_v3 = vld [vmem:[#allocation60_spill] sm:$0xff] }
 0x9f3   :  { %3480 = vmatpush.bf16.msrb.mxu2 %v7235_v24  ;;  %3445 = vmatpush.bf16.msra.mxu3 %v7236_v54  ;;  %v4881_v24 = vld [vmem:[#allocation4 + $0x468] sm:$0xff]  ;;  %v4868_v40 = vld [vmem:[#allocation4 + $0x400] sm:$0xff]  ;;  %v4879_v54 = vld [vmem:[#allocation4 + $0x458] sm:$0xff] }
 0x9f4   :  { %3654 = vmatpush.bf16.msra.mxu1 %v4881_v24  ;;  %v4880_v41 = vld [vmem:[#allocation4 + $0x460] sm:$0xff] }
 0x9f7   :  { %3481 = vmatpush.bf16.msrb.mxu2 %v7237_v61  ;;  %3446 = vmatpush.bf16.msra.mxu3 %v7238_v13  ;;  %v4878_v61 = vld [vmem:[#allocation4 + $0x450] sm:$0xff]  ;;  %v4877_v13 = vld [vmem:[#allocation4 + $0x448] sm:$0xff] }
 0x9f8   :  { %3655 = vmatpush.bf16.msra.mxu1 %v4880_v41 }
 0x9fb   :  { %3482 = vmatpush.bf16.msrb.mxu2 %v7239_v18  ;;  %3447 = vmatpush.bf16.msra.mxu3 %v7240_v22  ;;  %v4876_v18 = vld [vmem:[#allocation4 + $0x440] sm:$0xff] }
 0x9fc   :  { %3656 = vmatpush.bf16.msra.mxu1 %v4879_v54 }
 0x9ff   :  { %3483 = vmatpush.bf16.msrb.mxu2 %v7241_v36  ;;  %3448 = vmatpush.bf16.msra.mxu3 %v7242_v37 }
 0xa00   :  { %3657 = vmatpush.bf16.msra.mxu1 %v4878_v61 }
 0xa03   :  { %3493 = vmatpush.bf16.msrb.mxu3 %v7243_v48  ;;  %3484 = vmatpush.bf16.msrb.mxu2 %v7244_v0 }
 0xa04   :  { %3658 = vmatpush.bf16.msra.mxu1 %v4877_v13 }
 0xa07   :  { %3494 = vmatpush.bf16.msrb.mxu3 %v7245_v19  ;;  %3485 = vmatpush.bf16.msrb.mxu2 %v7246_v3 }
 0xa08   :  { %3659 = vmatpush.bf16.msra.mxu1 %v4876_v18 }
 0xa09   :  { %v3411_v39 = vpop.f32.mrf.mxu0  ;;  %v3424_v51 = vpop.f32.mrf.mxu1 }
 0xa0a   :  { %v3412_v1 = vadd.f32 %v3411_v39, %v7247_v60 }
 0xa0b   :  { %3495 = vmatpush.bf16.msrb.mxu3 %v7248_v28  ;;  %3486 = vmatpush.bf16.msrb.mxu2 %v7249_v30 }
 0xa0c   :  { %v6571_v4 = vadd.f32 %v3424_v51, %v3412_v1 }
 0xa0f   :  { %3496 = vmatpush.bf16.msrb.mxu3 %v7250_v15  ;;  %3487 = vmatpush.bf16.msrb.mxu2 %v7251_v20 }
 0xa11   :  { %v3413_v49 = vpop.f32.mrf.mxu0  ;;  %v3426_v55 = vpop.f32.mrf.mxu1 }
 0xa13   :  { %3497 = vmatpush.bf16.msrb.mxu3 %v7252_v27 }
 0xa17   :  { %3498 = vmatpush.bf16.msrb.mxu3 %v7253_v59 }
 0xa1b   :  { %3499 = vmatpush.bf16.msrb.mxu3 %v7254_v31 }
 0xa1f   :  { %3500 = vmatpush.bf16.msrb.mxu3 %v7255_v2 }
 0xa29   :  { %v3463_v47 = vpop.f32.mrf.mxu0  ;;  %v3476_v58 = vpop.f32.mrf.mxu1 }
 0xa2a   :  { %v3464_v11 = vadd.f32 %v3463_v47, %v7256_v8 }
 0xa2c   :  { %v6580_v53 = vadd.f32 %v3476_v58, %v3464_v11 }
 0xa31   :  { %v3465_v9 = vpop.f32.mrf.mxu0  ;;  %v3478_v43 = vpop.f32.mrf.mxu1 }
 0xa55   :  { %v3320_v10 = vpop.f32.mrf.mxu2 }
 0xa5d   :  { %v3322_v35 = vpop.f32.mrf.mxu2 }
 0xa65   :  { %v3333_v12 = vpop.f32.mrf.mxu3  ;;  %v3375_v26 = vpop.f32.mrf.mxu2 }
 0xa66   :  { %v3334_v21 = vadd.f32 %v3333_v12, %v3320_v10  ;;  %v3376_v34 = vadd.f32 %v3375_v26, %v5506_v32  ;;  %v4871_v32 = vld [vmem:[#allocation4 + $0x418] sm:$0xff] }
 0xa68   :  { %v6583_v46 = vadd.f32 %v3334_v21, %v6453_v25  ;;  %v4872_v25 = vld [vmem:[#allocation4 + $0x420] sm:$0xff] }
 0xa69   :  { %3642 = vmatpush.bf16.msra.mxu0 %v4872_v25 }
 0xa6d   :  { %v3335_v42 = vpop.f32.mrf.mxu3  ;;  %v3377_v14 = vpop.f32.mrf.mxu2  ;;  %3643 = vmatpush.bf16.msra.mxu0 %v4871_v32 }
 0xa71   :  { %3644 = vmatpush.bf16.msra.mxu0 %v4870_v62 }
 0xa75   :  { %v3388_v16 = vpop.f32.mrf.mxu3  ;;  %3645 = vmatpush.bf16.msra.mxu0 %v4869_v6 }
 0xa76   :  { %v3389_v29 = vadd.f32 %v3388_v16, %v3376_v34 }
 0xa78   :  { %v3393_v38 = vmax.f32 %v3389_v29, 0.0 }
 0xa79   :  { %3646 = vmatpush.bf16.msra.mxu0 %v4868_v40 }
 0xa7a   :  { %v3394_v44 = vpack.c.bf16 %v3393_v38, %v3392_v17 }
 0xa7c   :  { %v3396_v45 = vunpack.c.l.b16 %v3394_v44  ;;  %v3397_v56 = vunpack.c.h.b16 %v3394_v44 }
 0xa7d   :  { %v3390_v57 = vpop.f32.mrf.mxu3 }
 0xa7e   :  { %v3398_v5 = vpack.c.b16 %v3396_v45, %v3396_v45  ;;  %v3399_v23 = vpack.c.b16 %v3397_v56, %v3397_v56 }
 0xa80   :  { %3436 = vmatmul.bf16.vlgmr.msra.gmra.mxu2 %v3398_v5  ;;  %3449 = vmatmul.bf16.vlgmr.msra.gmra.mxu3 %v3399_v23 }
 0xa90   :  { %3488 = vmatmul.bf16.vlgmr.msrb.gmra.mxu2 %v3398_v5  ;;  %3501 = vmatmul.bf16.vlgmr.msrb.gmra.mxu3 %v3399_v23 }
 0xb03   :  { %v3437_v22 = vpop.f32.mrf.mxu2  ;;  %v3450_v36 = vpop.f32.mrf.mxu3 }
 0xb04   :  { %v3438_v37 = vadd.f32 %v3437_v22, %v6571_v4 }
 0xb06   :  { %v3451_v48 = vadd.f32 %v3450_v36, %v3438_v37 }
 0xb08   :  { %v3506_v0 = vmax.f32 %v3451_v48, 0.0 }
 0xb0a   :  { %v3508_v19 = vpack.c.bf16 %v3506_v0, %v3506_v0 }
 0xb0b   :  { %v3439_v3 = vpop.f32.mrf.mxu2  ;;  %v3452_v39 = vpop.f32.mrf.mxu3 }
 0xb0c   :  { %3647 = vmatmul.bf16.vlgmr.msra.gmra.mxu0 %v3508_v19 }
 0xb13   :  { %v3489_v51 = vpop.f32.mrf.mxu2  ;;  %v3502_v60 = vpop.f32.mrf.mxu3 }
 0xb14   :  { %v3490_v1 = vadd.f32 %v3489_v51, %v6580_v53 }
 0xb16   :  { %v3503_v28 = vadd.f32 %v3502_v60, %v3490_v1 }
 0xb18   :  { %v3507_v30 = vmax.f32 %v3503_v28, 0.0 }
 0xb1a   :  { %v3509_v15 = vpack.c.bf16 %v3507_v30, %v3507_v30 }
 0xb1b   :  { %v3491_v20 = vpop.f32.mrf.mxu2  ;;  %v3504_v49 = vpop.f32.mrf.mxu3 }
 0xb1c   :  { %3660 = vmatmul.bf16.vlgmr.msra.gmra.mxu1 %v3509_v15 }
 0xb89   :  { %v3648_v55 = vpop.f32.mrf.mxu0 }
 0xb91   :  { %v3650_v27 = vpop.f32.mrf.mxu0 }
 0xb99   :  { %v3661_v59 = vpop.f32.mrf.mxu1 }
 0xb9a   :  { %v3662_v4 = vadd.f32 %v3661_v59, %v3648_v55 }
 0xb9c   :  { %v3665_v31 = vadd.f32 %v3662_v4, %v6583_v46 }
 0xb9e   :  { %v3666_v2 = vmax.f32 %v3665_v31, 0.0 }
 0xba0   :  { %3667 = vst [vmem:[%s6599_s7] sm:$0xff] %v3666_v2 }
 0xba1   :  { %v3663_v47 = vpop.f32.mrf.mxu1 }
 0xba2   :  { %3672 = vsyncpa [#allocation3], 1 }
 0xba3   :  { %3673 = vsyncpa [#allocation5], 1 }

</bundles_post_ra>
